<compile_context>
chip_gen: v7x
topology: tpu7x:2x2x1
jax: 0.10.0
libtpu: 0.0.40
codegen_flags: <defaults>
</compile_context>

<pallas_src>
import functools
import math

import jax
import jax.numpy as jnp
from jax.experimental import pallas as pl
from jax.experimental.pallas import tpu as pltpu

# ---- scaled-down RoBERTa config (roberta-base would be H=768, 12 layers, 12 heads) ----
B, S = 2, 8                  # batch, sequence length
H, NH, DH = 64, 4, 16        # hidden, num heads, head dim
FF = 4 * H                   # feed-forward intermediate dim
N_LAYERS = 2
VOCAB = 50
PAD_ID = 1                   # RoBERTa padding_idx
MAX_POS = S + 2
TYPE_VOCAB = 2
NUM_CLASSES = 3
NC_PAD = 128                 # classifier output padded to a full lane width
LN_EPS = 1e-5


# ----------------------------- fused Pallas kernel -----------------------------

def _layernorm(x, g, b):
    mean = jnp.mean(x, axis=-1, keepdims=True)
    var = jnp.mean((x - mean) * (x - mean), axis=-1, keepdims=True)
    return (x - mean) * jax.lax.rsqrt(var + LN_EPS) * g + b


def _gelu(x):
    # TODO(synk): RoBERTa uses exact erf-GELU; tanh approximation used here.
    return 0.5 * x * (1.0 + jnp.tanh(0.7978845608028654 * (x + 0.044715 * x * x * x)))


def _fused_forward_kernel(
    emb_ref, bias_ref,                       # (B*S, H), (B, S)
    emb_ln_g_ref, emb_ln_b_ref,              # (1, H)
    qkv_w_ref, qkv_b_ref,                    # (L, H, 3H), (L, 1, 3H)
    o_w_ref, o_b_ref,                        # (L, H, H), (L, 1, H)
    ln1_g_ref, ln1_b_ref,                    # (L, 1, H)
    i_w_ref, i_b_ref,                        # (L, H, FF), (L, 1, FF)
    f_w_ref, f_b_ref,                        # (L, FF, H), (L, 1, H)
    ln2_g_ref, ln2_b_ref,                    # (L, 1, H)
    pre_w_ref, pre_b_ref,                    # (H, H), (1, H)
    cls_w_ref, cls_b_ref,                    # (H, NC_PAD), (1, NC_PAD)
    out_ref,                                 # (B, NC_PAD)
    *, scale):
    x = _layernorm(emb_ref[...], emb_ln_g_ref[...], emb_ln_b_ref[...])   # (B*S, H)
    bias = bias_ref[...]                                                 # (B, S)

    for l in range(N_LAYERS):                # static unroll; weights stay VMEM-resident
        # ---- fused QKV projection: one MXU op, 192-lane output ----
        qkv = jnp.dot(x, qkv_w_ref[l], preferred_element_type=jnp.float32) + qkv_b_ref[l]
        q = qkv[:, :H]
        k = qkv[:, H:2 * H]
        v = qkv[:, 2 * H:]

        # ---- attention: all (batch, head) pairs in this single invocation ----
        ctx_rows = []
        for b in range(B):
            qb = q[b * S:(b + 1) * S, :]
            kb = k[b * S:(b + 1) * S, :]
            vb = v[b * S:(b + 1) * S, :]
            bias_b = bias[b:b + 1, :]                                    # (1, S) key-side mask
            head_ctx = []
            for h in range(NH):
                qh = qb[:, h * DH:(h + 1) * DH]
                kh = kb[:, h * DH:(h + 1) * DH]
                vh = vb[:, h * DH:(h + 1) * DH]
                s = jax.lax.dot_general(qh, kh, (((1,), (1,)), ((), ())),
                                        preferred_element_type=jnp.float32) * scale
                s = s + bias_b
                m = jnp.max(s, axis=-1, keepdims=True)
                p = jnp.exp(s - m)
                p = p * pl.reciprocal(jnp.sum(p, axis=-1, keepdims=True), approx=True)
                head_ctx.append(jnp.dot(p, vh, preferred_element_type=jnp.float32))
            ctx_rows.append(jnp.concatenate(head_ctx, axis=-1))          # (S, H)
        ctx = jnp.concatenate(ctx_rows, axis=0)                          # (B*S, H)

        # ---- output projection + residual layernorm ----
        attn_out = jnp.dot(ctx, o_w_ref[l], preferred_element_type=jnp.float32) + o_b_ref[l]
        x = _layernorm(attn_out + x, ln1_g_ref[l], ln1_b_ref[l])

        # ---- feed-forward + residual layernorm ----
        ff = _gelu(jnp.dot(x, i_w_ref[l], preferred_element_type=jnp.float32) + i_b_ref[l])
        ff = jnp.dot(ff, f_w_ref[l], preferred_element_type=jnp.float32) + f_b_ref[l]
        x = _layernorm(ff + x, ln2_g_ref[l], ln2_b_ref[l])

    # ---- pooler (first token of each sequence) + classifier head ----
    pooler = jnp.concatenate([x[b * S:b * S + 1, :] for b in range(B)], axis=0)   # (B, H)
    pooler = jnp.maximum(
        jnp.dot(pooler, pre_w_ref[...], preferred_element_type=jnp.float32) + pre_b_ref[...],
        0.0)
    # TODO(synk): Dropout(0.3) is identity in eval mode; training-mode RNG mask not implemented.
    out_ref[...] = jnp.dot(pooler, cls_w_ref[...],
                           preferred_element_type=jnp.float32) + cls_b_ref[...]


# ----------------------------- model (glue + single kernel call) -----------------------------

def init_params(seed=0):
    keys = iter(jax.random.split(jax.random.PRNGKey(seed), 128))

    def nrm(shape):
        return 0.02 * jax.random.normal(next(keys), shape, jnp.float32)

    params = {
        "word_emb": nrm((VOCAB, H)),
        "pos_emb": nrm((MAX_POS, H)),
        "type_emb": nrm((TYPE_VOCAB, H)),
        "emb_ln_g": jnp.ones((H,), jnp.float32),
        "emb_ln_b": jnp.zeros((H,), jnp.float32),
        "layers": [],
        # nn.Linear(NUM_DIM, NUM_DIM) / nn.Linear(NUM_DIM, NUM_CLASSES); weights stored (in, out)
        "pre_w": nrm((H, H)), "pre_b": jnp.zeros((H,), jnp.float32),
        "cls_w": nrm((H, NUM_CLASSES)), "cls_b": jnp.zeros((NUM_CLASSES,), jnp.float32),
    }
    for _ in range(N_LAYERS):
        params["layers"].append({
            "q_w": nrm((H, H)), "q_b": jnp.zeros((H,), jnp.float32),
            "k_w": nrm((H, H)), "k_b": jnp.zeros((H,), jnp.float32),
            "v_w": nrm((H, H)), "v_b": jnp.zeros((H,), jnp.float32),
            "o_w": nrm((H, H)), "o_b": jnp.zeros((H,), jnp.float32),
            "ln1_g": jnp.ones((H,), jnp.float32), "ln1_b": jnp.zeros((H,), jnp.float32),
            "i_w": nrm((H, FF)), "i_b": jnp.zeros((FF,), jnp.float32),
            "f_w": nrm((FF, H)), "f_b": jnp.zeros((H,), jnp.float32),
            "ln2_g": jnp.ones((H,), jnp.float32), "ln2_b": jnp.zeros((H,), jnp.float32),
        })
    return params


def roberta_forward(params, input_ids, attention_mask, token_type_ids):
    # RoBERTa position ids: cumsum over non-pad mask, offset by padding_idx.
    not_pad = (input_ids != PAD_ID).astype(jnp.int32)
    position_ids = jnp.cumsum(not_pad, axis=1) * not_pad + PAD_ID

    we = jnp.take(params["word_emb"], input_ids, axis=0)       # (B,S,H)
    pe = jnp.take(params["pos_emb"], position_ids, axis=0)
    te = jnp.take(params["type_emb"], token_type_ids, axis=0)
    emb = (we + pe + te).reshape(B * S, H)

    # additive attention mask bias over keys: 0 for real tokens, -1e9 for padding
    bias = (1.0 - attention_mask.astype(jnp.float32)) * -1e9   # (B, S)

    layers = params["layers"]
    stk = lambda key: jnp.stack([l[key] for l in layers], axis=0)
    stk_b = lambda key: jnp.stack([l[key].reshape(1, -1) for l in layers], axis=0)

    # merged Q/K/V weights: (L, H, 3H) / (L, 1, 3H)
    qkv_w = jnp.stack(
        [jnp.concatenate([l["q_w"], l["k_w"], l["v_w"]], axis=1) for l in layers], axis=0)
    qkv_b = jnp.stack(
        [jnp.concatenate([l["q_b"], l["k_b"], l["v_b"]]).reshape(1, 3 * H) for l in layers],
        axis=0)

    # lane-dense padded classifier head (zeros in the padded lanes -> logits unchanged)
    cls_w = jnp.zeros((H, NC_PAD), jnp.float32).at[:, :NUM_CLASSES].set(params["cls_w"])
    cls_b = jnp.zeros((1, NC_PAD), jnp.float32).at[0, :NUM_CLASSES].set(params["cls_b"])

    vmem = pl.BlockSpec(memory_space=pltpu.MemorySpace.VMEM)
    logits_pad = pl.pallas_call(
        functools.partial(_fused_forward_kernel, scale=1.0 / math.sqrt(DH)),
        out_shape=jax.ShapeDtypeStruct((B, NC_PAD), jnp.float32),
        in_specs=[vmem] * 20,
        out_specs=vmem,
    )(
        emb, bias,
        params["emb_ln_g"].reshape(1, H), params["emb_ln_b"].reshape(1, H),
        qkv_w, qkv_b,
        stk("o_w"), stk_b("o_b"),
        stk_b("ln1_g"), stk_b("ln1_b"),
        stk("i_w"), stk_b("i_b"),
        stk("f_w"), stk_b("f_b"),
        stk_b("ln2_g"), stk_b("ln2_b"),
        params["pre_w"], params["pre_b"].reshape(1, H),
        cls_w, cls_b,
    )
    return logits_pad[:, :NUM_CLASSES]                          # (B, NUM_CLASSES)


if __name__ == "__main__":
    params = init_params(seed=0)

    key = jax.random.PRNGKey(0)
    k_ids, _ = jax.random.split(key)
    input_ids = jax.random.randint(k_ids, (B, S), 2, VOCAB, dtype=jnp.int32)
    attention_mask = jnp.ones((B, S), jnp.int32)
    # pad the tail of the second sequence to exercise masking
    input_ids = input_ids.at[1, -2:].set(PAD_ID)
    attention_mask = attention_mask.at[1, -2:].set(0)
    token_type_ids = jnp.zeros((B, S), jnp.int32)

    logits = jax.jit(roberta_forward)(params, input_ids, attention_mask, token_type_ids)
    jax.block_until_ready(logits)
    assert logits.shape == (B, NUM_CLASSES) and logits.dtype == jnp.float32
    print("KERNEL_OK")
</pallas_src>

<mosaic_0001>
module attributes {stable_mosaic.version = 11 : i64} {
  func.func @_fused_forward_kernel(%arg0: memref<16x64xf32, #tpu.memory_space<vmem>>, %arg1: memref<2x8xf32, #tpu.memory_space<vmem>>, %arg2: memref<1x64xf32, #tpu.memory_space<vmem>>, %arg3: memref<1x64xf32, #tpu.memory_space<vmem>>, %arg4: memref<2x64x192xf32, #tpu.memory_space<vmem>>, %arg5: memref<2x1x192xf32, #tpu.memory_space<vmem>>, %arg6: memref<2x64x64xf32, #tpu.memory_space<vmem>>, %arg7: memref<2x1x64xf32, #tpu.memory_space<vmem>>, %arg8: memref<2x1x64xf32, #tpu.memory_space<vmem>>, %arg9: memref<2x1x64xf32, #tpu.memory_space<vmem>>, %arg10: memref<2x64x256xf32, #tpu.memory_space<vmem>>, %arg11: memref<2x1x256xf32, #tpu.memory_space<vmem>>, %arg12: memref<2x256x64xf32, #tpu.memory_space<vmem>>, %arg13: memref<2x1x64xf32, #tpu.memory_space<vmem>>, %arg14: memref<2x1x64xf32, #tpu.memory_space<vmem>>, %arg15: memref<2x1x64xf32, #tpu.memory_space<vmem>>, %arg16: memref<64x64xf32, #tpu.memory_space<vmem>>, %arg17: memref<1x64xf32, #tpu.memory_space<vmem>>, %arg18: memref<64x128xf32, #tpu.memory_space<vmem>>, %arg19: memref<1x128xf32, #tpu.memory_space<vmem>>, %arg20: memref<2x128xf32, #tpu.memory_space<vmem>>) attributes {dimension_semantics = [], scalar_prefetch = 0 : i64, scratch_operands = 0 : i64, tpu.core_type = #tpu.core_type<tc>} {
    %c0 = arith.constant 0 : index
    %c0_0 = arith.constant 0 : index
    %0 = vector.load %arg0[%c0, %c0_0] : memref<16x64xf32, #tpu.memory_space<vmem>>, vector<16x64xf32>
    %c0_1 = arith.constant 0 : index
    %c0_2 = arith.constant 0 : index
    %1 = vector.load %arg2[%c0_1, %c0_2] : memref<1x64xf32, #tpu.memory_space<vmem>>, vector<1x64xf32>
    %c0_3 = arith.constant 0 : index
    %c0_4 = arith.constant 0 : index
    %2 = vector.load %arg3[%c0_3, %c0_4] : memref<1x64xf32, #tpu.memory_space<vmem>>, vector<1x64xf32>
    %cst = arith.constant dense<0.000000e+00> : vector<16xf32>
    %3 = vector.multi_reduction <add>, %0, %cst [1] : vector<16x64xf32> to vector<16xf32>
    %4 = vector.shape_cast %3 : vector<16xf32> to vector<16x1xf32>
    %cst_5 = arith.constant 6.400000e+01 : f32
    %5 = vector.broadcast %cst_5 : f32 to vector<16x1xf32>
    %6 = arith.divf %4, %5 : vector<16x1xf32>
    %7 = vector.broadcast %6 : vector<16x1xf32> to vector<16x64xf32>
    %8 = arith.subf %0, %7 : vector<16x64xf32>
    %9 = vector.broadcast %6 : vector<16x1xf32> to vector<16x64xf32>
    %10 = arith.subf %0, %9 : vector<16x64xf32>
    %11 = arith.mulf %8, %10 : vector<16x64xf32>
    %cst_6 = arith.constant dense<0.000000e+00> : vector<16xf32>
    %12 = vector.multi_reduction <add>, %11, %cst_6 [1] : vector<16x64xf32> to vector<16xf32>
    %13 = vector.shape_cast %12 : vector<16xf32> to vector<16x1xf32>
    %cst_7 = arith.constant 6.400000e+01 : f32
    %14 = vector.broadcast %cst_7 : f32 to vector<16x1xf32>
    %15 = arith.divf %13, %14 : vector<16x1xf32>
    %16 = vector.broadcast %6 : vector<16x1xf32> to vector<16x64xf32>
    %17 = arith.subf %0, %16 : vector<16x64xf32>
    %cst_8 = arith.constant 9.99999974E-6 : f32
    %18 = vector.broadcast %cst_8 : f32 to vector<16x1xf32>
    %19 = arith.addf %15, %18 : vector<16x1xf32>
    %20 = math.rsqrt %19 : vector<16x1xf32>
    %21 = vector.broadcast %20 : vector<16x1xf32> to vector<16x64xf32>
    %22 = arith.mulf %17, %21 : vector<16x64xf32>
    %23 = vector.broadcast %1 : vector<1x64xf32> to vector<16x64xf32>
    %24 = arith.mulf %22, %23 : vector<16x64xf32>
    %25 = vector.broadcast %2 : vector<1x64xf32> to vector<16x64xf32>
    %26 = arith.addf %24, %25 : vector<16x64xf32>
    %c0_9 = arith.constant 0 : index
    %c0_10 = arith.constant 0 : index
    %27 = vector.load %arg1[%c0_9, %c0_10] : memref<2x8xf32, #tpu.memory_space<vmem>>, vector<2x8xf32>
    %c0_11 = arith.constant 0 : index
    %c0_12 = arith.constant 0 : index
    %c0_13 = arith.constant 0 : index
    %28 = vector.load %arg4[%c0_11, %c0_12, %c0_13] : memref<2x64x192xf32, #tpu.memory_space<vmem>>, vector<1x64x192xf32>
    %29 = vector.shape_cast %28 : vector<1x64x192xf32> to vector<64x192xf32>
    %cst_14 = arith.constant dense<0.000000e+00> : vector<16x192xf32>
    %30 = tpu.matmul %26, %29, %cst_14 {dimension_numbers = #tpu.dot_dimension_numbers<[1], [0], [0], [1], [0, 0, 1, 1], [], []>} : vector<16x64xf32>, vector<64x192xf32>, vector<16x192xf32> -> vector<16x192xf32>
    %c0_15 = arith.constant 0 : index
    %c0_16 = arith.constant 0 : index
    %c0_17 = arith.constant 0 : index
    %31 = vector.load %arg5[%c0_15, %c0_16, %c0_17] : memref<2x1x192xf32, #tpu.memory_space<vmem>>, vector<1x1x192xf32>
    %32 = vector.shape_cast %31 : vector<1x1x192xf32> to vector<1x192xf32>
    %33 = vector.broadcast %32 : vector<1x192xf32> to vector<16x192xf32>
    %34 = arith.addf %30, %33 : vector<16x192xf32>
    %35 = vector.extract_strided_slice %34 {offsets = [0, 0], sizes = [16, 64], strides = [1, 1]} : vector<16x192xf32> to vector<16x64xf32>
    %36 = vector.extract_strided_slice %34 {offsets = [0, 64], sizes = [16, 64], strides = [1, 1]} : vector<16x192xf32> to vector<16x64xf32>
    %37 = vector.extract_strided_slice %34 {offsets = [0, 128], sizes = [16, 64], strides = [1, 1]} : vector<16x192xf32> to vector<16x64xf32>
    %38 = vector.extract_strided_slice %35 {offsets = [0, 0], sizes = [8, 64], strides = [1, 1]} : vector<16x64xf32> to vector<8x64xf32>
    %39 = vector.extract_strided_slice %36 {offsets = [0, 0], sizes = [8, 64], strides = [1, 1]} : vector<16x64xf32> to vector<8x64xf32>
    %40 = vector.extract_strided_slice %37 {offsets = [0, 0], sizes = [8, 64], strides = [1, 1]} : vector<16x64xf32> to vector<8x64xf32>
    %41 = vector.extract_strided_slice %27 {offsets = [0, 0], sizes = [1, 8], strides = [1, 1]} : vector<2x8xf32> to vector<1x8xf32>
    %42 = vector.extract_strided_slice %38 {offsets = [0, 0], sizes = [8, 16], strides = [1, 1]} : vector<8x64xf32> to vector<8x16xf32>
    %43 = vector.extract_strided_slice %39 {offsets = [0, 0], sizes = [8, 16], strides = [1, 1]} : vector<8x64xf32> to vector<8x16xf32>
    %44 = vector.extract_strided_slice %40 {offsets = [0, 0], sizes = [8, 16], strides = [1, 1]} : vector<8x64xf32> to vector<8x16xf32>
    %cst_18 = arith.constant dense<0.000000e+00> : vector<8x8xf32>
    %45 = tpu.matmul %42, %43, %cst_18 {dimension_numbers = #tpu.dot_dimension_numbers<[1], [1], [0], [0], [0, 0, 1, 0], [], []>} : vector<8x16xf32>, vector<8x16xf32>, vector<8x8xf32> -> vector<8x8xf32>
    %cst_19 = arith.constant 2.500000e-01 : f32
    %46 = vector.broadcast %cst_19 : f32 to vector<8x8xf32>
    %47 = arith.mulf %45, %46 : vector<8x8xf32>
    %48 = vector.broadcast %41 : vector<1x8xf32> to vector<8x8xf32>
    %49 = arith.addf %47, %48 : vector<8x8xf32>
    %cst_20 = arith.constant dense<0xFF800000> : vector<8xf32>
    %50 = vector.multi_reduction <maximumf>, %49, %cst_20 [1] : vector<8x8xf32> to vector<8xf32>
    %51 = vector.shape_cast %50 : vector<8xf32> to vector<8x1xf32>
    %52 = vector.broadcast %51 : vector<8x1xf32> to vector<8x8xf32>
    %53 = arith.subf %49, %52 : vector<8x8xf32>
    %54 = math.exp %53 : vector<8x8xf32>
    %cst_21 = arith.constant dense<0.000000e+00> : vector<8xf32>
    %55 = vector.multi_reduction <add>, %54, %cst_21 [1] : vector<8x8xf32> to vector<8xf32>
    %56 = vector.shape_cast %55 : vector<8xf32> to vector<8x1xf32>
    %57 = tpu.reciprocal %56 {approx = true} : vector<8x1xf32> -> vector<8x1xf32>
    %58 = vector.broadcast %57 : vector<8x1xf32> to vector<8x8xf32>
    %59 = arith.mulf %54, %58 : vector<8x8xf32>
    %cst_22 = arith.constant dense<0.000000e+00> : vector<8x16xf32>
    %60 = tpu.matmul %59, %44, %cst_22 {dimension_numbers = #tpu.dot_dimension_numbers<[1], [0], [0], [1], [0, 0, 1, 1], [], []>} : vector<8x8xf32>, vector<8x16xf32>, vector<8x16xf32> -> vector<8x16xf32>
    %61 = vector.extract_strided_slice %38 {offsets = [0, 16], sizes = [8, 16], strides = [1, 1]} : vector<8x64xf32> to vector<8x16xf32>
    %62 = vector.extract_strided_slice %39 {offsets = [0, 16], sizes = [8, 16], strides = [1, 1]} : vector<8x64xf32> to vector<8x16xf32>
    %63 = vector.extract_strided_slice %40 {offsets = [0, 16], sizes = [8, 16], strides = [1, 1]} : vector<8x64xf32> to vector<8x16xf32>
    %cst_23 = arith.constant dense<0.000000e+00> : vector<8x8xf32>
    %64 = tpu.matmul %61, %62, %cst_23 {dimension_numbers = #tpu.dot_dimension_numbers<[1], [1], [0], [0], [0, 0, 1, 0], [], []>} : vector<8x16xf32>, vector<8x16xf32>, vector<8x8xf32> -> vector<8x8xf32>
    %cst_24 = arith.constant 2.500000e-01 : f32
    %65 = vector.broadcast %cst_24 : f32 to vector<8x8xf32>
    %66 = arith.mulf %64, %65 : vector<8x8xf32>
    %67 = vector.broadcast %41 : vector<1x8xf32> to vector<8x8xf32>
    %68 = arith.addf %66, %67 : vector<8x8xf32>
    %cst_25 = arith.constant dense<0xFF800000> : vector<8xf32>
    %69 = vector.multi_reduction <maximumf>, %68, %cst_25 [1] : vector<8x8xf32> to vector<8xf32>
    %70 = vector.shape_cast %69 : vector<8xf32> to vector<8x1xf32>
    %71 = vector.broadcast %70 : vector<8x1xf32> to vector<8x8xf32>
    %72 = arith.subf %68, %71 : vector<8x8xf32>
    %73 = math.exp %72 : vector<8x8xf32>
    %cst_26 = arith.constant dense<0.000000e+00> : vector<8xf32>
    %74 = vector.multi_reduction <add>, %73, %cst_26 [1] : vector<8x8xf32> to vector<8xf32>
    %75 = vector.shape_cast %74 : vector<8xf32> to vector<8x1xf32>
    %76 = tpu.reciprocal %75 {approx = true} : vector<8x1xf32> -> vector<8x1xf32>
    %77 = vector.broadcast %76 : vector<8x1xf32> to vector<8x8xf32>
    %78 = arith.mulf %73, %77 : vector<8x8xf32>
    %cst_27 = arith.constant dense<0.000000e+00> : vector<8x16xf32>
    %79 = tpu.matmul %78, %63, %cst_27 {dimension_numbers = #tpu.dot_dimension_numbers<[1], [0], [0], [1], [0, 0, 1, 1], [], []>} : vector<8x8xf32>, vector<8x16xf32>, vector<8x16xf32> -> vector<8x16xf32>
    %80 = vector.extract_strided_slice %38 {offsets = [0, 32], sizes = [8, 16], strides = [1, 1]} : vector<8x64xf32> to vector<8x16xf32>
    %81 = vector.extract_strided_slice %39 {offsets = [0, 32], sizes = [8, 16], strides = [1, 1]} : vector<8x64xf32> to vector<8x16xf32>
    %82 = vector.extract_strided_slice %40 {offsets = [0, 32], sizes = [8, 16], strides = [1, 1]} : vector<8x64xf32> to vector<8x16xf32>
    %cst_28 = arith.constant dense<0.000000e+00> : vector<8x8xf32>
    %83 = tpu.matmul %80, %81, %cst_28 {dimension_numbers = #tpu.dot_dimension_numbers<[1], [1], [0], [0], [0, 0, 1, 0], [], []>} : vector<8x16xf32>, vector<8x16xf32>, vector<8x8xf32> -> vector<8x8xf32>
    %cst_29 = arith.constant 2.500000e-01 : f32
    %84 = vector.broadcast %cst_29 : f32 to vector<8x8xf32>
    %85 = arith.mulf %83, %84 : vector<8x8xf32>
    %86 = vector.broadcast %41 : vector<1x8xf32> to vector<8x8xf32>
    %87 = arith.addf %85, %86 : vector<8x8xf32>
    %cst_30 = arith.constant dense<0xFF800000> : vector<8xf32>
    %88 = vector.multi_reduction <maximumf>, %87, %cst_30 [1] : vector<8x8xf32> to vector<8xf32>
    %89 = vector.shape_cast %88 : vector<8xf32> to vector<8x1xf32>
    %90 = vector.broadcast %89 : vector<8x1xf32> to vector<8x8xf32>
    %91 = arith.subf %87, %90 : vector<8x8xf32>
    %92 = math.exp %91 : vector<8x8xf32>
    %cst_31 = arith.constant dense<0.000000e+00> : vector<8xf32>
    %93 = vector.multi_reduction <add>, %92, %cst_31 [1] : vector<8x8xf32> to vector<8xf32>
    %94 = vector.shape_cast %93 : vector<8xf32> to vector<8x1xf32>
    %95 = tpu.reciprocal %94 {approx = true} : vector<8x1xf32> -> vector<8x1xf32>
    %96 = vector.broadcast %95 : vector<8x1xf32> to vector<8x8xf32>
    %97 = arith.mulf %92, %96 : vector<8x8xf32>
    %cst_32 = arith.constant dense<0.000000e+00> : vector<8x16xf32>
    %98 = tpu.matmul %97, %82, %cst_32 {dimension_numbers = #tpu.dot_dimension_numbers<[1], [0], [0], [1], [0, 0, 1, 1], [], []>} : vector<8x8xf32>, vector<8x16xf32>, vector<8x16xf32> -> vector<8x16xf32>
    %99 = vector.extract_strided_slice %38 {offsets = [0, 48], sizes = [8, 16], strides = [1, 1]} : vector<8x64xf32> to vector<8x16xf32>
    %100 = vector.extract_strided_slice %39 {offsets = [0, 48], sizes = [8, 16], strides = [1, 1]} : vector<8x64xf32> to vector<8x16xf32>
    %101 = vector.extract_strided_slice %40 {offsets = [0, 48], sizes = [8, 16], strides = [1, 1]} : vector<8x64xf32> to vector<8x16xf32>
    %cst_33 = arith.constant dense<0.000000e+00> : vector<8x8xf32>
    %102 = tpu.matmul %99, %100, %cst_33 {dimension_numbers = #tpu.dot_dimension_numbers<[1], [1], [0], [0], [0, 0, 1, 0], [], []>} : vector<8x16xf32>, vector<8x16xf32>, vector<8x8xf32> -> vector<8x8xf32>
    %cst_34 = arith.constant 2.500000e-01 : f32
    %103 = vector.broadcast %cst_34 : f32 to vector<8x8xf32>
    %104 = arith.mulf %102, %103 : vector<8x8xf32>
    %105 = vector.broadcast %41 : vector<1x8xf32> to vector<8x8xf32>
    %106 = arith.addf %104, %105 : vector<8x8xf32>
    %cst_35 = arith.constant dense<0xFF800000> : vector<8xf32>
    %107 = vector.multi_reduction <maximumf>, %106, %cst_35 [1] : vector<8x8xf32> to vector<8xf32>
    %108 = vector.shape_cast %107 : vector<8xf32> to vector<8x1xf32>
    %109 = vector.broadcast %108 : vector<8x1xf32> to vector<8x8xf32>
    %110 = arith.subf %106, %109 : vector<8x8xf32>
    %111 = math.exp %110 : vector<8x8xf32>
    %cst_36 = arith.constant dense<0.000000e+00> : vector<8xf32>
    %112 = vector.multi_reduction <add>, %111, %cst_36 [1] : vector<8x8xf32> to vector<8xf32>
    %113 = vector.shape_cast %112 : vector<8xf32> to vector<8x1xf32>
    %114 = tpu.reciprocal %113 {approx = true} : vector<8x1xf32> -> vector<8x1xf32>
    %115 = vector.broadcast %114 : vector<8x1xf32> to vector<8x8xf32>
    %116 = arith.mulf %111, %115 : vector<8x8xf32>
    %cst_37 = arith.constant dense<0.000000e+00> : vector<8x16xf32>
    %117 = tpu.matmul %116, %101, %cst_37 {dimension_numbers = #tpu.dot_dimension_numbers<[1], [0], [0], [1], [0, 0, 1, 1], [], []>} : vector<8x8xf32>, vector<8x16xf32>, vector<8x16xf32> -> vector<8x16xf32>
    %118 = tpu.concatenate %60, %79, %98, %117 in 1 : vector<8x16xf32>, vector<8x16xf32>, vector<8x16xf32>, vector<8x16xf32> -> vector<8x64xf32>
    %119 = vector.extract_strided_slice %35 {offsets = [8, 0], sizes = [8, 64], strides = [1, 1]} : vector<16x64xf32> to vector<8x64xf32>
    %120 = vector.extract_strided_slice %36 {offsets = [8, 0], sizes = [8, 64], strides = [1, 1]} : vector<16x64xf32> to vector<8x64xf32>
    %121 = vector.extract_strided_slice %37 {offsets = [8, 0], sizes = [8, 64], strides = [1, 1]} : vector<16x64xf32> to vector<8x64xf32>
    %122 = vector.extract_strided_slice %27 {offsets = [1, 0], sizes = [1, 8], strides = [1, 1]} : vector<2x8xf32> to vector<1x8xf32>
    %123 = vector.extract_strided_slice %119 {offsets = [0, 0], sizes = [8, 16], strides = [1, 1]} : vector<8x64xf32> to vector<8x16xf32>
    %124 = vector.extract_strided_slice %120 {offsets = [0, 0], sizes = [8, 16], strides = [1, 1]} : vector<8x64xf32> to vector<8x16xf32>
    %125 = vector.extract_strided_slice %121 {offsets = [0, 0], sizes = [8, 16], strides = [1, 1]} : vector<8x64xf32> to vector<8x16xf32>
    %cst_38 = arith.constant dense<0.000000e+00> : vector<8x8xf32>
    %126 = tpu.matmul %123, %124, %cst_38 {dimension_numbers = #tpu.dot_dimension_numbers<[1], [1], [0], [0], [0, 0, 1, 0], [], []>} : vector<8x16xf32>, vector<8x16xf32>, vector<8x8xf32> -> vector<8x8xf32>
    %cst_39 = arith.constant 2.500000e-01 : f32
    %127 = vector.broadcast %cst_39 : f32 to vector<8x8xf32>
    %128 = arith.mulf %126, %127 : vector<8x8xf32>
    %129 = vector.broadcast %122 : vector<1x8xf32> to vector<8x8xf32>
    %130 = arith.addf %128, %129 : vector<8x8xf32>
    %cst_40 = arith.constant dense<0xFF800000> : vector<8xf32>
    %131 = vector.multi_reduction <maximumf>, %130, %cst_40 [1] : vector<8x8xf32> to vector<8xf32>
    %132 = vector.shape_cast %131 : vector<8xf32> to vector<8x1xf32>
    %133 = vector.broadcast %132 : vector<8x1xf32> to vector<8x8xf32>
    %134 = arith.subf %130, %133 : vector<8x8xf32>
    %135 = math.exp %134 : vector<8x8xf32>
    %cst_41 = arith.constant dense<0.000000e+00> : vector<8xf32>
    %136 = vector.multi_reduction <add>, %135, %cst_41 [1] : vector<8x8xf32> to vector<8xf32>
    %137 = vector.shape_cast %136 : vector<8xf32> to vector<8x1xf32>
    %138 = tpu.reciprocal %137 {approx = true} : vector<8x1xf32> -> vector<8x1xf32>
    %139 = vector.broadcast %138 : vector<8x1xf32> to vector<8x8xf32>
    %140 = arith.mulf %135, %139 : vector<8x8xf32>
    %cst_42 = arith.constant dense<0.000000e+00> : vector<8x16xf32>
    %141 = tpu.matmul %140, %125, %cst_42 {dimension_numbers = #tpu.dot_dimension_numbers<[1], [0], [0], [1], [0, 0, 1, 1], [], []>} : vector<8x8xf32>, vector<8x16xf32>, vector<8x16xf32> -> vector<8x16xf32>
    %142 = vector.extract_strided_slice %119 {offsets = [0, 16], sizes = [8, 16], strides = [1, 1]} : vector<8x64xf32> to vector<8x16xf32>
    %143 = vector.extract_strided_slice %120 {offsets = [0, 16], sizes = [8, 16], strides = [1, 1]} : vector<8x64xf32> to vector<8x16xf32>
    %144 = vector.extract_strided_slice %121 {offsets = [0, 16], sizes = [8, 16], strides = [1, 1]} : vector<8x64xf32> to vector<8x16xf32>
    %cst_43 = arith.constant dense<0.000000e+00> : vector<8x8xf32>
    %145 = tpu.matmul %142, %143, %cst_43 {dimension_numbers = #tpu.dot_dimension_numbers<[1], [1], [0], [0], [0, 0, 1, 0], [], []>} : vector<8x16xf32>, vector<8x16xf32>, vector<8x8xf32> -> vector<8x8xf32>
    %cst_44 = arith.constant 2.500000e-01 : f32
    %146 = vector.broadcast %cst_44 : f32 to vector<8x8xf32>
    %147 = arith.mulf %145, %146 : vector<8x8xf32>
    %148 = vector.broadcast %122 : vector<1x8xf32> to vector<8x8xf32>
    %149 = arith.addf %147, %148 : vector<8x8xf32>
    %cst_45 = arith.constant dense<0xFF800000> : vector<8xf32>
    %150 = vector.multi_reduction <maximumf>, %149, %cst_45 [1] : vector<8x8xf32> to vector<8xf32>
    %151 = vector.shape_cast %150 : vector<8xf32> to vector<8x1xf32>
    %152 = vector.broadcast %151 : vector<8x1xf32> to vector<8x8xf32>
    %153 = arith.subf %149, %152 : vector<8x8xf32>
    %154 = math.exp %153 : vector<8x8xf32>
    %cst_46 = arith.constant dense<0.000000e+00> : vector<8xf32>
    %155 = vector.multi_reduction <add>, %154, %cst_46 [1] : vector<8x8xf32> to vector<8xf32>
    %156 = vector.shape_cast %155 : vector<8xf32> to vector<8x1xf32>
    %157 = tpu.reciprocal %156 {approx = true} : vector<8x1xf32> -> vector<8x1xf32>
    %158 = vector.broadcast %157 : vector<8x1xf32> to vector<8x8xf32>
    %159 = arith.mulf %154, %158 : vector<8x8xf32>
    %cst_47 = arith.constant dense<0.000000e+00> : vector<8x16xf32>
    %160 = tpu.matmul %159, %144, %cst_47 {dimension_numbers = #tpu.dot_dimension_numbers<[1], [0], [0], [1], [0, 0, 1, 1], [], []>} : vector<8x8xf32>, vector<8x16xf32>, vector<8x16xf32> -> vector<8x16xf32>
    %161 = vector.extract_strided_slice %119 {offsets = [0, 32], sizes = [8, 16], strides = [1, 1]} : vector<8x64xf32> to vector<8x16xf32>
    %162 = vector.extract_strided_slice %120 {offsets = [0, 32], sizes = [8, 16], strides = [1, 1]} : vector<8x64xf32> to vector<8x16xf32>
    %163 = vector.extract_strided_slice %121 {offsets = [0, 32], sizes = [8, 16], strides = [1, 1]} : vector<8x64xf32> to vector<8x16xf32>
    %cst_48 = arith.constant dense<0.000000e+00> : vector<8x8xf32>
    %164 = tpu.matmul %161, %162, %cst_48 {dimension_numbers = #tpu.dot_dimension_numbers<[1], [1], [0], [0], [0, 0, 1, 0], [], []>} : vector<8x16xf32>, vector<8x16xf32>, vector<8x8xf32> -> vector<8x8xf32>
    %cst_49 = arith.constant 2.500000e-01 : f32
    %165 = vector.broadcast %cst_49 : f32 to vector<8x8xf32>
    %166 = arith.mulf %164, %165 : vector<8x8xf32>
    %167 = vector.broadcast %122 : vector<1x8xf32> to vector<8x8xf32>
    %168 = arith.addf %166, %167 : vector<8x8xf32>
    %cst_50 = arith.constant dense<0xFF800000> : vector<8xf32>
    %169 = vector.multi_reduction <maximumf>, %168, %cst_50 [1] : vector<8x8xf32> to vector<8xf32>
    %170 = vector.shape_cast %169 : vector<8xf32> to vector<8x1xf32>
    %171 = vector.broadcast %170 : vector<8x1xf32> to vector<8x8xf32>
    %172 = arith.subf %168, %171 : vector<8x8xf32>
    %173 = math.exp %172 : vector<8x8xf32>
    %cst_51 = arith.constant dense<0.000000e+00> : vector<8xf32>
    %174 = vector.multi_reduction <add>, %173, %cst_51 [1] : vector<8x8xf32> to vector<8xf32>
    %175 = vector.shape_cast %174 : vector<8xf32> to vector<8x1xf32>
    %176 = tpu.reciprocal %175 {approx = true} : vector<8x1xf32> -> vector<8x1xf32>
    %177 = vector.broadcast %176 : vector<8x1xf32> to vector<8x8xf32>
    %178 = arith.mulf %173, %177 : vector<8x8xf32>
    %cst_52 = arith.constant dense<0.000000e+00> : vector<8x16xf32>
    %179 = tpu.matmul %178, %163, %cst_52 {dimension_numbers = #tpu.dot_dimension_numbers<[1], [0], [0], [1], [0, 0, 1, 1], [], []>} : vector<8x8xf32>, vector<8x16xf32>, vector<8x16xf32> -> vector<8x16xf32>
    %180 = vector.extract_strided_slice %119 {offsets = [0, 48], sizes = [8, 16], strides = [1, 1]} : vector<8x64xf32> to vector<8x16xf32>
    %181 = vector.extract_strided_slice %120 {offsets = [0, 48], sizes = [8, 16], strides = [1, 1]} : vector<8x64xf32> to vector<8x16xf32>
    %182 = vector.extract_strided_slice %121 {offsets = [0, 48], sizes = [8, 16], strides = [1, 1]} : vector<8x64xf32> to vector<8x16xf32>
    %cst_53 = arith.constant dense<0.000000e+00> : vector<8x8xf32>
    %183 = tpu.matmul %180, %181, %cst_53 {dimension_numbers = #tpu.dot_dimension_numbers<[1], [1], [0], [0], [0, 0, 1, 0], [], []>} : vector<8x16xf32>, vector<8x16xf32>, vector<8x8xf32> -> vector<8x8xf32>
    %cst_54 = arith.constant 2.500000e-01 : f32
    %184 = vector.broadcast %cst_54 : f32 to vector<8x8xf32>
    %185 = arith.mulf %183, %184 : vector<8x8xf32>
    %186 = vector.broadcast %122 : vector<1x8xf32> to vector<8x8xf32>
    %187 = arith.addf %185, %186 : vector<8x8xf32>
    %cst_55 = arith.constant dense<0xFF800000> : vector<8xf32>
    %188 = vector.multi_reduction <maximumf>, %187, %cst_55 [1] : vector<8x8xf32> to vector<8xf32>
    %189 = vector.shape_cast %188 : vector<8xf32> to vector<8x1xf32>
    %190 = vector.broadcast %189 : vector<8x1xf32> to vector<8x8xf32>
    %191 = arith.subf %187, %190 : vector<8x8xf32>
    %192 = math.exp %191 : vector<8x8xf32>
    %cst_56 = arith.constant dense<0.000000e+00> : vector<8xf32>
    %193 = vector.multi_reduction <add>, %192, %cst_56 [1] : vector<8x8xf32> to vector<8xf32>
    %194 = vector.shape_cast %193 : vector<8xf32> to vector<8x1xf32>
    %195 = tpu.reciprocal %194 {approx = true} : vector<8x1xf32> -> vector<8x1xf32>
    %196 = vector.broadcast %195 : vector<8x1xf32> to vector<8x8xf32>
    %197 = arith.mulf %192, %196 : vector<8x8xf32>
    %cst_57 = arith.constant dense<0.000000e+00> : vector<8x16xf32>
    %198 = tpu.matmul %197, %182, %cst_57 {dimension_numbers = #tpu.dot_dimension_numbers<[1], [0], [0], [1], [0, 0, 1, 1], [], []>} : vector<8x8xf32>, vector<8x16xf32>, vector<8x16xf32> -> vector<8x16xf32>
    %199 = tpu.concatenate %141, %160, %179, %198 in 1 : vector<8x16xf32>, vector<8x16xf32>, vector<8x16xf32>, vector<8x16xf32> -> vector<8x64xf32>
    %200 = tpu.concatenate %118, %199 in 0 : vector<8x64xf32>, vector<8x64xf32> -> vector<16x64xf32>
    %c0_58 = arith.constant 0 : index
    %c0_59 = arith.constant 0 : index
    %c0_60 = arith.constant 0 : index
    %201 = vector.load %arg6[%c0_58, %c0_59, %c0_60] : memref<2x64x64xf32, #tpu.memory_space<vmem>>, vector<1x64x64xf32>
    %202 = vector.shape_cast %201 : vector<1x64x64xf32> to vector<64x64xf32>
    %cst_61 = arith.constant dense<0.000000e+00> : vector<16x64xf32>
    %203 = tpu.matmul %200, %202, %cst_61 {dimension_numbers = #tpu.dot_dimension_numbers<[1], [0], [0], [1], [0, 0, 1, 1], [], []>} : vector<16x64xf32>, vector<64x64xf32>, vector<16x64xf32> -> vector<16x64xf32>
    %c0_62 = arith.constant 0 : index
    %c0_63 = arith.constant 0 : index
    %c0_64 = arith.constant 0 : index
    %204 = vector.load %arg7[%c0_62, %c0_63, %c0_64] : memref<2x1x64xf32, #tpu.memory_space<vmem>>, vector<1x1x64xf32>
    %205 = vector.shape_cast %204 : vector<1x1x64xf32> to vector<1x64xf32>
    %206 = vector.broadcast %205 : vector<1x64xf32> to vector<16x64xf32>
    %207 = arith.addf %203, %206 : vector<16x64xf32>
    %208 = arith.addf %207, %26 : vector<16x64xf32>
    %c0_65 = arith.constant 0 : index
    %c0_66 = arith.constant 0 : index
    %c0_67 = arith.constant 0 : index
    %209 = vector.load %arg8[%c0_65, %c0_66, %c0_67] : memref<2x1x64xf32, #tpu.memory_space<vmem>>, vector<1x1x64xf32>
    %210 = vector.shape_cast %209 : vector<1x1x64xf32> to vector<1x64xf32>
    %c0_68 = arith.constant 0 : index
    %c0_69 = arith.constant 0 : index
    %c0_70 = arith.constant 0 : index
    %211 = vector.load %arg9[%c0_68, %c0_69, %c0_70] : memref<2x1x64xf32, #tpu.memory_space<vmem>>, vector<1x1x64xf32>
    %212 = vector.shape_cast %211 : vector<1x1x64xf32> to vector<1x64xf32>
    %cst_71 = arith.constant dense<0.000000e+00> : vector<16xf32>
    %213 = vector.multi_reduction <add>, %208, %cst_71 [1] : vector<16x64xf32> to vector<16xf32>
    %214 = vector.shape_cast %213 : vector<16xf32> to vector<16x1xf32>
    %cst_72 = arith.constant 6.400000e+01 : f32
    %215 = vector.broadcast %cst_72 : f32 to vector<16x1xf32>
    %216 = arith.divf %214, %215 : vector<16x1xf32>
    %217 = vector.broadcast %216 : vector<16x1xf32> to vector<16x64xf32>
    %218 = arith.subf %208, %217 : vector<16x64xf32>
    %219 = vector.broadcast %216 : vector<16x1xf32> to vector<16x64xf32>
    %220 = arith.subf %208, %219 : vector<16x64xf32>
    %221 = arith.mulf %218, %220 : vector<16x64xf32>
    %cst_73 = arith.constant dense<0.000000e+00> : vector<16xf32>
    %222 = vector.multi_reduction <add>, %221, %cst_73 [1] : vector<16x64xf32> to vector<16xf32>
    %223 = vector.shape_cast %222 : vector<16xf32> to vector<16x1xf32>
    %cst_74 = arith.constant 6.400000e+01 : f32
    %224 = vector.broadcast %cst_74 : f32 to vector<16x1xf32>
    %225 = arith.divf %223, %224 : vector<16x1xf32>
    %226 = vector.broadcast %216 : vector<16x1xf32> to vector<16x64xf32>
    %227 = arith.subf %208, %226 : vector<16x64xf32>
    %cst_75 = arith.constant 9.99999974E-6 : f32
    %228 = vector.broadcast %cst_75 : f32 to vector<16x1xf32>
    %229 = arith.addf %225, %228 : vector<16x1xf32>
    %230 = math.rsqrt %229 : vector<16x1xf32>
    %231 = vector.broadcast %230 : vector<16x1xf32> to vector<16x64xf32>
    %232 = arith.mulf %227, %231 : vector<16x64xf32>
    %233 = vector.broadcast %210 : vector<1x64xf32> to vector<16x64xf32>
    %234 = arith.mulf %232, %233 : vector<16x64xf32>
    %235 = vector.broadcast %212 : vector<1x64xf32> to vector<16x64xf32>
    %236 = arith.addf %234, %235 : vector<16x64xf32>
    %c0_76 = arith.constant 0 : index
    %c0_77 = arith.constant 0 : index
    %c0_78 = arith.constant 0 : index
    %237 = vector.load %arg10[%c0_76, %c0_77, %c0_78] : memref<2x64x256xf32, #tpu.memory_space<vmem>>, vector<1x64x256xf32>
    %238 = vector.shape_cast %237 : vector<1x64x256xf32> to vector<64x256xf32>
    %cst_79 = arith.constant dense<0.000000e+00> : vector<16x256xf32>
    %239 = tpu.matmul %236, %238, %cst_79 {dimension_numbers = #tpu.dot_dimension_numbers<[1], [0], [0], [1], [0, 0, 1, 1], [], []>} : vector<16x64xf32>, vector<64x256xf32>, vector<16x256xf32> -> vector<16x256xf32>
    %c0_80 = arith.constant 0 : index
    %c0_81 = arith.constant 0 : index
    %c0_82 = arith.constant 0 : index
    %240 = vector.load %arg11[%c0_80, %c0_81, %c0_82] : memref<2x1x256xf32, #tpu.memory_space<vmem>>, vector<1x1x256xf32>
    %241 = vector.shape_cast %240 : vector<1x1x256xf32> to vector<1x256xf32>
    %242 = vector.broadcast %241 : vector<1x256xf32> to vector<16x256xf32>
    %243 = arith.addf %239, %242 : vector<16x256xf32>
    %cst_83 = arith.constant 5.000000e-01 : f32
    %244 = vector.broadcast %cst_83 : f32 to vector<16x256xf32>
    %245 = arith.mulf %244, %243 : vector<16x256xf32>
    %cst_84 = arith.constant 4.471500e-02 : f32
    %246 = vector.broadcast %cst_84 : f32 to vector<16x256xf32>
    %247 = arith.mulf %246, %243 : vector<16x256xf32>
    %248 = arith.mulf %247, %243 : vector<16x256xf32>
    %249 = arith.mulf %248, %243 : vector<16x256xf32>
    %250 = arith.addf %243, %249 : vector<16x256xf32>
    %cst_85 = arith.constant 0.797884583 : f32
    %251 = vector.broadcast %cst_85 : f32 to vector<16x256xf32>
    %252 = arith.mulf %251, %250 : vector<16x256xf32>
    %253 = math.tanh %252 : vector<16x256xf32>
    %cst_86 = arith.constant 1.000000e+00 : f32
    %254 = vector.broadcast %cst_86 : f32 to vector<16x256xf32>
    %255 = arith.addf %254, %253 : vector<16x256xf32>
    %256 = arith.mulf %245, %255 : vector<16x256xf32>
    %c0_87 = arith.constant 0 : index
    %c0_88 = arith.constant 0 : index
    %c0_89 = arith.constant 0 : index
    %257 = vector.load %arg12[%c0_87, %c0_88, %c0_89] : memref<2x256x64xf32, #tpu.memory_space<vmem>>, vector<1x256x64xf32>
    %258 = vector.shape_cast %257 : vector<1x256x64xf32> to vector<256x64xf32>
    %cst_90 = arith.constant dense<0.000000e+00> : vector<16x64xf32>
    %259 = tpu.matmul %256, %258, %cst_90 {dimension_numbers = #tpu.dot_dimension_numbers<[1], [0], [0], [1], [0, 0, 1, 1], [], []>} : vector<16x256xf32>, vector<256x64xf32>, vector<16x64xf32> -> vector<16x64xf32>
    %c0_91 = arith.constant 0 : index
    %c0_92 = arith.constant 0 : index
    %c0_93 = arith.constant 0 : index
    %260 = vector.load %arg13[%c0_91, %c0_92, %c0_93] : memref<2x1x64xf32, #tpu.memory_space<vmem>>, vector<1x1x64xf32>
    %261 = vector.shape_cast %260 : vector<1x1x64xf32> to vector<1x64xf32>
    %262 = vector.broadcast %261 : vector<1x64xf32> to vector<16x64xf32>
    %263 = arith.addf %259, %262 : vector<16x64xf32>
    %264 = arith.addf %263, %236 : vector<16x64xf32>
    %c0_94 = arith.constant 0 : index
    %c0_95 = arith.constant 0 : index
    %c0_96 = arith.constant 0 : index
    %265 = vector.load %arg14[%c0_94, %c0_95, %c0_96] : memref<2x1x64xf32, #tpu.memory_space<vmem>>, vector<1x1x64xf32>
    %266 = vector.shape_cast %265 : vector<1x1x64xf32> to vector<1x64xf32>
    %c0_97 = arith.constant 0 : index
    %c0_98 = arith.constant 0 : index
    %c0_99 = arith.constant 0 : index
    %267 = vector.load %arg15[%c0_97, %c0_98, %c0_99] : memref<2x1x64xf32, #tpu.memory_space<vmem>>, vector<1x1x64xf32>
    %268 = vector.shape_cast %267 : vector<1x1x64xf32> to vector<1x64xf32>
    %cst_100 = arith.constant dense<0.000000e+00> : vector<16xf32>
    %269 = vector.multi_reduction <add>, %264, %cst_100 [1] : vector<16x64xf32> to vector<16xf32>
    %270 = vector.shape_cast %269 : vector<16xf32> to vector<16x1xf32>
    %cst_101 = arith.constant 6.400000e+01 : f32
    %271 = vector.broadcast %cst_101 : f32 to vector<16x1xf32>
    %272 = arith.divf %270, %271 : vector<16x1xf32>
    %273 = vector.broadcast %272 : vector<16x1xf32> to vector<16x64xf32>
    %274 = arith.subf %264, %273 : vector<16x64xf32>
    %275 = vector.broadcast %272 : vector<16x1xf32> to vector<16x64xf32>
    %276 = arith.subf %264, %275 : vector<16x64xf32>
    %277 = arith.mulf %274, %276 : vector<16x64xf32>
    %cst_102 = arith.constant dense<0.000000e+00> : vector<16xf32>
    %278 = vector.multi_reduction <add>, %277, %cst_102 [1] : vector<16x64xf32> to vector<16xf32>
    %279 = vector.shape_cast %278 : vector<16xf32> to vector<16x1xf32>
    %cst_103 = arith.constant 6.400000e+01 : f32
    %280 = vector.broadcast %cst_103 : f32 to vector<16x1xf32>
    %281 = arith.divf %279, %280 : vector<16x1xf32>
    %282 = vector.broadcast %272 : vector<16x1xf32> to vector<16x64xf32>
    %283 = arith.subf %264, %282 : vector<16x64xf32>
    %cst_104 = arith.constant 9.99999974E-6 : f32
    %284 = vector.broadcast %cst_104 : f32 to vector<16x1xf32>
    %285 = arith.addf %281, %284 : vector<16x1xf32>
    %286 = math.rsqrt %285 : vector<16x1xf32>
    %287 = vector.broadcast %286 : vector<16x1xf32> to vector<16x64xf32>
    %288 = arith.mulf %283, %287 : vector<16x64xf32>
    %289 = vector.broadcast %266 : vector<1x64xf32> to vector<16x64xf32>
    %290 = arith.mulf %288, %289 : vector<16x64xf32>
    %291 = vector.broadcast %268 : vector<1x64xf32> to vector<16x64xf32>
    %292 = arith.addf %290, %291 : vector<16x64xf32>
    %c1 = arith.constant 1 : index
    %c0_105 = arith.constant 0 : index
    %c0_106 = arith.constant 0 : index
    %293 = vector.load %arg4[%c1, %c0_105, %c0_106] : memref<2x64x192xf32, #tpu.memory_space<vmem>>, vector<1x64x192xf32>
    %294 = vector.shape_cast %293 : vector<1x64x192xf32> to vector<64x192xf32>
    %cst_107 = arith.constant dense<0.000000e+00> : vector<16x192xf32>
    %295 = tpu.matmul %292, %294, %cst_107 {dimension_numbers = #tpu.dot_dimension_numbers<[1], [0], [0], [1], [0, 0, 1, 1], [], []>} : vector<16x64xf32>, vector<64x192xf32>, vector<16x192xf32> -> vector<16x192xf32>
    %c1_108 = arith.constant 1 : index
    %c0_109 = arith.constant 0 : index
    %c0_110 = arith.constant 0 : index
    %296 = vector.load %arg5[%c1_108, %c0_109, %c0_110] : memref<2x1x192xf32, #tpu.memory_space<vmem>>, vector<1x1x192xf32>
    %297 = vector.shape_cast %296 : vector<1x1x192xf32> to vector<1x192xf32>
    %298 = vector.broadcast %297 : vector<1x192xf32> to vector<16x192xf32>
    %299 = arith.addf %295, %298 : vector<16x192xf32>
    %300 = vector.extract_strided_slice %299 {offsets = [0, 0], sizes = [16, 64], strides = [1, 1]} : vector<16x192xf32> to vector<16x64xf32>
    %301 = vector.extract_strided_slice %299 {offsets = [0, 64], sizes = [16, 64], strides = [1, 1]} : vector<16x192xf32> to vector<16x64xf32>
    %302 = vector.extract_strided_slice %299 {offsets = [0, 128], sizes = [16, 64], strides = [1, 1]} : vector<16x192xf32> to vector<16x64xf32>
    %303 = vector.extract_strided_slice %300 {offsets = [0, 0], sizes = [8, 64], strides = [1, 1]} : vector<16x64xf32> to vector<8x64xf32>
    %304 = vector.extract_strided_slice %301 {offsets = [0, 0], sizes = [8, 64], strides = [1, 1]} : vector<16x64xf32> to vector<8x64xf32>
    %305 = vector.extract_strided_slice %302 {offsets = [0, 0], sizes = [8, 64], strides = [1, 1]} : vector<16x64xf32> to vector<8x64xf32>
    %306 = vector.extract_strided_slice %27 {offsets = [0, 0], sizes = [1, 8], strides = [1, 1]} : vector<2x8xf32> to vector<1x8xf32>
    %307 = vector.extract_strided_slice %303 {offsets = [0, 0], sizes = [8, 16], strides = [1, 1]} : vector<8x64xf32> to vector<8x16xf32>
    %308 = vector.extract_strided_slice %304 {offsets = [0, 0], sizes = [8, 16], strides = [1, 1]} : vector<8x64xf32> to vector<8x16xf32>
    %309 = vector.extract_strided_slice %305 {offsets = [0, 0], sizes = [8, 16], strides = [1, 1]} : vector<8x64xf32> to vector<8x16xf32>
    %cst_111 = arith.constant dense<0.000000e+00> : vector<8x8xf32>
    %310 = tpu.matmul %307, %308, %cst_111 {dimension_numbers = #tpu.dot_dimension_numbers<[1], [1], [0], [0], [0, 0, 1, 0], [], []>} : vector<8x16xf32>, vector<8x16xf32>, vector<8x8xf32> -> vector<8x8xf32>
    %cst_112 = arith.constant 2.500000e-01 : f32
    %311 = vector.broadcast %cst_112 : f32 to vector<8x8xf32>
    %312 = arith.mulf %310, %311 : vector<8x8xf32>
    %313 = vector.broadcast %306 : vector<1x8xf32> to vector<8x8xf32>
    %314 = arith.addf %312, %313 : vector<8x8xf32>
    %cst_113 = arith.constant dense<0xFF800000> : vector<8xf32>
    %315 = vector.multi_reduction <maximumf>, %314, %cst_113 [1] : vector<8x8xf32> to vector<8xf32>
    %316 = vector.shape_cast %315 : vector<8xf32> to vector<8x1xf32>
    %317 = vector.broadcast %316 : vector<8x1xf32> to vector<8x8xf32>
    %318 = arith.subf %314, %317 : vector<8x8xf32>
    %319 = math.exp %318 : vector<8x8xf32>
    %cst_114 = arith.constant dense<0.000000e+00> : vector<8xf32>
    %320 = vector.multi_reduction <add>, %319, %cst_114 [1] : vector<8x8xf32> to vector<8xf32>
    %321 = vector.shape_cast %320 : vector<8xf32> to vector<8x1xf32>
    %322 = tpu.reciprocal %321 {approx = true} : vector<8x1xf32> -> vector<8x1xf32>
    %323 = vector.broadcast %322 : vector<8x1xf32> to vector<8x8xf32>
    %324 = arith.mulf %319, %323 : vector<8x8xf32>
    %cst_115 = arith.constant dense<0.000000e+00> : vector<8x16xf32>
    %325 = tpu.matmul %324, %309, %cst_115 {dimension_numbers = #tpu.dot_dimension_numbers<[1], [0], [0], [1], [0, 0, 1, 1], [], []>} : vector<8x8xf32>, vector<8x16xf32>, vector<8x16xf32> -> vector<8x16xf32>
    %326 = vector.extract_strided_slice %303 {offsets = [0, 16], sizes = [8, 16], strides = [1, 1]} : vector<8x64xf32> to vector<8x16xf32>
    %327 = vector.extract_strided_slice %304 {offsets = [0, 16], sizes = [8, 16], strides = [1, 1]} : vector<8x64xf32> to vector<8x16xf32>
    %328 = vector.extract_strided_slice %305 {offsets = [0, 16], sizes = [8, 16], strides = [1, 1]} : vector<8x64xf32> to vector<8x16xf32>
    %cst_116 = arith.constant dense<0.000000e+00> : vector<8x8xf32>
    %329 = tpu.matmul %326, %327, %cst_116 {dimension_numbers = #tpu.dot_dimension_numbers<[1], [1], [0], [0], [0, 0, 1, 0], [], []>} : vector<8x16xf32>, vector<8x16xf32>, vector<8x8xf32> -> vector<8x8xf32>
    %cst_117 = arith.constant 2.500000e-01 : f32
    %330 = vector.broadcast %cst_117 : f32 to vector<8x8xf32>
    %331 = arith.mulf %329, %330 : vector<8x8xf32>
    %332 = vector.broadcast %306 : vector<1x8xf32> to vector<8x8xf32>
    %333 = arith.addf %331, %332 : vector<8x8xf32>
    %cst_118 = arith.constant dense<0xFF800000> : vector<8xf32>
    %334 = vector.multi_reduction <maximumf>, %333, %cst_118 [1] : vector<8x8xf32> to vector<8xf32>
    %335 = vector.shape_cast %334 : vector<8xf32> to vector<8x1xf32>
    %336 = vector.broadcast %335 : vector<8x1xf32> to vector<8x8xf32>
    %337 = arith.subf %333, %336 : vector<8x8xf32>
    %338 = math.exp %337 : vector<8x8xf32>
    %cst_119 = arith.constant dense<0.000000e+00> : vector<8xf32>
    %339 = vector.multi_reduction <add>, %338, %cst_119 [1] : vector<8x8xf32> to vector<8xf32>
    %340 = vector.shape_cast %339 : vector<8xf32> to vector<8x1xf32>
    %341 = tpu.reciprocal %340 {approx = true} : vector<8x1xf32> -> vector<8x1xf32>
    %342 = vector.broadcast %341 : vector<8x1xf32> to vector<8x8xf32>
    %343 = arith.mulf %338, %342 : vector<8x8xf32>
    %cst_120 = arith.constant dense<0.000000e+00> : vector<8x16xf32>
    %344 = tpu.matmul %343, %328, %cst_120 {dimension_numbers = #tpu.dot_dimension_numbers<[1], [0], [0], [1], [0, 0, 1, 1], [], []>} : vector<8x8xf32>, vector<8x16xf32>, vector<8x16xf32> -> vector<8x16xf32>
    %345 = vector.extract_strided_slice %303 {offsets = [0, 32], sizes = [8, 16], strides = [1, 1]} : vector<8x64xf32> to vector<8x16xf32>
    %346 = vector.extract_strided_slice %304 {offsets = [0, 32], sizes = [8, 16], strides = [1, 1]} : vector<8x64xf32> to vector<8x16xf32>
    %347 = vector.extract_strided_slice %305 {offsets = [0, 32], sizes = [8, 16], strides = [1, 1]} : vector<8x64xf32> to vector<8x16xf32>
    %cst_121 = arith.constant dense<0.000000e+00> : vector<8x8xf32>
    %348 = tpu.matmul %345, %346, %cst_121 {dimension_numbers = #tpu.dot_dimension_numbers<[1], [1], [0], [0], [0, 0, 1, 0], [], []>} : vector<8x16xf32>, vector<8x16xf32>, vector<8x8xf32> -> vector<8x8xf32>
    %cst_122 = arith.constant 2.500000e-01 : f32
    %349 = vector.broadcast %cst_122 : f32 to vector<8x8xf32>
    %350 = arith.mulf %348, %349 : vector<8x8xf32>
    %351 = vector.broadcast %306 : vector<1x8xf32> to vector<8x8xf32>
    %352 = arith.addf %350, %351 : vector<8x8xf32>
    %cst_123 = arith.constant dense<0xFF800000> : vector<8xf32>
    %353 = vector.multi_reduction <maximumf>, %352, %cst_123 [1] : vector<8x8xf32> to vector<8xf32>
    %354 = vector.shape_cast %353 : vector<8xf32> to vector<8x1xf32>
    %355 = vector.broadcast %354 : vector<8x1xf32> to vector<8x8xf32>
    %356 = arith.subf %352, %355 : vector<8x8xf32>
    %357 = math.exp %356 : vector<8x8xf32>
    %cst_124 = arith.constant dense<0.000000e+00> : vector<8xf32>
    %358 = vector.multi_reduction <add>, %357, %cst_124 [1] : vector<8x8xf32> to vector<8xf32>
    %359 = vector.shape_cast %358 : vector<8xf32> to vector<8x1xf32>
    %360 = tpu.reciprocal %359 {approx = true} : vector<8x1xf32> -> vector<8x1xf32>
    %361 = vector.broadcast %360 : vector<8x1xf32> to vector<8x8xf32>
    %362 = arith.mulf %357, %361 : vector<8x8xf32>
    %cst_125 = arith.constant dense<0.000000e+00> : vector<8x16xf32>
    %363 = tpu.matmul %362, %347, %cst_125 {dimension_numbers = #tpu.dot_dimension_numbers<[1], [0], [0], [1], [0, 0, 1, 1], [], []>} : vector<8x8xf32>, vector<8x16xf32>, vector<8x16xf32> -> vector<8x16xf32>
    %364 = vector.extract_strided_slice %303 {offsets = [0, 48], sizes = [8, 16], strides = [1, 1]} : vector<8x64xf32> to vector<8x16xf32>
    %365 = vector.extract_strided_slice %304 {offsets = [0, 48], sizes = [8, 16], strides = [1, 1]} : vector<8x64xf32> to vector<8x16xf32>
    %366 = vector.extract_strided_slice %305 {offsets = [0, 48], sizes = [8, 16], strides = [1, 1]} : vector<8x64xf32> to vector<8x16xf32>
    %cst_126 = arith.constant dense<0.000000e+00> : vector<8x8xf32>
    %367 = tpu.matmul %364, %365, %cst_126 {dimension_numbers = #tpu.dot_dimension_numbers<[1], [1], [0], [0], [0, 0, 1, 0], [], []>} : vector<8x16xf32>, vector<8x16xf32>, vector<8x8xf32> -> vector<8x8xf32>
    %cst_127 = arith.constant 2.500000e-01 : f32
    %368 = vector.broadcast %cst_127 : f32 to vector<8x8xf32>
    %369 = arith.mulf %367, %368 : vector<8x8xf32>
    %370 = vector.broadcast %306 : vector<1x8xf32> to vector<8x8xf32>
    %371 = arith.addf %369, %370 : vector<8x8xf32>
    %cst_128 = arith.constant dense<0xFF800000> : vector<8xf32>
    %372 = vector.multi_reduction <maximumf>, %371, %cst_128 [1] : vector<8x8xf32> to vector<8xf32>
    %373 = vector.shape_cast %372 : vector<8xf32> to vector<8x1xf32>
    %374 = vector.broadcast %373 : vector<8x1xf32> to vector<8x8xf32>
    %375 = arith.subf %371, %374 : vector<8x8xf32>
    %376 = math.exp %375 : vector<8x8xf32>
    %cst_129 = arith.constant dense<0.000000e+00> : vector<8xf32>
    %377 = vector.multi_reduction <add>, %376, %cst_129 [1] : vector<8x8xf32> to vector<8xf32>
    %378 = vector.shape_cast %377 : vector<8xf32> to vector<8x1xf32>
    %379 = tpu.reciprocal %378 {approx = true} : vector<8x1xf32> -> vector<8x1xf32>
    %380 = vector.broadcast %379 : vector<8x1xf32> to vector<8x8xf32>
    %381 = arith.mulf %376, %380 : vector<8x8xf32>
    %cst_130 = arith.constant dense<0.000000e+00> : vector<8x16xf32>
    %382 = tpu.matmul %381, %366, %cst_130 {dimension_numbers = #tpu.dot_dimension_numbers<[1], [0], [0], [1], [0, 0, 1, 1], [], []>} : vector<8x8xf32>, vector<8x16xf32>, vector<8x16xf32> -> vector<8x16xf32>
    %383 = tpu.concatenate %325, %344, %363, %382 in 1 : vector<8x16xf32>, vector<8x16xf32>, vector<8x16xf32>, vector<8x16xf32> -> vector<8x64xf32>
    %384 = vector.extract_strided_slice %300 {offsets = [8, 0], sizes = [8, 64], strides = [1, 1]} : vector<16x64xf32> to vector<8x64xf32>
    %385 = vector.extract_strided_slice %301 {offsets = [8, 0], sizes = [8, 64], strides = [1, 1]} : vector<16x64xf32> to vector<8x64xf32>
    %386 = vector.extract_strided_slice %302 {offsets = [8, 0], sizes = [8, 64], strides = [1, 1]} : vector<16x64xf32> to vector<8x64xf32>
    %387 = vector.extract_strided_slice %27 {offsets = [1, 0], sizes = [1, 8], strides = [1, 1]} : vector<2x8xf32> to vector<1x8xf32>
    %388 = vector.extract_strided_slice %384 {offsets = [0, 0], sizes = [8, 16], strides = [1, 1]} : vector<8x64xf32> to vector<8x16xf32>
    %389 = vector.extract_strided_slice %385 {offsets = [0, 0], sizes = [8, 16], strides = [1, 1]} : vector<8x64xf32> to vector<8x16xf32>
    %390 = vector.extract_strided_slice %386 {offsets = [0, 0], sizes = [8, 16], strides = [1, 1]} : vector<8x64xf32> to vector<8x16xf32>
    %cst_131 = arith.constant dense<0.000000e+00> : vector<8x8xf32>
    %391 = tpu.matmul %388, %389, %cst_131 {dimension_numbers = #tpu.dot_dimension_numbers<[1], [1], [0], [0], [0, 0, 1, 0], [], []>} : vector<8x16xf32>, vector<8x16xf32>, vector<8x8xf32> -> vector<8x8xf32>
    %cst_132 = arith.constant 2.500000e-01 : f32
    %392 = vector.broadcast %cst_132 : f32 to vector<8x8xf32>
    %393 = arith.mulf %391, %392 : vector<8x8xf32>
    %394 = vector.broadcast %387 : vector<1x8xf32> to vector<8x8xf32>
    %395 = arith.addf %393, %394 : vector<8x8xf32>
    %cst_133 = arith.constant dense<0xFF800000> : vector<8xf32>
    %396 = vector.multi_reduction <maximumf>, %395, %cst_133 [1] : vector<8x8xf32> to vector<8xf32>
    %397 = vector.shape_cast %396 : vector<8xf32> to vector<8x1xf32>
    %398 = vector.broadcast %397 : vector<8x1xf32> to vector<8x8xf32>
    %399 = arith.subf %395, %398 : vector<8x8xf32>
    %400 = math.exp %399 : vector<8x8xf32>
    %cst_134 = arith.constant dense<0.000000e+00> : vector<8xf32>
    %401 = vector.multi_reduction <add>, %400, %cst_134 [1] : vector<8x8xf32> to vector<8xf32>
    %402 = vector.shape_cast %401 : vector<8xf32> to vector<8x1xf32>
    %403 = tpu.reciprocal %402 {approx = true} : vector<8x1xf32> -> vector<8x1xf32>
    %404 = vector.broadcast %403 : vector<8x1xf32> to vector<8x8xf32>
    %405 = arith.mulf %400, %404 : vector<8x8xf32>
    %cst_135 = arith.constant dense<0.000000e+00> : vector<8x16xf32>
    %406 = tpu.matmul %405, %390, %cst_135 {dimension_numbers = #tpu.dot_dimension_numbers<[1], [0], [0], [1], [0, 0, 1, 1], [], []>} : vector<8x8xf32>, vector<8x16xf32>, vector<8x16xf32> -> vector<8x16xf32>
    %407 = vector.extract_strided_slice %384 {offsets = [0, 16], sizes = [8, 16], strides = [1, 1]} : vector<8x64xf32> to vector<8x16xf32>
    %408 = vector.extract_strided_slice %385 {offsets = [0, 16], sizes = [8, 16], strides = [1, 1]} : vector<8x64xf32> to vector<8x16xf32>
    %409 = vector.extract_strided_slice %386 {offsets = [0, 16], sizes = [8, 16], strides = [1, 1]} : vector<8x64xf32> to vector<8x16xf32>
    %cst_136 = arith.constant dense<0.000000e+00> : vector<8x8xf32>
    %410 = tpu.matmul %407, %408, %cst_136 {dimension_numbers = #tpu.dot_dimension_numbers<[1], [1], [0], [0], [0, 0, 1, 0], [], []>} : vector<8x16xf32>, vector<8x16xf32>, vector<8x8xf32> -> vector<8x8xf32>
    %cst_137 = arith.constant 2.500000e-01 : f32
    %411 = vector.broadcast %cst_137 : f32 to vector<8x8xf32>
    %412 = arith.mulf %410, %411 : vector<8x8xf32>
    %413 = vector.broadcast %387 : vector<1x8xf32> to vector<8x8xf32>
    %414 = arith.addf %412, %413 : vector<8x8xf32>
    %cst_138 = arith.constant dense<0xFF800000> : vector<8xf32>
    %415 = vector.multi_reduction <maximumf>, %414, %cst_138 [1] : vector<8x8xf32> to vector<8xf32>
    %416 = vector.shape_cast %415 : vector<8xf32> to vector<8x1xf32>
    %417 = vector.broadcast %416 : vector<8x1xf32> to vector<8x8xf32>
    %418 = arith.subf %414, %417 : vector<8x8xf32>
    %419 = math.exp %418 : vector<8x8xf32>
    %cst_139 = arith.constant dense<0.000000e+00> : vector<8xf32>
    %420 = vector.multi_reduction <add>, %419, %cst_139 [1] : vector<8x8xf32> to vector<8xf32>
    %421 = vector.shape_cast %420 : vector<8xf32> to vector<8x1xf32>
    %422 = tpu.reciprocal %421 {approx = true} : vector<8x1xf32> -> vector<8x1xf32>
    %423 = vector.broadcast %422 : vector<8x1xf32> to vector<8x8xf32>
    %424 = arith.mulf %419, %423 : vector<8x8xf32>
    %cst_140 = arith.constant dense<0.000000e+00> : vector<8x16xf32>
    %425 = tpu.matmul %424, %409, %cst_140 {dimension_numbers = #tpu.dot_dimension_numbers<[1], [0], [0], [1], [0, 0, 1, 1], [], []>} : vector<8x8xf32>, vector<8x16xf32>, vector<8x16xf32> -> vector<8x16xf32>
    %426 = vector.extract_strided_slice %384 {offsets = [0, 32], sizes = [8, 16], strides = [1, 1]} : vector<8x64xf32> to vector<8x16xf32>
    %427 = vector.extract_strided_slice %385 {offsets = [0, 32], sizes = [8, 16], strides = [1, 1]} : vector<8x64xf32> to vector<8x16xf32>
    %428 = vector.extract_strided_slice %386 {offsets = [0, 32], sizes = [8, 16], strides = [1, 1]} : vector<8x64xf32> to vector<8x16xf32>
    %cst_141 = arith.constant dense<0.000000e+00> : vector<8x8xf32>
    %429 = tpu.matmul %426, %427, %cst_141 {dimension_numbers = #tpu.dot_dimension_numbers<[1], [1], [0], [0], [0, 0, 1, 0], [], []>} : vector<8x16xf32>, vector<8x16xf32>, vector<8x8xf32> -> vector<8x8xf32>
    %cst_142 = arith.constant 2.500000e-01 : f32
    %430 = vector.broadcast %cst_142 : f32 to vector<8x8xf32>
    %431 = arith.mulf %429, %430 : vector<8x8xf32>
    %432 = vector.broadcast %387 : vector<1x8xf32> to vector<8x8xf32>
    %433 = arith.addf %431, %432 : vector<8x8xf32>
    %cst_143 = arith.constant dense<0xFF800000> : vector<8xf32>
    %434 = vector.multi_reduction <maximumf>, %433, %cst_143 [1] : vector<8x8xf32> to vector<8xf32>
    %435 = vector.shape_cast %434 : vector<8xf32> to vector<8x1xf32>
    %436 = vector.broadcast %435 : vector<8x1xf32> to vector<8x8xf32>
    %437 = arith.subf %433, %436 : vector<8x8xf32>
    %438 = math.exp %437 : vector<8x8xf32>
    %cst_144 = arith.constant dense<0.000000e+00> : vector<8xf32>
    %439 = vector.multi_reduction <add>, %438, %cst_144 [1] : vector<8x8xf32> to vector<8xf32>
    %440 = vector.shape_cast %439 : vector<8xf32> to vector<8x1xf32>
    %441 = tpu.reciprocal %440 {approx = true} : vector<8x1xf32> -> vector<8x1xf32>
    %442 = vector.broadcast %441 : vector<8x1xf32> to vector<8x8xf32>
    %443 = arith.mulf %438, %442 : vector<8x8xf32>
    %cst_145 = arith.constant dense<0.000000e+00> : vector<8x16xf32>
    %444 = tpu.matmul %443, %428, %cst_145 {dimension_numbers = #tpu.dot_dimension_numbers<[1], [0], [0], [1], [0, 0, 1, 1], [], []>} : vector<8x8xf32>, vector<8x16xf32>, vector<8x16xf32> -> vector<8x16xf32>
    %445 = vector.extract_strided_slice %384 {offsets = [0, 48], sizes = [8, 16], strides = [1, 1]} : vector<8x64xf32> to vector<8x16xf32>
    %446 = vector.extract_strided_slice %385 {offsets = [0, 48], sizes = [8, 16], strides = [1, 1]} : vector<8x64xf32> to vector<8x16xf32>
    %447 = vector.extract_strided_slice %386 {offsets = [0, 48], sizes = [8, 16], strides = [1, 1]} : vector<8x64xf32> to vector<8x16xf32>
    %cst_146 = arith.constant dense<0.000000e+00> : vector<8x8xf32>
    %448 = tpu.matmul %445, %446, %cst_146 {dimension_numbers = #tpu.dot_dimension_numbers<[1], [1], [0], [0], [0, 0, 1, 0], [], []>} : vector<8x16xf32>, vector<8x16xf32>, vector<8x8xf32> -> vector<8x8xf32>
    %cst_147 = arith.constant 2.500000e-01 : f32
    %449 = vector.broadcast %cst_147 : f32 to vector<8x8xf32>
    %450 = arith.mulf %448, %449 : vector<8x8xf32>
    %451 = vector.broadcast %387 : vector<1x8xf32> to vector<8x8xf32>
    %452 = arith.addf %450, %451 : vector<8x8xf32>
    %cst_148 = arith.constant dense<0xFF800000> : vector<8xf32>
    %453 = vector.multi_reduction <maximumf>, %452, %cst_148 [1] : vector<8x8xf32> to vector<8xf32>
    %454 = vector.shape_cast %453 : vector<8xf32> to vector<8x1xf32>
    %455 = vector.broadcast %454 : vector<8x1xf32> to vector<8x8xf32>
    %456 = arith.subf %452, %455 : vector<8x8xf32>
    %457 = math.exp %456 : vector<8x8xf32>
    %cst_149 = arith.constant dense<0.000000e+00> : vector<8xf32>
    %458 = vector.multi_reduction <add>, %457, %cst_149 [1] : vector<8x8xf32> to vector<8xf32>
    %459 = vector.shape_cast %458 : vector<8xf32> to vector<8x1xf32>
    %460 = tpu.reciprocal %459 {approx = true} : vector<8x1xf32> -> vector<8x1xf32>
    %461 = vector.broadcast %460 : vector<8x1xf32> to vector<8x8xf32>
    %462 = arith.mulf %457, %461 : vector<8x8xf32>
    %cst_150 = arith.constant dense<0.000000e+00> : vector<8x16xf32>
    %463 = tpu.matmul %462, %447, %cst_150 {dimension_numbers = #tpu.dot_dimension_numbers<[1], [0], [0], [1], [0, 0, 1, 1], [], []>} : vector<8x8xf32>, vector<8x16xf32>, vector<8x16xf32> -> vector<8x16xf32>
    %464 = tpu.concatenate %406, %425, %444, %463 in 1 : vector<8x16xf32>, vector<8x16xf32>, vector<8x16xf32>, vector<8x16xf32> -> vector<8x64xf32>
    %465 = tpu.concatenate %383, %464 in 0 : vector<8x64xf32>, vector<8x64xf32> -> vector<16x64xf32>
    %c1_151 = arith.constant 1 : index
    %c0_152 = arith.constant 0 : index
    %c0_153 = arith.constant 0 : index
    %466 = vector.load %arg6[%c1_151, %c0_152, %c0_153] : memref<2x64x64xf32, #tpu.memory_space<vmem>>, vector<1x64x64xf32>
    %467 = vector.shape_cast %466 : vector<1x64x64xf32> to vector<64x64xf32>
    %cst_154 = arith.constant dense<0.000000e+00> : vector<16x64xf32>
    %468 = tpu.matmul %465, %467, %cst_154 {dimension_numbers = #tpu.dot_dimension_numbers<[1], [0], [0], [1], [0, 0, 1, 1], [], []>} : vector<16x64xf32>, vector<64x64xf32>, vector<16x64xf32> -> vector<16x64xf32>
    %c1_155 = arith.constant 1 : index
    %c0_156 = arith.constant 0 : index
    %c0_157 = arith.constant 0 : index
    %469 = vector.load %arg7[%c1_155, %c0_156, %c0_157] : memref<2x1x64xf32, #tpu.memory_space<vmem>>, vector<1x1x64xf32>
    %470 = vector.shape_cast %469 : vector<1x1x64xf32> to vector<1x64xf32>
    %471 = vector.broadcast %470 : vector<1x64xf32> to vector<16x64xf32>
    %472 = arith.addf %468, %471 : vector<16x64xf32>
    %473 = arith.addf %472, %292 : vector<16x64xf32>
    %c1_158 = arith.constant 1 : index
    %c0_159 = arith.constant 0 : index
    %c0_160 = arith.constant 0 : index
    %474 = vector.load %arg8[%c1_158, %c0_159, %c0_160] : memref<2x1x64xf32, #tpu.memory_space<vmem>>, vector<1x1x64xf32>
    %475 = vector.shape_cast %474 : vector<1x1x64xf32> to vector<1x64xf32>
    %c1_161 = arith.constant 1 : index
    %c0_162 = arith.constant 0 : index
    %c0_163 = arith.constant 0 : index
    %476 = vector.load %arg9[%c1_161, %c0_162, %c0_163] : memref<2x1x64xf32, #tpu.memory_space<vmem>>, vector<1x1x64xf32>
    %477 = vector.shape_cast %476 : vector<1x1x64xf32> to vector<1x64xf32>
    %cst_164 = arith.constant dense<0.000000e+00> : vector<16xf32>
    %478 = vector.multi_reduction <add>, %473, %cst_164 [1] : vector<16x64xf32> to vector<16xf32>
    %479 = vector.shape_cast %478 : vector<16xf32> to vector<16x1xf32>
    %cst_165 = arith.constant 6.400000e+01 : f32
    %480 = vector.broadcast %cst_165 : f32 to vector<16x1xf32>
    %481 = arith.divf %479, %480 : vector<16x1xf32>
    %482 = vector.broadcast %481 : vector<16x1xf32> to vector<16x64xf32>
    %483 = arith.subf %473, %482 : vector<16x64xf32>
    %484 = vector.broadcast %481 : vector<16x1xf32> to vector<16x64xf32>
    %485 = arith.subf %473, %484 : vector<16x64xf32>
    %486 = arith.mulf %483, %485 : vector<16x64xf32>
    %cst_166 = arith.constant dense<0.000000e+00> : vector<16xf32>
    %487 = vector.multi_reduction <add>, %486, %cst_166 [1] : vector<16x64xf32> to vector<16xf32>
    %488 = vector.shape_cast %487 : vector<16xf32> to vector<16x1xf32>
    %cst_167 = arith.constant 6.400000e+01 : f32
    %489 = vector.broadcast %cst_167 : f32 to vector<16x1xf32>
    %490 = arith.divf %488, %489 : vector<16x1xf32>
    %491 = vector.broadcast %481 : vector<16x1xf32> to vector<16x64xf32>
    %492 = arith.subf %473, %491 : vector<16x64xf32>
    %cst_168 = arith.constant 9.99999974E-6 : f32
    %493 = vector.broadcast %cst_168 : f32 to vector<16x1xf32>
    %494 = arith.addf %490, %493 : vector<16x1xf32>
    %495 = math.rsqrt %494 : vector<16x1xf32>
    %496 = vector.broadcast %495 : vector<16x1xf32> to vector<16x64xf32>
    %497 = arith.mulf %492, %496 : vector<16x64xf32>
    %498 = vector.broadcast %475 : vector<1x64xf32> to vector<16x64xf32>
    %499 = arith.mulf %497, %498 : vector<16x64xf32>
    %500 = vector.broadcast %477 : vector<1x64xf32> to vector<16x64xf32>
    %501 = arith.addf %499, %500 : vector<16x64xf32>
    %c1_169 = arith.constant 1 : index
    %c0_170 = arith.constant 0 : index
    %c0_171 = arith.constant 0 : index
    %502 = vector.load %arg10[%c1_169, %c0_170, %c0_171] : memref<2x64x256xf32, #tpu.memory_space<vmem>>, vector<1x64x256xf32>
    %503 = vector.shape_cast %502 : vector<1x64x256xf32> to vector<64x256xf32>
    %cst_172 = arith.constant dense<0.000000e+00> : vector<16x256xf32>
    %504 = tpu.matmul %501, %503, %cst_172 {dimension_numbers = #tpu.dot_dimension_numbers<[1], [0], [0], [1], [0, 0, 1, 1], [], []>} : vector<16x64xf32>, vector<64x256xf32>, vector<16x256xf32> -> vector<16x256xf32>
    %c1_173 = arith.constant 1 : index
    %c0_174 = arith.constant 0 : index
    %c0_175 = arith.constant 0 : index
    %505 = vector.load %arg11[%c1_173, %c0_174, %c0_175] : memref<2x1x256xf32, #tpu.memory_space<vmem>>, vector<1x1x256xf32>
    %506 = vector.shape_cast %505 : vector<1x1x256xf32> to vector<1x256xf32>
    %507 = vector.broadcast %506 : vector<1x256xf32> to vector<16x256xf32>
    %508 = arith.addf %504, %507 : vector<16x256xf32>
    %cst_176 = arith.constant 5.000000e-01 : f32
    %509 = vector.broadcast %cst_176 : f32 to vector<16x256xf32>
    %510 = arith.mulf %509, %508 : vector<16x256xf32>
    %cst_177 = arith.constant 4.471500e-02 : f32
    %511 = vector.broadcast %cst_177 : f32 to vector<16x256xf32>
    %512 = arith.mulf %511, %508 : vector<16x256xf32>
    %513 = arith.mulf %512, %508 : vector<16x256xf32>
    %514 = arith.mulf %513, %508 : vector<16x256xf32>
    %515 = arith.addf %508, %514 : vector<16x256xf32>
    %cst_178 = arith.constant 0.797884583 : f32
    %516 = vector.broadcast %cst_178 : f32 to vector<16x256xf32>
    %517 = arith.mulf %516, %515 : vector<16x256xf32>
    %518 = math.tanh %517 : vector<16x256xf32>
    %cst_179 = arith.constant 1.000000e+00 : f32
    %519 = vector.broadcast %cst_179 : f32 to vector<16x256xf32>
    %520 = arith.addf %519, %518 : vector<16x256xf32>
    %521 = arith.mulf %510, %520 : vector<16x256xf32>
    %c1_180 = arith.constant 1 : index
    %c0_181 = arith.constant 0 : index
    %c0_182 = arith.constant 0 : index
    %522 = vector.load %arg12[%c1_180, %c0_181, %c0_182] : memref<2x256x64xf32, #tpu.memory_space<vmem>>, vector<1x256x64xf32>
    %523 = vector.shape_cast %522 : vector<1x256x64xf32> to vector<256x64xf32>
    %cst_183 = arith.constant dense<0.000000e+00> : vector<16x64xf32>
    %524 = tpu.matmul %521, %523, %cst_183 {dimension_numbers = #tpu.dot_dimension_numbers<[1], [0], [0], [1], [0, 0, 1, 1], [], []>} : vector<16x256xf32>, vector<256x64xf32>, vector<16x64xf32> -> vector<16x64xf32>
    %c1_184 = arith.constant 1 : index
    %c0_185 = arith.constant 0 : index
    %c0_186 = arith.constant 0 : index
    %525 = vector.load %arg13[%c1_184, %c0_185, %c0_186] : memref<2x1x64xf32, #tpu.memory_space<vmem>>, vector<1x1x64xf32>
    %526 = vector.shape_cast %525 : vector<1x1x64xf32> to vector<1x64xf32>
    %527 = vector.broadcast %526 : vector<1x64xf32> to vector<16x64xf32>
    %528 = arith.addf %524, %527 : vector<16x64xf32>
    %529 = arith.addf %528, %501 : vector<16x64xf32>
    %c1_187 = arith.constant 1 : index
    %c0_188 = arith.constant 0 : index
    %c0_189 = arith.constant 0 : index
    %530 = vector.load %arg14[%c1_187, %c0_188, %c0_189] : memref<2x1x64xf32, #tpu.memory_space<vmem>>, vector<1x1x64xf32>
    %531 = vector.shape_cast %530 : vector<1x1x64xf32> to vector<1x64xf32>
    %c1_190 = arith.constant 1 : index
    %c0_191 = arith.constant 0 : index
    %c0_192 = arith.constant 0 : index
    %532 = vector.load %arg15[%c1_190, %c0_191, %c0_192] : memref<2x1x64xf32, #tpu.memory_space<vmem>>, vector<1x1x64xf32>
    %533 = vector.shape_cast %532 : vector<1x1x64xf32> to vector<1x64xf32>
    %cst_193 = arith.constant dense<0.000000e+00> : vector<16xf32>
    %534 = vector.multi_reduction <add>, %529, %cst_193 [1] : vector<16x64xf32> to vector<16xf32>
    %535 = vector.shape_cast %534 : vector<16xf32> to vector<16x1xf32>
    %cst_194 = arith.constant 6.400000e+01 : f32
    %536 = vector.broadcast %cst_194 : f32 to vector<16x1xf32>
    %537 = arith.divf %535, %536 : vector<16x1xf32>
    %538 = vector.broadcast %537 : vector<16x1xf32> to vector<16x64xf32>
    %539 = arith.subf %529, %538 : vector<16x64xf32>
    %540 = vector.broadcast %537 : vector<16x1xf32> to vector<16x64xf32>
    %541 = arith.subf %529, %540 : vector<16x64xf32>
    %542 = arith.mulf %539, %541 : vector<16x64xf32>
    %cst_195 = arith.constant dense<0.000000e+00> : vector<16xf32>
    %543 = vector.multi_reduction <add>, %542, %cst_195 [1] : vector<16x64xf32> to vector<16xf32>
    %544 = vector.shape_cast %543 : vector<16xf32> to vector<16x1xf32>
    %cst_196 = arith.constant 6.400000e+01 : f32
    %545 = vector.broadcast %cst_196 : f32 to vector<16x1xf32>
    %546 = arith.divf %544, %545 : vector<16x1xf32>
    %547 = vector.broadcast %537 : vector<16x1xf32> to vector<16x64xf32>
    %548 = arith.subf %529, %547 : vector<16x64xf32>
    %cst_197 = arith.constant 9.99999974E-6 : f32
    %549 = vector.broadcast %cst_197 : f32 to vector<16x1xf32>
    %550 = arith.addf %546, %549 : vector<16x1xf32>
    %551 = math.rsqrt %550 : vector<16x1xf32>
    %552 = vector.broadcast %551 : vector<16x1xf32> to vector<16x64xf32>
    %553 = arith.mulf %548, %552 : vector<16x64xf32>
    %554 = vector.broadcast %531 : vector<1x64xf32> to vector<16x64xf32>
    %555 = arith.mulf %553, %554 : vector<16x64xf32>
    %556 = vector.broadcast %533 : vector<1x64xf32> to vector<16x64xf32>
    %557 = arith.addf %555, %556 : vector<16x64xf32>
    %558 = vector.extract_strided_slice %557 {offsets = [0, 0], sizes = [1, 64], strides = [1, 1]} : vector<16x64xf32> to vector<1x64xf32>
    %559 = vector.extract_strided_slice %557 {offsets = [8, 0], sizes = [1, 64], strides = [1, 1]} : vector<16x64xf32> to vector<1x64xf32>
    %560 = tpu.concatenate %558, %559 in 0 : vector<1x64xf32>, vector<1x64xf32> -> vector<2x64xf32>
    %c0_198 = arith.constant 0 : index
    %c0_199 = arith.constant 0 : index
    %561 = vector.load %arg16[%c0_198, %c0_199] : memref<64x64xf32, #tpu.memory_space<vmem>>, vector<64x64xf32>
    %cst_200 = arith.constant dense<0.000000e+00> : vector<2x64xf32>
    %562 = tpu.matmul %560, %561, %cst_200 {dimension_numbers = #tpu.dot_dimension_numbers<[1], [0], [0], [1], [0, 0, 1, 1], [], []>} : vector<2x64xf32>, vector<64x64xf32>, vector<2x64xf32> -> vector<2x64xf32>
    %c0_201 = arith.constant 0 : index
    %c0_202 = arith.constant 0 : index
    %563 = vector.load %arg17[%c0_201, %c0_202] : memref<1x64xf32, #tpu.memory_space<vmem>>, vector<1x64xf32>
    %564 = vector.broadcast %563 : vector<1x64xf32> to vector<2x64xf32>
    %565 = arith.addf %562, %564 : vector<2x64xf32>
    %cst_203 = arith.constant 0.000000e+00 : f32
    %566 = vector.broadcast %cst_203 : f32 to vector<2x64xf32>
    %567 = arith.maximumf %565, %566 : vector<2x64xf32>
    %c0_204 = arith.constant 0 : index
    %c0_205 = arith.constant 0 : index
    %568 = vector.load %arg18[%c0_204, %c0_205] : memref<64x128xf32, #tpu.memory_space<vmem>>, vector<64x128xf32>
    %cst_206 = arith.constant dense<0.000000e+00> : vector<2x128xf32>
    %569 = tpu.matmul %567, %568, %cst_206 {dimension_numbers = #tpu.dot_dimension_numbers<[1], [0], [0], [1], [0, 0, 1, 1], [], []>} : vector<2x64xf32>, vector<64x128xf32>, vector<2x128xf32> -> vector<2x128xf32>
    %c0_207 = arith.constant 0 : index
    %c0_208 = arith.constant 0 : index
    %570 = vector.load %arg19[%c0_207, %c0_208] : memref<1x128xf32, #tpu.memory_space<vmem>>, vector<1x128xf32>
    %571 = vector.broadcast %570 : vector<1x128xf32> to vector<2x128xf32>
    %572 = arith.addf %569, %571 : vector<2x128xf32>
    %c0_209 = arith.constant 0 : index
    %c0_210 = arith.constant 0 : index
    %573 = vector.load %arg20[%c0_209, %c0_210] : memref<2x128xf32, #tpu.memory_space<vmem>>, vector<2x128xf32>
    tpu.vector_store %arg20[%c0_209, %c0_210], %572 {strides = array<i32>} : memref<2x128xf32, #tpu.memory_space<vmem>>, vector<2x128xf32>,
    return
  }
}

</mosaic_0001>

<bundles_post_ra>
// kernel: roberta_forward.1
= control target key start
LH: loop header
LB: loop body
LE: loop exit
PB: predicated region body
PF: predicated region fallthrough
CT: control target
= control target key end

     0   :  { %s6197_s0 = inlined_call_operand.vmem [shape: f32[16,64], index: 0, kind: input, shape index: {}]   ;;  %s6198_s1 = inlined_call_operand.vmem [shape: f32[2,8], index: 1, kind: input, shape index: {}]   ;;  %s6199_s2 = inlined_call_operand.vmem [shape: f32[1,64], index: 2, kind: input, shape index: {}]   ;;  %s6200_s3 = inlined_call_operand.vmem [shape: f32[1,64], index: 3, kind: input, shape index: {}]   ;;  %s6201_s4 = inlined_call_operand.vmem [shape: f32[2,64,192], index: 4, kind: input, shape index: {}]   ;;  %s6202_s5 = inlined_call_operand.vmem [shape: f32[2,1,192], index: 5, kind: input, shape index: {}]   ;;  %s6203_s6 = inlined_call_operand.vmem [shape: f32[2,64,64], index: 6, kind: input, shape index: {}]   ;;  %s6204_s7 = inlined_call_operand.vmem [shape: f32[2,1,64], index: 7, kind: input, shape index: {}]   ;;  %s6205_s8 = inlined_call_operand.vmem [shape: f32[2,1,64], index: 8, kind: input, shape index: {}]   ;;  %s6206_s9 = inlined_call_operand.vmem [shape: f32[2,1,64], index: 9, kind: input, shape index: {}]   ;;  %s6207_s10 = inlined_call_operand.vmem [shape: f32[2,64,256], index: 10, kind: input, shape index: {}]   ;;  %s6208_s11 = inlined_call_operand.vmem [shape: f32[2,1,256], index: 11, kind: input, shape index: {}]   ;;  %s6209_s12 = inlined_call_operand.vmem [shape: f32[2,256,64], index: 12, kind: input, shape index: {}]   ;;  %s6210_s13 = inlined_call_operand.vmem [shape: f32[2,1,64], index: 13, kind: input, shape index: {}]   ;;  %s6211_s14 = inlined_call_operand.vmem [shape: f32[2,1,64], index: 14, kind: input, shape index: {}]   ;;  %s6212_s15 = inlined_call_operand.vmem [shape: f32[2,1,64], index: 15, kind: input, shape index: {}]   ;;  %s6213_s16 = inlined_call_operand.vmem [shape: f32[64,64], index: 16, kind: input, shape index: {}]   ;;  %s6214_s17 = inlined_call_operand.vmem [shape: f32[1,64], index: 17, kind: input, shape index: {}]   ;;  %s6215_s18 = inlined_call_operand.vmem [shape: f32[64,128], index: 18, kind: input, shape index: {}]   ;;  %s6216_s19 = inlined_call_operand.vmem [shape: f32[1,128], index: 19, kind: input, shape index: {}]   ;;  %s6217_s20 = inlined_call_operand.hbm [shape: f32[2,128], index: 20, kind: output, shape index: {}]  }
   0x1   :  { %6228 = sst [smem:[#allocation5_spill]] %s6197_s0 }
   0x2   :  { %6229 = sst [smem:[#allocation6_spill]] %s6198_s1 }
   0x3   :  { %6230 = sst [smem:[#allocation7_spill]] %s6199_s2 }
   0x4   :  { %6231 = sst [smem:[#allocation8_spill]] %s6200_s3 }
   0x5   :  { %6232 = sst [smem:[#allocation9_spill]] %s6201_s4 }
   0x6   :  { %s6233_s23 = sld [smem:[#allocation5_spill]]  ;;  %vm70_vm0 = vcmask 523264  }
   0xc   :  { %v66_v0 = vld [vmem:[%s6233_s23] sm:$0xff] }
   0xd   :  { %25 = vsyncpa [#allocation3], 0  ;;  %v71_v1 = vsel %vm70_vm0, %v66_v0, 0.0  ;;  %s6234_s25 = sld [smem:[#allocation9_spill]]  ;;  %v5067_v20 = vmov 0.0   ;;  %s6235_s30 = sld [smem:[#allocation7_spill]]  ;;  %v133_v41 = vlaneseq }
   0xe   :  { %72 = vadd.xlane.f32.xlu0 %v71_v1  ;;  %213 = vmatprep.mubr.f32.mxu0 %v5067_v20  ;;  %s6236_s1 = sld [smem:[#allocation8_spill]]  ;;  %vm5068_vm1 = vmmov 0   ;;  %v131_v44 = vld [vmem:[%s6202_s5] sm:$0x3]  ;;  %s6222_s2 = smov 48   ;;  %vm229_vm2 = vcmask 130048  }
   0xf   :  { %4512 = vmatprep.subr.mxu1 %v5067_v20  ;;  %v134_v42 = vshrl.u32 %v133_v41, 7  ;;  %4514 = vmatprep.mubr.msk.f32.mxu1 %vm5068_vm1, %v5067_v20  ;;  %s5070_s3 = smov 64   ;;  %s6237_s28 = sld [smem:[#allocation6_spill]]  ;;  %vm310_vm3 = vcmask 64512   ;;  %v67_v1 = vld [vmem:[%s6233_s23 + $0x8] sm:$0xff]  ;;  %vm910_vm4 = vcmask 261120  }
  0x10   :  { %s5071_s4 = smov 112   ;;  %s5072_s0 = smov 32   ;;  %vm912_vm5 = vcmask 392192   ;;  %vm3982_vm6 = vcmask 1040384  }
  0x11   :  { %v5258_v43 = vsub.s32 0, %v134_v42  ;;  %v5273_v49 = vsub.s32 1, %v134_v42  ;;  %s6224_s23 = smov 96   ;;  %s6226_s21 = smov 16  }
  0x12   :  { %s6238_s29 = smov 16   ;;  %s6241_s22 = smov 48  }
  0x13   :  { %v116_v7 = vld [vmem:[%s6234_s25 + $0x8] sm:$0xff]  ;;  %v118_v8 = vld [vmem:[%s6234_s25 + $0x18] sm:$0xff]  ;;  %v115_v10 = vld [vmem:[%s6234_s25] sm:$0xff]  ;;  %v5264_v45 = vrot.slane %v131_v44, %v5258_v43  ;;  %v5276_v50 = vrot.slane %v131_v44, %v5273_v49 }
  0x14   :  { %v4748_v9 = vpack.c.bf16 %v118_v8, %v116_v7  ;;  %v117_v11 = vld [vmem:[%s6234_s25 + $0x10] sm:$0xff]  ;;  %v120_v13 = vld [vmem:[%s6234_s25 + $0x28] sm:$0xff]  ;;  %v122_v14 = vld [vmem:[%s6234_s25 + $0x38] sm:$0xff] }
  0x15   :  { %v4750_v12 = vpack.c.bf16 %v117_v11, %v115_v10  ;;  %v119_v15 = vld [vmem:[%s6234_s25 + $0x20] sm:$0xff]  ;;  %v4752_v16 = vpack.c.bf16 %v122_v14, %v120_v13  ;;  %v121_v17 = vld [vmem:[%s6234_s25 + $0x30] sm:$0xff]  ;;  %v124_v18 = vld [vmem:[%s6234_s25 + $0x48] sm:$0xff] }
  0x16   :  { %4749 = vmatprep.subr.bf16.mxu0 %v4748_v9  ;;  %v126_v19 = vld [vmem:[%s6234_s25 + $0x58] sm:$0xff]  ;;  %v4754_v21 = vpack.c.bf16 %v121_v17, %v119_v15  ;;  %v123_v23 = vld [vmem:[%s6234_s25 + $0x40] sm:$0xff]  ;;  %v125_v24 = vld [vmem:[%s6234_s25 + $0x50] sm:$0xff] }
  0x17   :  { %4751 = vmatpush1.bf16.msra.mxu0 %v4750_v12  ;;  %v4756_v22 = vpack.c.bf16 %v126_v19, %v124_v18  ;;  %v128_v25 = vld [vmem:[%s6234_s25 + $0x68] sm:$0xff]  ;;  %v130_v26 = vld [vmem:[%s6234_s25 + $0x78] sm:$0xff]  ;;  %v4758_v27 = vpack.c.bf16 %v125_v24, %v123_v23  ;;  %v127_v29 = vld [vmem:[%s6234_s25 + $0x60] sm:$0xff] }
  0x18   :  { %4753 = vmatprep.subr.bf16.mxu0 %v4752_v16  ;;  %v4760_v28 = vpack.c.bf16 %v130_v26, %v128_v25  ;;  %v129_v30 = vld [vmem:[%s6234_s25 + $0x70] sm:$0xff]  ;;  %v5242_v36 = vld [vmem:[%s6235_s30] ss:$0 sm:$0xff]  ;;  %s6240_s30 = smov 80  }
  0x19   :  { %v4762_v31 = vpack.c.bf16 %v129_v30, %v127_v29  ;;  %v5247_v38 = vld [vmem:[%s6236_s1] ss:$0 sm:$0xff]  ;;  %s6220_s1 = smov 80  }
  0x1a   :  { %v5292_v53 = vld [vmem:[%s6237_s28] sm:$0x3] }
  0x1b   :  { %4755 = vmatpush1.bf16.msra.mxu0 %v4754_v21  ;;  %v5296_v54 = vrot.slane %v5292_v53, %v5258_v43 }
  0x1c   :  { %4757 = vmatprep.subr.bf16.mxu0 %v4756_v22 }
  0x1f   :  { %4759 = vmatpush1.bf16.msra.mxu0 %v4758_v27 }
  0x20   :  { %4761 = vmatprep.subr.bf16.mxu0 %v4760_v28 }
  0x23   :  { %4763 = vmatpush1.bf16.msra.mxu0 %v4762_v31 }
  0x24   :  { %4537 = vmatprep.subr.mxu0 %v5067_v20 }
  0x9b   :  { %v73_v2 = vpop.xlane.xlu0 %72 }
  0x9c   :  { %v78_v3 = vmul.f32 0.015625, %v73_v2  ;;  %v74_v2 = vsel %vm70_vm0, %v67_v1, 0.0 }
  0x9e   :  { %v80_v4 = vsub.f32 %v66_v0, %v78_v3 }
  0xa0   :  { %v82_v5 = vmul.f32 %v80_v4, %v80_v4 }
  0xa2   :  { %v84_v6 = vsel %vm70_vm0, %v82_v5, 0.0 }
  0xa3   :  { %85 = vadd.xlane.f32.xlu0 %v84_v6 }
 0x130   :  { %v86_v32 = vpop.xlane.xlu0 %85 }
 0x131   :  { %v90_v33 = vmul.f32 0.015625, %v86_v32 }
 0x133   :  { %v92_v34 = vadd.f32 1e-05, %v90_v33 }
 0x135   :  { %4943 = vrsqrt.f32 %v92_v34 }
 0x13f   :  { %v4944_v35 = vpop.eup %4943 }
 0x140   :  { %v96_v37 = vmul.f32 %v4944_v35, %v80_v4 }
 0x142   :  { %v104_v39 = vmul.f32 %v5242_v36, %v96_v37 }
 0x144   :  { %v5251_v40 = vadd.f32 %v5247_v38, %v104_v39 }
 0x146   :  { %4178 = vmatmul.mubr.msk.f32.vlgmr.msra.gmra.mrb[0].mxu0 %vm70_vm0, %v5251_v40 }
 0x147   :  { %219 = vmatprep.mubr.f32.mxu0 %v5067_v20 }
 0x219   :  { %v215_v46 = vpop.f32.mrb[0].mxu0 }
 0x21a   :  { %v5267_v47 = vadd.f32 %v215_v46, %v5264_v45  ;;  %v217_v48 = vpop.f32.mrb[1].mxu0 }
 0x21b   :  { %v5281_v52 = vadd.f32 %v217_v48, %v5276_v50 }
 0x21c   :  { %397 = vrot.lane.b32.xlu0 %v5267_v47, %s6222_s2  ;;  %227 = vrot.lane.b32.xlu1 %v5267_v47, %s5070_s3 }
 0x28e   :  { %v228_v51 = vpop.permute.xlu1 %227  ;;  %v398_v3 = vpop.permute.xlu0 %397 }
 0x28f   :  { %4513 = vmatpush3.xpose.msk.msra.mxu1 %vm229_vm2, %v228_v51 }
 0x290   :  { %4517 = vmatprep.subr.mxu1 %v5067_v20 }
 0x292   :  { %4515 = vmatmul.mubr.msk.f32.vlgmr.msra.gmra.mrb[0].mxu1 %vm229_vm2, %v5267_v47 }
 0x293   :  { %4518 = vmatpush3.msra.mxu1 %v5281_v52  ;;  %4519 = vmatprep.mubr.msk.f32.mxu1 %vm5068_vm1, %v5067_v20 }
 0x294   :  { %4522 = vmatprep.subr.mxu1 %v5067_v20 }
 0x365   :  { %v300_v55 = vpop.f32.mrb[0].mxu1 }
 0x366   :  { %v304_v56 = vmul.f32 0.25, %v300_v55  ;;  %v4516_v57 = vpop.f32.mrb[1].mxu1 }
 0x368   :  { %v309_v58 = vadd.f32 %v5296_v54, %v304_v56 }
 0x36a   :  { %v311_v59 = vsel %vm310_vm3, %v309_v58, -inf }
 0x36b   :  { %312 = vmax.xlane.f32.xlu1 %v311_v59 }
 0x3f8   :  { %v313_v60 = vpop.xlane.xlu1 %312 }
 0x3f9   :  { %v314_v61 = vsub.f32 %v309_v58, %v313_v60 }
 0x3fb   :  { %v315_v62 = vmul.f32 1.442695, %v314_v61 }
 0x3fd   :  { %4945 = vpow2.f32 %v315_v62 }
 0x407   :  { %v4946_v63 = vpop.eup %4945 }
 0x408   :  { %v317_v0 = vsel %vm310_vm3, %v4946_v63, 0.0 }
 0x409   :  { %318 = vadd.xlane.f32.xlu0 %v317_v0 }
 0x41f   :  { %395 = vrot.lane.b32.xlu0 %v5267_v47, %s5071_s4 }
 0x43e   :  { %75 = vadd.xlane.f32.xlu0 %v74_v2 }
 0x454   :  { %565 = vrot.lane.b32.xlu0 %v5267_v47, %s5072_s0 }
 0x496   :  { %v319_v4 = vpop.xlane.xlu0 %318 }
 0x497   :  { %4947 = vrcp.f32 %v319_v4  ;;  %v5386_v4 = vrot.slane %v5292_v53, %v5273_v49 }
 0x49a   :  { %v396_v7 = vpop.permute.xlu0 %395 }
 0x4a1   :  { %v4948_v5 = vpop.eup %4947 }
 0x4a2   :  { %v321_v6 = vmul.f32 %v4948_v5, %v4946_v63 }
 0x4a4   :  { %4520 = vmatmul.mubr.msk.f32.vlgmr.msra.gmra.mrb[2].mxu1 %vm310_vm3, %v321_v6 }
 0x4a5   :  { %4523 = vmatpush3.xpose.msk.msra.mxu1 %vm229_vm2, %v398_v3  ;;  %4524 = vmatprep.mubr.msk.f32.mxu1 %vm5068_vm1, %v5067_v20 }
 0x4a6   :  { %4527 = vmatprep.subr.mxu1 %v5067_v20 }
 0x4a8   :  { %4525 = vmatmul.mubr.msk.f32.vlgmr.msra.gmra.mrb[4].mxu1 %vm229_vm2, %v396_v7 }
 0x4a9   :  { %4529 = vmatprep.mubr.msk.f32.mxu1 %vm5068_vm1, %v5067_v20 }
 0x4cb   :  { %v76_v8 = vpop.xlane.xlu0 %75 }
 0x4cc   :  { %v79_v9 = vmul.f32 0.015625, %v76_v8 }
 0x4ce   :  { %v81_v10 = vsub.f32 %v67_v1, %v79_v9 }
 0x4d0   :  { %v83_v11 = vmul.f32 %v81_v10, %v81_v10 }
 0x4d2   :  { %v87_v12 = vsel %vm70_vm0, %v83_v11, 0.0 }
 0x4d3   :  { %88 = vadd.xlane.f32.xlu1 %v87_v12 }
 0x560   :  { %v89_v13 = vpop.xlane.xlu1 %88 }
 0x561   :  { %v91_v14 = vmul.f32 0.015625, %v89_v13 }
 0x563   :  { %v93_v15 = vadd.f32 1e-05, %v91_v14 }
 0x565   :  { %4949 = vrsqrt.f32 %v93_v15 }
 0x56f   :  { %v4950_v16 = vpop.eup %4949 }
 0x570   :  { %v97_v17 = vmul.f32 %v4950_v16, %v81_v10 }
 0x572   :  { %v105_v18 = vmul.f32 %v5242_v36, %v97_v17 }
 0x574   :  { %v5320_v19 = vadd.f32 %v5247_v38, %v105_v18 }
 0x576   :  { %4179 = vmatmul.mubr.msk.f32.gmra.mrb[2].mxu0 %vm70_vm0, %v5320_v19 }
 0x577   :  { %v5324_v21 = vpop.f32.mrb[2].mxu1  ;;  %4539 = vmatprep.mubr.msk.f32.mxu0 %vm5068_vm1, %v5067_v20 }
 0x578   :  { %v4521_v22 = vpop.f32.mrb[3].mxu1 }
 0x57b   :  { %v469_v23 = vpop.f32.mrb[4].mxu1 }
 0x57c   :  { %v473_v24 = vmul.f32 0.25, %v469_v23  ;;  %v4526_v25 = vpop.f32.mrb[5].mxu1 }
 0x57e   :  { %v474_v26 = vadd.f32 %v473_v24, %v5296_v54 }
 0x580   :  { %v475_v27 = vsel %vm310_vm3, %v474_v26, -inf }
 0x581   :  { %476 = vmax.xlane.f32.xlu1 %v475_v27 }
 0x592   :  { %487 = vrot.lane.b32.xlu1 %v5281_v52, %s5071_s4 }
 0x596   :  { %563 = vrot.lane.b32.xlu1 %v5267_v47, %s6224_s23 }
 0x59a   :  { %732 = vrot.lane.b32.xlu1 %v5267_v47, %s6226_s21 }
 0x59e   :  { %730 = vrot.lane.b32.xlu1 %v5267_v47, %s6220_s1 }
 0x60e   :  { %v477_v28 = vpop.xlane.xlu1 %476 }
 0x60f   :  { %v478_v29 = vsub.f32 %v474_v26, %v477_v28 }
 0x611   :  { %v479_v30 = vmul.f32 1.442695, %v478_v29 }
 0x612   :  { %v488_v31 = vpop.permute.xlu1 %487 }
 0x613   :  { %4951 = vpow2.f32 %v479_v30  ;;  %4528 = vmatpush3.msra.mxu1 %v488_v31 }
 0x614   :  { %4532 = vmatprep.subr.mxu1 %v5067_v20 }
 0x616   :  { %v564_v37 = vpop.permute.xlu1 %563 }
 0x61a   :  { %v733_v38 = vpop.permute.xlu1 %732 }
 0x61d   :  { %v4952_v32 = vpop.eup %4951 }
 0x61e   :  { %v481_v33 = vsel %vm310_vm3, %v4952_v32, 0.0  ;;  %v731_v39 = vpop.permute.xlu1 %730 }
 0x61f   :  { %482 = vadd.xlane.f32.xlu1 %v481_v33 }
 0x649   :  { %v221_v34 = vpop.f32.mrb[2].mxu0 }
 0x64a   :  { %v222_v35 = vadd.f32 %v221_v34, %v5264_v45  ;;  %v5341_v36 = vpop.f32.mrb[3].mxu0  ;;  %v566_v45 = vpop.permute.xlu0 %565 }
 0x64c   :  { %1251 = vrot.lane.b32.xlu0 %v222_v35, %s5072_s0  ;;  %915 = vrot.lane.b32.xlu1 %v222_v35, %s5070_s3 }
 0x650   :  { %1418 = vrot.lane.b32.xlu0 %v222_v35, %s6226_s21  ;;  %1083 = vrot.lane.b32.xlu1 %v222_v35, %s6222_s2 }
 0x654   :  { %1081 = vrot.lane.b32.xlu1 %v222_v35, %s5071_s4 }
 0x658   :  { %1249 = vrot.lane.b32.xlu1 %v222_v35, %s6224_s23 }
 0x65c   :  { %1416 = vrot.lane.b32.xlu1 %v222_v35, %s6220_s1 }
 0x6ac   :  { %v483_v41 = vpop.xlane.xlu1 %482 }
 0x6ad   :  { %4953 = vrcp.f32 %v483_v41 }
 0x6b7   :  { %v4954_v42 = vpop.eup %4953 }
 0x6b8   :  { %v485_v44 = vmul.f32 %v4954_v42, %v4952_v32 }
 0x6ba   :  { %4530 = vmatmul.mubr.msk.f32.vlgmr.msra.gmra.mrb[6].mxu1 %vm310_vm3, %v485_v44  ;;  %v224_v44 = vadd.f32 %v5341_v36, %v5276_v50 }
 0x6bb   :  { %4533 = vmatpush3.xpose.msk.msra.mxu1 %vm229_vm2, %v566_v45  ;;  %4534 = vmatprep.mubr.msk.f32.mxu1 %vm5068_vm1, %v5067_v20 }
 0x6bc   :  { %4542 = vmatprep.subr.mxu1 %v5067_v20 }
 0x6be   :  { %4535 = vmatmul.mubr.msk.f32.vlgmr.msra.gmra.mrb[8].mxu1 %vm229_vm2, %v564_v37  ;;  %v916_v46 = vpop.permute.xlu1 %915  ;;  %v1252_v51 = vpop.permute.xlu0 %1251 }
 0x6bf   :  { %4543 = vmatpush3.xpose.msk.msra.mxu1 %vm229_vm2, %v733_v38  ;;  %4544 = vmatprep.mubr.msk.f32.mxu1 %vm5068_vm1, %v5067_v20 }
 0x6c0   :  { %4552 = vmatprep.subr.mxu1 %v5067_v20 }
 0x6c2   :  { %4545 = vmatmul.mubr.msk.f32.vlgmr.msra.gmra.mrb[10].mxu1 %vm229_vm2, %v731_v39  ;;  %v1084_v47 = vpop.permute.xlu1 %1083  ;;  %v1419_v56 = vpop.permute.xlu0 %1418 }
 0x6c3   :  { %4553 = vmatpush3.xpose.msk.msra.mxu1 %vm229_vm2, %v916_v46  ;;  %4554 = vmatprep.mubr.msk.f32.mxu1 %vm5068_vm1, %v5067_v20 }
 0x6c4   :  { %4562 = vmatprep.subr.mxu1 %v5067_v20 }
 0x6c6   :  { %4555 = vmatmul.mubr.msk.f32.vlgmr.msra.gmra.mrb[12].mxu1 %vm229_vm2, %v222_v35  ;;  %v1082_v48 = vpop.permute.xlu1 %1081 }
 0x6c7   :  { %4563 = vmatpush3.xpose.msk.msra.mxu1 %vm229_vm2, %v1084_v47  ;;  %4564 = vmatprep.mubr.msk.f32.mxu1 %vm5068_vm1, %v5067_v20 }
 0x6c8   :  { %4572 = vmatprep.subr.mxu1 %v5067_v20 }
 0x6ca   :  { %4565 = vmatmul.mubr.msk.f32.vlgmr.msra.gmra.mrb[14].mxu1 %vm229_vm2, %v1082_v48  ;;  %v1250_v55 = vpop.permute.xlu1 %1249 }
 0x6cb   :  { %4573 = vmatpush3.xpose.msk.msra.mxu1 %vm229_vm2, %v1252_v51  ;;  %4574 = vmatprep.mubr.msk.f32.mxu1 %vm5068_vm1, %v5067_v20 }
 0x6cc   :  { %4582 = vmatprep.subr.mxu1 %v5067_v20 }
 0x6ce   :  { %4575 = vmatmul.mubr.msk.f32.vlgmr.msra.gmra.mrb[16].mxu1 %vm229_vm2, %v1250_v55  ;;  %v1417_v57 = vpop.permute.xlu1 %1416 }
 0x6cf   :  { %4583 = vmatpush3.xpose.msk.msra.mxu1 %vm229_vm2, %v1419_v56  ;;  %4584 = vmatprep.mubr.msk.f32.mxu1 %vm5068_vm1, %v5067_v20 }
 0x6d2   :  { %4585 = vmatmul.mubr.msk.f32.vlgmr.msra.gmra.mrb[18].mxu1 %vm229_vm2, %v1417_v57 }
 0x78d   :  { %v5380_v58 = vpop.f32.mrb[6].mxu1 }
 0x78e   :  { %v4531_v59 = vpop.f32.mrb[7].mxu1 }
 0x791   :  { %v637_v60 = vpop.f32.mrb[8].mxu1 }
 0x792   :  { %v641_v61 = vmul.f32 0.25, %v637_v60  ;;  %v4536_v62 = vpop.f32.mrb[9].mxu1 }
 0x794   :  { %v642_v63 = vadd.f32 %v641_v61, %v5296_v54 }
 0x795   :  { %v804_v0 = vpop.f32.mrb[10].mxu1 }
 0x796   :  { %v808_v1 = vmul.f32 0.25, %v804_v0  ;;  %v4546_v2 = vpop.f32.mrb[11].mxu1  ;;  %v643_v3 = vsel %vm310_vm3, %v642_v63, -inf }
 0x797   :  { %644 = vmax.xlane.f32.xlu0 %v643_v3 }
 0x798   :  { %v809_v5 = vadd.f32 %v808_v1, %v5296_v54 }
 0x799   :  { %v987_v6 = vpop.f32.mrb[12].mxu1 }
 0x79a   :  { %v991_v7 = vmul.f32 0.25, %v987_v6  ;;  %v4556_v8 = vpop.f32.mrb[13].mxu1  ;;  %v810_v9 = vsel %vm310_vm3, %v809_v5, -inf }
 0x79b   :  { %811 = vmax.xlane.f32.xlu1 %v810_v9 }
 0x79c   :  { %v996_v10 = vadd.f32 %v5386_v4, %v991_v7 }
 0x79d   :  { %v1155_v11 = vpop.f32.mrb[14].mxu1 }
 0x79e   :  { %v1159_v12 = vmul.f32 0.25, %v1155_v11  ;;  %v4566_v13 = vpop.f32.mrb[15].mxu1  ;;  %v997_v14 = vsel %vm310_vm3, %v996_v10, -inf }
 0x79f   :  { %998 = vmax.xlane.f32.xlu0 %v997_v14 }
 0x7a0   :  { %v1160_v15 = vadd.f32 %v1159_v12, %v5386_v4 }
 0x7a1   :  { %v1323_v53 = vpop.f32.mrb[16].mxu1 }
 0x7a2   :  { %v1327_v16 = vmul.f32 0.25, %v1323_v53  ;;  %v4576_v17 = vpop.f32.mrb[17].mxu1  ;;  %v1161_v18 = vsel %vm310_vm3, %v1160_v15, -inf }
 0x7a3   :  { %1162 = vmax.xlane.f32.xlu0 %v1161_v18 }
 0x7a4   :  { %v1328_v22 = vadd.f32 %v1327_v16, %v5386_v4 }
 0x7a5   :  { %v1490_v23 = vpop.f32.mrb[18].mxu1 }
 0x7a6   :  { %v1494_v24 = vmul.f32 0.25, %v1490_v23  ;;  %v4586_v25 = vpop.f32.mrb[19].mxu1  ;;  %v1329_v26 = vsel %vm310_vm3, %v1328_v22, -inf }
 0x7a7   :  { %1330 = vmax.xlane.f32.xlu1 %v1329_v26 }
 0x7a8   :  { %v1495_v27 = vadd.f32 %v1494_v24, %v5386_v4 }
 0x7aa   :  { %v1496_v28 = vsel %vm310_vm3, %v1495_v27, -inf }
 0x7ab   :  { %1497 = vmax.xlane.f32.xlu0 %v1496_v28  ;;  %v1599_v28 = vld [vmem:[%s6203_s6 + $0x8] sm:$0xff] }
 0x7b8   :  { %654 = vrot.lane.b32.xlu1 %v5281_v52, %s6224_s23 }
 0x824   :  { %v645_v29 = vpop.xlane.xlu0 %644 }
 0x825   :  { %v646_v30 = vsub.f32 %v642_v63, %v645_v29  ;;  %v1600_v29 = vld [vmem:[%s6203_s6 + $0x10] sm:$0xff] }
 0x827   :  { %v647_v31 = vmul.f32 1.442695, %v646_v30 }
 0x828   :  { %v812_v32 = vpop.xlane.xlu1 %811 }
 0x829   :  { %4955 = vpow2.f32 %v647_v31  ;;  %v813_v33 = vsub.f32 %v809_v5, %v812_v32  ;;  %v1601_v31 = vld [vmem:[%s6203_s6 + $0x18] sm:$0xff] }
 0x82a   :  { %v4768_v32 = vpack.c.bf16 %v1601_v31, %v1600_v29  ;;  %v1751_v31 = vld [vmem:[%s6207_s10 + $0x58] sm:$0xff] }
 0x82b   :  { %v814_v34 = vmul.f32 1.442695, %v813_v33 }
 0x82c   :  { %v999_v45 = vpop.xlane.xlu0 %998 }
 0x82d   :  { %4957 = vpow2.f32 %v814_v34  ;;  %v1000_v46 = vsub.f32 %v996_v10, %v999_v45 }
 0x82f   :  { %v1001_v51 = vmul.f32 1.442695, %v1000_v46 }
 0x830   :  { %v1163_v47 = vpop.xlane.xlu0 %1162 }
 0x831   :  { %v1164_v48 = vsub.f32 %v1160_v15, %v1163_v47  ;;  %4959 = vpow2.f32 %v1001_v51 }
 0x833   :  { %v4956_v35 = vpop.eup %4955  ;;  %v1165_v57 = vmul.f32 1.442695, %v1164_v48 }
 0x834   :  { %v1331_v37 = vpop.xlane.xlu1 %1330  ;;  %v649_v38 = vsel %vm310_vm3, %v4956_v35, 0.0 }
 0x835   :  { %650 = vadd.xlane.f32.xlu1 %v649_v38  ;;  %v1332_v55 = vsub.f32 %v1328_v22, %v1331_v37  ;;  %4961 = vpow2.f32 %v1165_v57  ;;  %v1602_v38 = vld [vmem:[%s6203_s6 + $0x20] sm:$0xff] }
 0x837   :  { %v4958_v39 = vpop.eup %4957  ;;  %v1333_v59 = vmul.f32 1.442695, %v1332_v55 }
 0x838   :  { %v655_v41 = vpop.permute.xlu1 %654  ;;  %v816_v42 = vsel %vm310_vm3, %v4958_v39, 0.0  ;;  %v1498_v56 = vpop.xlane.xlu0 %1497 }
 0x839   :  { %4538 = vmatpush3.msra.mxu0 %v655_v41  ;;  %817 = vadd.xlane.f32.xlu0 %v816_v42  ;;  %v1499_v60 = vsub.f32 %v1495_v27, %v1498_v56  ;;  %4963 = vpow2.f32 %v1333_v59  ;;  %v1598_v27 = vld [vmem:[%s6203_s6] sm:$0xff]  ;;  %v1604_v42 = vld [vmem:[%s6203_s6 + $0x30] sm:$0xff] }
 0x83a   :  { %4547 = vmatprep.subr.mxu0 %v5067_v20  ;;  %v4764_v30 = vpack.c.bf16 %v1599_v28, %v1598_v27  ;;  %v1744_v27 = vld [vmem:[%s6207_s10 + $0x20] sm:$0xff]  ;;  %v1746_v28 = vld [vmem:[%s6207_s10 + $0x30] sm:$0xff] }
 0x83b   :  { %v1500_v61 = vmul.f32 1.442695, %v1499_v60  ;;  %v4960_v50 = vpop.eup %4959  ;;  %v4786_v29 = vpack.c.bf16 %v1746_v28, %v1744_v27  ;;  %v1914_v27 = vld [vmem:[%s6209_s12 + $0xd8] sm:$0xff] }
 0x83c   :  { %v1003_v62 = vsel %vm310_vm3, %v4960_v50, 0.0  ;;  %4765 = vmatprep.subr.bf16.mxu1 %v4764_v30 }
 0x83d   :  { %4965 = vpow2.f32 %v1500_v61  ;;  %4767 = vmatpush3.bf16.msra.mxu1 %v4764_v30  ;;  %v1749_v30 = vld [vmem:[%s6207_s10 + $0x48] sm:$0xff] }
 0x83e   :  { %4769 = vmatprep.subr.bf16.mxu1 %v4768_v32 }
 0x83f   :  { %v4962_v36 = vpop.eup %4961 }
 0x840   :  { %v1167_v0 = vsel %vm310_vm3, %v4962_v36, 0.0 }
 0x841   :  { %4771 = vmatpush3.bf16.msra.mxu1 %v4768_v32  ;;  %v4788_v32 = vpack.c.bf16 %v1751_v31, %v1749_v30  ;;  %v1897_v30 = vld [vmem:[%s6209_s12 + $0x50] sm:$0xff]  ;;  %v1898_v31 = vld [vmem:[%s6209_s12 + $0x58] sm:$0xff] }
 0x843   :  { %v4964_v63 = vpop.eup %4963 }
 0x846   :  { %1173 = vrot.lane.b32.xlu1 %v224_v44, %s5071_s4 }
 0x847   :  { %v4966_v1 = vpop.eup %4965 }
 0x848   :  { %v1502_v2 = vsel %vm310_vm3, %v4966_v1, 0.0 }
 0x84f   :  { %821 = vrot.lane.b32.xlu0 %v5281_v52, %s6220_s1  ;;  %v1335_v52 = vsel %vm310_vm3, %v4964_v63, 0.0 }
 0x86a   :  { %1004 = vadd.xlane.f32.xlu1 %v1003_v62 }
 0x86e   :  { %1336 = vadd.xlane.f32.xlu1 %v1335_v52  ;;  %1168 = vadd.xlane.f32.xlu0 %v1167_v0 }
 0x872   :  { %1503 = vadd.xlane.f32.xlu0 %v1502_v2 }
 0x87f   :  { %1340 = vrot.lane.b32.xlu1 %v224_v44, %s6224_s23 }
 0x883   :  { %898 = vrot.lane.b32.xlu1 %v5380_v58, %s6226_s21 }
 0x888   :  { %1507 = vrot.lane.b32.xlu0 %v224_v44, %s6220_s1 }
 0x8c2   :  { %v651_v3 = vpop.xlane.xlu1 %650 }
 0x8c3   :  { %4967 = vrcp.f32 %v651_v3 }
 0x8c6   :  { %v818_v5 = vpop.xlane.xlu0 %817  ;;  %v1174_v58 = vpop.permute.xlu1 %1173 }
 0x8c7   :  { %4969 = vrcp.f32 %v818_v5 }
 0x8ca   :  { %v822_v8 = vpop.permute.xlu0 %821 }
 0x8cd   :  { %v4968_v6 = vpop.eup %4967 }
 0x8ce   :  { %v653_v7 = vmul.f32 %v4968_v6, %v4956_v35 }
 0x8d0   :  { %4540 = vmatmul.mubr.msk.f32.vlgmr.msra.gmra.mrb[4].mxu0 %vm310_vm3, %v653_v7 }
 0x8d1   :  { %v4970_v9 = vpop.eup %4969  ;;  %4548 = vmatpush3.msra.mxu0 %v822_v8  ;;  %4549 = vmatprep.mubr.msk.f32.mxu0 %vm5068_vm1, %v5067_v20 }
 0x8d2   :  { %v820_v10 = vmul.f32 %v4970_v9, %v4958_v39  ;;  %4557 = vmatprep.subr.mxu0 %v5067_v20  ;;  %v1603_v39 = vld [vmem:[%s6203_s6 + $0x28] sm:$0xff] }
 0x8d3   :  { %v4772_v41 = vpack.c.bf16 %v1603_v39, %v1602_v38  ;;  %v1755_v38 = vld [vmem:[%s6207_s10 + $0x78] sm:$0xff]  ;;  %v1752_v39 = vld [vmem:[%s6207_s10 + $0x60] sm:$0xff] }
 0x8d4   :  { %4550 = vmatmul.mubr.msk.f32.vlgmr.msra.gmra.mrb[6].mxu0 %vm310_vm3, %v820_v10 }
 0x8d5   :  { %4558 = vmatpush3.msra.mxu0 %v224_v44  ;;  %4559 = vmatprep.mubr.msk.f32.mxu0 %vm5068_vm1, %v5067_v20  ;;  %v1605_v44 = vld [vmem:[%s6203_s6 + $0x38] sm:$0xff] }
 0x8d6   :  { %4567 = vmatprep.subr.mxu0 %v5067_v20  ;;  %4773 = vmatprep.subr.bf16.mxu1 %v4772_v41  ;;  %v4776_v45 = vpack.c.bf16 %v1605_v44, %v1604_v42  ;;  %v1754_v42 = vld [vmem:[%s6207_s10 + $0x70] sm:$0xff] }
 0x8d7   :  { %4775 = vmatpush3.bf16.msra.mxu1 %v4772_v41  ;;  %v4794_v44 = vpack.c.bf16 %v1754_v42, %v1752_v39  ;;  %v1917_v39 = vld [vmem:[%s6209_s12 + $0xf0] sm:$0xff] }
 0x8d8   :  { %4777 = vmatprep.subr.bf16.mxu1 %v4776_v45 }
 0x8db   :  { %4779 = vmatpush3.bf16.msra.mxu1 %v4776_v45 }
 0x8f7   :  { %v1005_v11 = vpop.xlane.xlu1 %1004 }
 0x8f8   :  { %4971 = vrcp.f32 %v1005_v11 }
 0x8fb   :  { %v1169_v12 = vpop.xlane.xlu0 %1168  ;;  %v1337_v13 = vpop.xlane.xlu1 %1336 }
 0x8fc   :  { %4973 = vrcp.f32 %v1169_v12 }
 0x8fd   :  { %4975 = vrcp.f32 %v1337_v13 }
 0x8ff   :  { %v1504_v14 = vpop.xlane.xlu0 %1503  ;;  %v1341_v22 = vpop.permute.xlu1 %1340 }
 0x900   :  { %4977 = vrcp.f32 %v1504_v14 }
 0x902   :  { %v4972_v15 = vpop.eup %4971 }
 0x903   :  { %v1007_v53 = vmul.f32 %v4972_v15, %v4960_v50  ;;  %v1508_v25 = vpop.permute.xlu0 %1507  ;;  %v899_v60 = vpop.permute.xlu1 %898 }
 0x904   :  { %v909_v50 = vsel %vm229_vm2, %v5324_v21, %v899_v60  ;;  %v4204_v21 = vld [vmem:[%s6204_s7] ss:$0 sm:$0xff] }
 0x905   :  { %4560 = vmatmul.mubr.msk.f32.vlgmr.msra.gmra.mrb[8].mxu0 %vm310_vm3, %v1007_v53  ;;  %v5539_v60 = vld [vmem:[%s6205_s8] ss:$0 sm:$0xff] }
 0x906   :  { %4568 = vmatpush3.msra.mxu0 %v1174_v58  ;;  %4569 = vmatprep.mubr.msk.f32.mxu0 %vm5068_vm1, %v5067_v20  ;;  %v4974_v16 = vpop.eup %4973 }
 0x907   :  { %4577 = vmatprep.subr.mxu0 %v5067_v20  ;;  %v1171_v17 = vmul.f32 %v4974_v16, %v4962_v36  ;;  %v4976_v18 = vpop.eup %4975 }
 0x908   :  { %v1339_v23 = vmul.f32 %v4976_v18, %v4964_v63 }
 0x909   :  { %4570 = vmatmul.mubr.msk.f32.vlgmr.msra.gmra.mrb[10].mxu0 %vm310_vm3, %v1171_v17  ;;  %v1741_v17 = vld [vmem:[%s6207_s10 + $0x8] sm:$0xff] }
 0x90a   :  { %4578 = vmatpush3.msra.mxu0 %v1341_v22  ;;  %4579 = vmatprep.mubr.msk.f32.mxu0 %vm5068_vm1, %v5067_v20  ;;  %v4978_v24 = vpop.eup %4977  ;;  %v1740_v22 = vld [vmem:[%s6207_s10] sm:$0xff] }
 0x90b   :  { %4587 = vmatprep.subr.mxu0 %v5067_v20  ;;  %v1506_v26 = vmul.f32 %v4978_v24, %v4966_v1  ;;  %v1745_v24 = vld [vmem:[%s6207_s10 + $0x28] sm:$0xff] }
 0x90d   :  { %4580 = vmatmul.mubr.msk.f32.vlgmr.msra.gmra.mrb[12].mxu0 %vm310_vm3, %v1339_v23 }
 0x90e   :  { %4588 = vmatpush3.msra.mxu0 %v1508_v25  ;;  %4589 = vmatprep.mubr.msk.f32.mxu0 %vm5068_vm1, %v5067_v20  ;;  %v1747_v25 = vld [vmem:[%s6207_s10 + $0x38] sm:$0xff] }
 0x911   :  { %4590 = vmatmul.mubr.msk.f32.vlgmr.msra.gmra.mrb[14].mxu0 %vm310_vm3, %v1506_v26  ;;  %v4784_v26 = vpack.c.bf16 %v1747_v25, %v1745_v24  ;;  %v1896_v24 = vld [vmem:[%s6209_s12 + $0x48] sm:$0xff] }
 0x912   :  { %1838 = vmatprep.mubr.f32.mxu0 %v5067_v20 }
 0x9a3   :  { %v726_v33 = vpop.f32.mrb[4].mxu0 }
 0x9a4   :  { %v4541_v34 = vpop.f32.mrb[5].mxu0  ;;  %902 = vrot.lane.b32.xlu0 %v726_v33, %s5072_s0  ;;  %v1748_v33 = vld [vmem:[%s6207_s10 + $0x40] sm:$0xff] }
 0x9a5   :  { %v1750_v34 = vld [vmem:[%s6207_s10 + $0x50] sm:$0xff] }
 0x9a7   :  { %v893_v35 = vpop.f32.mrb[6].mxu0 }
 0x9a8   :  { %906 = vrot.lane.b32.xlu0 %v893_v35, %s6222_s2  ;;  %v4551_v37 = vpop.f32.mrb[7].mxu0  ;;  %v4790_v35 = vpack.c.bf16 %v1750_v34, %v1748_v33  ;;  %v1916_v33 = vld [vmem:[%s6209_s12 + $0xe8] sm:$0xff]  ;;  %v4818_v34 = vpack.c.bf16 %v1898_v31, %v1897_v30 }
 0x9a9   :  { %v1753_v37 = vld [vmem:[%s6207_s10 + $0x68] sm:$0xff] }
 0x9aa   :  { %v4792_v41 = vpack.c.bf16 %v1755_v38, %v1753_v37  ;;  %v1899_v37 = vld [vmem:[%s6209_s12 + $0x60] sm:$0xff]  ;;  %v1900_v38 = vld [vmem:[%s6209_s12 + $0x68] sm:$0xff] }
 0x9ab   :  { %v4822_v42 = vpack.c.bf16 %v1900_v38, %v1899_v37 }
 0x9d8   :  { %v1077_v46 = vpop.f32.mrb[8].mxu0 }
 0x9d9   :  { %v4561_v47 = vpop.f32.mrb[9].mxu0 }
 0x9dc   :  { %v1245_v48 = vpop.f32.mrb[10].mxu0 }
 0x9dd   :  { %1584 = vrot.lane.b32.xlu1 %v1245_v48, %s6226_s21  ;;  %v4571_v51 = vpop.f32.mrb[11].mxu0 }
 0x9e0   :  { %v1412_v55 = vpop.f32.mrb[12].mxu0 }
 0x9e1   :  { %1588 = vrot.lane.b32.xlu1 %v1412_v55, %s5072_s0  ;;  %v4581_v56 = vpop.f32.mrb[13].mxu0 }
 0x9e4   :  { %v1579_v57 = vpop.f32.mrb[14].mxu0 }
 0x9e5   :  { %1592 = vrot.lane.b32.xlu0 %v1579_v57, %s6222_s2  ;;  %v4591_v59 = vpop.f32.mrb[15].mxu0 }
 0xa16   :  { %v903_v61 = vpop.permute.xlu0 %902 }
 0xa17   :  { %v911_v36 = vsel %vm910_vm4, %v909_v50, %v903_v61  ;;  %v5544_v50 = vld [vmem:[%s6206_s9] ss:$0 sm:$0xff] }
 0xa1a   :  { %v907_v62 = vpop.permute.xlu0 %906 }
 0xa1b   :  { %v913_v63 = vsel %vm912_vm5, %v911_v36, %v907_v62 }
 0xa1c   :  { %4608 = vmatprep.mubr.msk.f32.mxu1 %vm70_vm0, %v913_v63  ;;  %v1903_v63 = vld [vmem:[%s6209_s12 + $0x80] sm:$0xff] }
 0xa4f   :  { %v1585_v52 = vpop.permute.xlu1 %1584 }
 0xa50   :  { %v1595_v1 = vsel %vm229_vm2, %v1077_v46, %v1585_v52  ;;  %v1904_v52 = vld [vmem:[%s6209_s12 + $0x88] sm:$0xff] }
 0xa53   :  { %v1589_v0 = vpop.permute.xlu1 %1588 }
 0xa54   :  { %v1596_v2 = vsel %vm910_vm4, %v1595_v1, %v1589_v0  ;;  %v1887_v0 = vld [vmem:[%s6209_s12] sm:$0xff]  ;;  %v4796_v1 = vpack.c.bf16 %v1904_v52, %v1903_v63 }
 0xa55   :  { %v1756_v63 = vld [vmem:[%s6208_s11] sm:$0x3] }
 0xa56   :  { %4797 = vmatprep.subr.bf16.mxu1 %v4796_v1  ;;  %v1761_v52 = vrot.slane %v1756_v63, %v5258_v43 }
 0xa57   :  { %v1593_v3 = vpop.permute.xlu0 %1592 }
 0xa58   :  { %v1597_v5 = vsel %vm912_vm5, %v1596_v2, %v1593_v3  ;;  %v1888_v2 = vld [vmem:[%s6209_s12 + $0x8] sm:$0xff] }
 0xa59   :  { %4609 = vmatmul.mubr.msk.f32.vlgmr.msra.gmra.mrb[20].mxu1 %vm70_vm0, %v1597_v5  ;;  %v4798_v3 = vpack.c.bf16 %v1888_v2, %v1887_v0  ;;  %v1905_v5 = vld [vmem:[%s6209_s12 + $0x90] sm:$0xff]  ;;  %v1765_v0 = vrot.slane %v1756_v63, %v5273_v49 }
 0xa5b   :  { %4799 = vmatpush3.bf16.msra.mxu1 %v4798_v3 }
 0xb2c   :  { %v4610_v6 = vpop.f32.mrb[20].mxu1 }
 0xb2d   :  { %v1691_v7 = vadd.f32 %v4610_v6, %v4204_v21  ;;  %v1685_v8 = vpop.f32.mrb[21].mxu1 }
 0xb2e   :  { %v1686_v9 = vadd.f32 %v4204_v21, %v1685_v8  ;;  %v1906_v21 = vld [vmem:[%s6209_s12 + $0x98] sm:$0xff] }
 0xb2f   :  { %v1695_v53 = vadd.f32 %v1691_v7, %v5320_v19  ;;  %v1742_v19 = vld [vmem:[%s6207_s10 + $0x10] sm:$0xff]  ;;  %v4800_v6 = vpack.c.bf16 %v1906_v21, %v1905_v5  ;;  %v1890_v8 = vld [vmem:[%s6209_s12 + $0x18] sm:$0xff] }
 0xb30   :  { %v1694_v10 = vadd.f32 %v1686_v9, %v5251_v40  ;;  %v1743_v40 = vld [vmem:[%s6207_s10 + $0x18] sm:$0xff]  ;;  %v4782_v23 = vpack.c.bf16 %v1742_v19, %v1740_v22  ;;  %v1889_v7 = vld [vmem:[%s6209_s12 + $0x10] sm:$0xff]  ;;  %v1912_v19 = vld [vmem:[%s6209_s12 + $0xc8] sm:$0xff] }
 0xb31   :  { %v1701_v16 = vsel %vm70_vm0, %v1695_v53, 0.0  ;;  %v4780_v18 = vpack.c.bf16 %v1743_v40, %v1741_v17  ;;  %v4802_v9 = vpack.c.bf16 %v1890_v8, %v1889_v7  ;;  %4801 = vmatprep.subr.bf16.mxu1 %v4800_v6  ;;  %v1893_v17 = vld [vmem:[%s6209_s12 + $0x30] sm:$0xff]  ;;  %v1894_v40 = vld [vmem:[%s6209_s12 + $0x38] sm:$0xff] }
 0xb32   :  { %v1698_v58 = vsel %vm70_vm0, %v1694_v10, 0.0  ;;  %v4810_v22 = vpack.c.bf16 %v1894_v40, %v1893_v17 }
 0xb33   :  { %1699 = vadd.xlane.f32.xlu1 %v1698_v58  ;;  %4781 = vmatprep.subr.bf16.mxu0 %v4780_v18  ;;  %v1908_v58 = vld [vmem:[%s6209_s12 + $0xa8] sm:$0xff]  ;;  %v1911_v18 = vld [vmem:[%s6209_s12 + $0xc0] sm:$0xff] }
 0xb34   :  { %4783 = vmatpush1.bf16.msra.mxu0 %v4782_v23  ;;  %4803 = vmatpush3.bf16.msra.mxu1 %v4802_v9  ;;  %v1895_v23 = vld [vmem:[%s6209_s12 + $0x40] sm:$0xff]  ;;  %v4812_v25 = vpack.c.bf16 %v1912_v19, %v1911_v18 }
 0xb35   :  { %4785 = vmatprep.subr.bf16.mxu0 %v4784_v26  ;;  %v1913_v26 = vld [vmem:[%s6209_s12 + $0xd0] sm:$0xff]  ;;  %v4814_v28 = vpack.c.bf16 %v1896_v24, %v1895_v23 }
 0xb38   :  { %4787 = vmatpush1.bf16.msra.mxu0 %v4786_v29  ;;  %v4816_v29 = vpack.c.bf16 %v1914_v27, %v1913_v26 }
 0xb39   :  { %4789 = vmatprep.subr.bf16.mxu0 %v4788_v32  ;;  %v1915_v32 = vld [vmem:[%s6209_s12 + $0xe0] sm:$0xff] }
 0xb3c   :  { %4791 = vmatpush1.bf16.msra.mxu0 %v4790_v35  ;;  %v4820_v35 = vpack.c.bf16 %v1916_v33, %v1915_v32 }
 0xb3d   :  { %4793 = vmatprep.subr.bf16.mxu0 %v4792_v41  ;;  %v1918_v41 = vld [vmem:[%s6209_s12 + $0xf8] sm:$0xff] }
 0xb40   :  { %4795 = vmatpush1.bf16.msra.mxu0 %v4794_v44  ;;  %v4824_v44 = vpack.c.bf16 %v1918_v41, %v1917_v39 }
 0xbc0   :  { %v1700_v11 = vpop.xlane.xlu1 %1699 }
 0xbc1   :  { %v1704_v12 = vmul.f32 0.015625, %v1700_v11 }
 0xbc3   :  { %v1706_v13 = vsub.f32 %v1694_v10, %v1704_v12  ;;  %v1907_v10 = vld [vmem:[%s6209_s12 + $0xa0] sm:$0xff] }
 0xbc4   :  { %v4804_v11 = vpack.c.bf16 %v1908_v58, %v1907_v10  ;;  %v1891_v12 = vld [vmem:[%s6209_s12 + $0x20] sm:$0xff] }
 0xbc5   :  { %v1708_v14 = vmul.f32 %v1706_v13, %v1706_v13 }
 0xbc6   :  { %4805 = vmatprep.subr.bf16.mxu1 %v4804_v11 }
 0xbc7   :  { %v1710_v15 = vsel %vm70_vm0, %v1708_v14, 0.0 }
 0xbc8   :  { %1711 = vadd.xlane.f32.xlu0 %v1710_v15  ;;  %v1909_v15 = vld [vmem:[%s6209_s12 + $0xb0] sm:$0xff] }
 0xbcc   :  { %1702 = vadd.xlane.f32.xlu0 %v1701_v16 }
 0xc55   :  { %v1712_v45 = vpop.xlane.xlu0 %1711 }
 0xc56   :  { %v1716_v46 = vmul.f32 0.015625, %v1712_v45  ;;  %v1901_v45 = vld [vmem:[%s6209_s12 + $0x70] sm:$0xff] }
 0xc58   :  { %v1718_v47 = vadd.f32 1e-05, %v1716_v46  ;;  %v1902_v46 = vld [vmem:[%s6209_s12 + $0x78] sm:$0xff] }
 0xc59   :  { %v1703_v48 = vpop.xlane.xlu0 %1702 }
 0xc5a   :  { %4979 = vrsqrt.f32 %v1718_v47  ;;  %v1705_v51 = vmul.f32 0.015625, %v1703_v48  ;;  %v4826_v47 = vpack.c.bf16 %v1902_v46, %v1901_v45  ;;  %v4211_v45 = vld [vmem:[%s6210_s13] ss:$0 sm:$0xff] }
 0xc5c   :  { %v5531_v55 = vsub.f32 %v1695_v53, %v1705_v51  ;;  %v1910_v53 = vld [vmem:[%s6209_s12 + $0xb8] sm:$0xff] }
 0xc5d   :  { %v4808_v16 = vpack.c.bf16 %v1910_v53, %v1909_v15 }
 0xc5e   :  { %v1709_v56 = vmul.f32 %v5531_v55, %v5531_v55 }
 0xc60   :  { %v1713_v57 = vsel %vm70_vm0, %v1709_v56, 0.0 }
 0xc61   :  { %1714 = vadd.xlane.f32.xlu1 %v1713_v57 }
 0xc64   :  { %v4980_v59 = vpop.eup %4979 }
 0xc65   :  { %v1722_v61 = vmul.f32 %v4980_v59, %v1706_v13  ;;  %v1892_v13 = vld [vmem:[%s6209_s12 + $0x28] sm:$0xff] }
 0xc66   :  { %v4806_v14 = vpack.c.bf16 %v1892_v13, %v1891_v12 }
 0xc67   :  { %v1730_v36 = vmul.f32 %v5539_v60, %v1722_v61 }
 0xc68   :  { %4807 = vmatpush3.bf16.msra.mxu1 %v4806_v14 }
 0xc69   :  { %v5548_v62 = vadd.f32 %v5544_v50, %v1730_v36  ;;  %4809 = vmatprep.subr.bf16.mxu1 %v4808_v16 }
 0xc6b   :  { %4209 = vmatmul.mubr.msk.f32.vlgmr.msra.gmra.mrb[16].mxu0 %vm70_vm0, %v5548_v62 }
 0xc6c   :  { %1844 = vmatprep.mubr.f32.mxu0 %v5067_v20  ;;  %4811 = vmatpush3.bf16.msra.mxu1 %v4810_v22 }
 0xc6d   :  { %4813 = vmatprep.subr.bf16.mxu1 %v4812_v25 }
 0xc70   :  { %4815 = vmatpush3.bf16.msra.mxu1 %v4814_v28 }
 0xc71   :  { %4817 = vmatprep.subr.bf16.mxu1 %v4816_v29 }
 0xc74   :  { %4819 = vmatpush3.bf16.msra.mxu1 %v4818_v34 }
 0xc75   :  { %4821 = vmatprep.subr.bf16.mxu1 %v4820_v35 }
 0xc78   :  { %4823 = vmatpush3.bf16.msra.mxu1 %v4822_v42 }
 0xc79   :  { %4825 = vmatprep.subr.bf16.mxu1 %v4824_v44 }
 0xc7c   :  { %4827 = vmatpush3.bf16.msra.mxu1 %v4826_v47 }
 0xc7d   :  { %4631 = vmatprep.subr.mxu1 %v5067_v20 }
 0xcee   :  { %v1715_v48 = vpop.xlane.xlu1 %1714 }
 0xcef   :  { %v1717_v51 = vmul.f32 0.015625, %v1715_v48 }
 0xcf1   :  { %v1719_v56 = vadd.f32 1e-05, %v1717_v51 }
 0xcf3   :  { %4981 = vrsqrt.f32 %v1719_v56 }
 0xcfd   :  { %v4982_v57 = vpop.eup %4981 }
 0xcfe   :  { %v1723_v59 = vmul.f32 %v4982_v57, %v5531_v55 }
 0xd00   :  { %v1731_v61 = vmul.f32 %v5539_v60, %v1723_v59 }
 0xd02   :  { %v5653_v36 = vadd.f32 %v5544_v50, %v1731_v61 }
 0xd04   :  { %4210 = vmatmul.mubr.msk.f32.gmra.mrb[18].mxu0 %vm70_vm0, %v5653_v36 }
 0xd05   :  { %2147 = vmatprep.mubr.f32.mxu0 %v5067_v20 }
 0xd3e   :  { %v1840_v1 = vpop.f32.mrb[16].mxu0 }
 0xd3f   :  { %v1841_v55 = vadd.f32 %v1840_v1, %v1761_v52  ;;  %v1842_v2 = vpop.f32.mrb[17].mxu0 }
 0xd40   :  { %v1843_v60 = vadd.f32 %v1842_v2, %v1765_v0 }
 0xd41   :  { %v1855_v3 = vmul.f32 0.044715, %v1841_v55  ;;  %v1851_v53 = vmul.f32 0.5, %v1841_v55 }
 0xd42   :  { %v1856_v50 = vmul.f32 0.044715, %v1843_v60  ;;  %v1852_v14 = vmul.f32 0.5, %v1843_v60 }
 0xd43   :  { %v1859_v5 = vmul.f32 %v1855_v3, %v1841_v55 }
 0xd44   :  { %v1860_v21 = vmul.f32 %v1856_v50, %v1843_v60  ;;  %v4217_v50 = vld [vmem:[%s6234_s25 + $0x98] sm:$0xff] }
 0xd45   :  { %v1863_v6 = vmul.f32 %v1859_v5, %v1841_v55 }
 0xd46   :  { %v1864_v7 = vmul.f32 %v1860_v21, %v1843_v60  ;;  %v4214_v21 = vld [vmem:[%s6234_s25 + $0x80] sm:$0xff] }
 0xd47   :  { %v1867_v8 = vadd.f32 %v1863_v6, %v1841_v55 }
 0xd48   :  { %v1868_v9 = vadd.f32 %v1864_v7, %v1843_v60  ;;  %v4219_v7 = vld [vmem:[%s6234_s25 + $0xa8] sm:$0xff] }
 0xd49   :  { %v1871_v10 = vmul.f32 0.7978846, %v1867_v8  ;;  %v4221_v8 = vld [vmem:[%s6234_s25 + $0xb8] sm:$0xff] }
 0xd4a   :  { %v1872_v58 = vmul.f32 0.7978846, %v1868_v9  ;;  %v4832_v9 = vpack.c.bf16 %v4221_v8, %v4219_v7 }
 0xd4b   :  { %4983 = vtanh.f32 %v1871_v10  ;;  %v4218_v10 = vld [vmem:[%s6234_s25 + $0xa0] sm:$0xff] }
 0xd4c   :  { %4985 = vtanh.f32 %v1872_v58  ;;  %v4220_v58 = vld [vmem:[%s6234_s25 + $0xb0] sm:$0xff] }
 0xd55   :  { %v4984_v11 = vpop.eup %4983 }
 0xd56   :  { %v4986_v12 = vpop.eup %4985  ;;  %v1879_v13 = vadd.f32 1.0, %v4984_v11  ;;  %v4834_v11 = vpack.c.bf16 %v4220_v58, %v4218_v10 }
 0xd57   :  { %v1880_v15 = vadd.f32 1.0, %v4986_v12  ;;  %v4223_v12 = vld [vmem:[%s6234_s25 + $0xc8] sm:$0xff] }
 0xd58   :  { %v1883_v17 = vmul.f32 %v1879_v13, %v1851_v53  ;;  %v4225_v13 = vld [vmem:[%s6234_s25 + $0xd8] sm:$0xff]  ;;  %v4224_v53 = vld [vmem:[%s6234_s25 + $0xd0] sm:$0xff] }
 0xd59   :  { %v1884_v16 = vmul.f32 %v1880_v15, %v1852_v14  ;;  %v4836_v14 = vpack.c.bf16 %v4225_v13, %v4223_v12  ;;  %v4222_v15 = vld [vmem:[%s6234_s25 + $0xc0] sm:$0xff] }
 0xd5b   :  { %1990 = vmatprep.mubr.f32.mxu1 %v1884_v16  ;;  %v4838_v16 = vpack.c.bf16 %v4224_v53, %v4222_v15 }
 0xd5c   :  { %1991 = vmatmul.mubr.f32.vlgmr.msra.gmra.mrb[22].mxu1 %v1883_v17  ;;  %v4227_v17 = vld [vmem:[%s6234_s25 + $0xe8] sm:$0xff] }
 0xdd7   :  { %v1846_v40 = vpop.f32.mrb[18].mxu0 }
 0xdd8   :  { %v1847_v18 = vadd.f32 %v1846_v40, %v1761_v52  ;;  %v1848_v22 = vpop.f32.mrb[19].mxu0  ;;  %v4229_v40 = vld [vmem:[%s6234_s25 + $0xf8] sm:$0xff] }
 0xdd9   :  { %v1849_v19 = vadd.f32 %v1848_v22, %v1765_v0  ;;  %v4226_v22 = vld [vmem:[%s6234_s25 + $0xe0] sm:$0xff] }
 0xdda   :  { %v1857_v23 = vmul.f32 0.044715, %v1847_v18  ;;  %v1853_v39 = vmul.f32 0.5, %v1847_v18 }
 0xddb   :  { %v1858_v24 = vmul.f32 0.044715, %v1849_v19  ;;  %v1854_v37 = vmul.f32 0.5, %v1849_v19 }
 0xddc   :  { %v1861_v25 = vmul.f32 %v1857_v23, %v1847_v18 }
 0xddd   :  { %v1862_v26 = vmul.f32 %v1858_v24, %v1849_v19 }
 0xdde   :  { %v1865_v27 = vmul.f32 %v1861_v25, %v1847_v18 }
 0xddf   :  { %v1866_v28 = vmul.f32 %v1862_v26, %v1849_v19 }
 0xde0   :  { %v1869_v29 = vadd.f32 %v1865_v27, %v1847_v18  ;;  %v4840_v18 = vpack.c.bf16 %v4229_v40, %v4227_v17 }
 0xde1   :  { %v1870_v30 = vadd.f32 %v1866_v28, %v1849_v19  ;;  %v4228_v19 = vld [vmem:[%s6234_s25 + $0xf0] sm:$0xff] }
 0xde2   :  { %v1873_v31 = vmul.f32 0.7978846, %v1869_v29  ;;  %v4842_v23 = vpack.c.bf16 %v4228_v19, %v4226_v22 }
 0xde3   :  { %v1874_v32 = vmul.f32 0.7978846, %v1870_v30 }
 0xde4   :  { %4987 = vtanh.f32 %v1873_v31 }
 0xde5   :  { %4989 = vtanh.f32 %v1874_v32 }
 0xdee   :  { %v4988_v33 = vpop.eup %4987 }
 0xdef   :  { %v4990_v34 = vpop.eup %4989  ;;  %v1881_v35 = vadd.f32 1.0, %v4988_v33  ;;  %v4212_v33 = vld [vmem:[%s6211_s14] ss:$0 sm:$0xff] }
 0xdf0   :  { %v1882_v38 = vadd.f32 1.0, %v4990_v34 }
 0xdf1   :  { %v1885_v42 = vmul.f32 %v1881_v35, %v1853_v39  ;;  %v4213_v35 = vld [vmem:[%s6212_s15] ss:$0 sm:$0xff] }
 0xdf2   :  { %v1886_v41 = vmul.f32 %v1882_v38, %v1854_v37 }
 0xdf4   :  { %1995 = vmatprep.mubr.f32.mxu1 %v1886_v41 }
 0xdf5   :  { %1996 = vmatmul.mubr.f32.gmra.mrb[24].mxu1 %v1885_v42 }
 0xdf6   :  { %4633 = vmatprep.mubr.msk.f32.mxu1 %vm5068_vm1, %v5067_v20 }
 0xe2f   :  { %v4408_v44 = vpop.f32.mrb[22].mxu1 }
 0xe30   :  { %v4409_v46 = vpop.f32.mrb[23].mxu1 }
 0xe31   :  { %v4410_v47 = vadd.f32 %v4409_v46, %v4408_v44 }
 0xe33   :  { %v1993_v48 = vadd.f32 %v4410_v47, %v4211_v45 }
 0xe35   :  { %v2001_v51 = vadd.f32 %v1993_v48, %v5548_v62  ;;  %v4215_v62 = vld [vmem:[%s6234_s25 + $0x88] sm:$0xff]  ;;  %v4230_v48 = vld [vmem:[%s6202_s5 + $0x2] sm:$0x3]  ;;  %s6239_s5 = smov 96  }
 0xe36   :  { %v4828_v5 = vpack.c.bf16 %v4217_v50, %v4215_v62 }
 0xe37   :  { %v2005_v56 = vsel %vm70_vm0, %v2001_v51, 0.0 }
 0xe38   :  { %2006 = vadd.xlane.f32.xlu0 %v2005_v56  ;;  %4829 = vmatprep.subr.bf16.mxu0 %v4828_v5 }
 0xec5   :  { %v2007_v57 = vpop.xlane.xlu0 %2006 }
 0xec6   :  { %v2011_v59 = vmul.f32 0.015625, %v2007_v57 }
 0xec8   :  { %v2013_v61 = vsub.f32 %v2001_v51, %v2011_v59  ;;  %v4411_v63 = vpop.f32.mrb[24].mxu1  ;;  %v2070_v51 = vrot.slane %v4230_v48, %v5258_v43 }
 0xec9   :  { %v4412_v52 = vpop.f32.mrb[25].mxu1 }
 0xeca   :  { %v4413_v0 = vadd.f32 %v4412_v52, %v4411_v63  ;;  %v2015_v1 = vmul.f32 %v2013_v61, %v2013_v61 }
 0xecc   :  { %v1998_v55 = vadd.f32 %v4413_v0, %v4211_v45  ;;  %v2017_v2 = vsel %vm70_vm0, %v2015_v1, 0.0 }
 0xecd   :  { %2018 = vadd.xlane.f32.xlu1 %v2017_v2 }
 0xece   :  { %v2002_v60 = vadd.f32 %v1998_v55, %v5653_v36  ;;  %v4216_v36 = vld [vmem:[%s6234_s25 + $0x90] sm:$0xff] }
 0xecf   :  { %v4830_v6 = vpack.c.bf16 %v4216_v36, %v4214_v21 }
 0xed0   :  { %v2008_v3 = vsel %vm70_vm0, %v2002_v60, 0.0 }
 0xed1   :  { %2009 = vadd.xlane.f32.xlu0 %v2008_v3  ;;  %4831 = vmatpush1.bf16.msra.mxu0 %v4830_v6 }
 0xed2   :  { %4833 = vmatprep.subr.bf16.mxu0 %v4832_v9 }
 0xed5   :  { %4835 = vmatpush1.bf16.msra.mxu0 %v4834_v11 }
 0xed6   :  { %4837 = vmatprep.subr.bf16.mxu0 %v4836_v14 }
 0xed9   :  { %4839 = vmatpush1.bf16.msra.mxu0 %v4838_v16 }
 0xeda   :  { %4841 = vmatprep.subr.bf16.mxu0 %v4840_v18 }
 0xedd   :  { %4843 = vmatpush1.bf16.msra.mxu0 %v4842_v23 }
 0xede   :  { %4611 = vmatprep.subr.mxu0 %v5067_v20 }
 0xf5a   :  { %v2019_v24 = vpop.xlane.xlu1 %2018 }
 0xf5b   :  { %v2023_v25 = vmul.f32 0.015625, %v2019_v24 }
 0xf5d   :  { %v2025_v26 = vadd.f32 1e-05, %v2023_v25 }
 0xf5e   :  { %v2010_v27 = vpop.xlane.xlu0 %2009 }
 0xf5f   :  { %4991 = vrsqrt.f32 %v2025_v26  ;;  %v2012_v28 = vmul.f32 0.015625, %v2010_v27 }
 0xf61   :  { %v2014_v29 = vsub.f32 %v2002_v60, %v2012_v28 }
 0xf63   :  { %v2016_v30 = vmul.f32 %v2014_v29, %v2014_v29 }
 0xf65   :  { %v2020_v31 = vsel %vm70_vm0, %v2016_v30, 0.0 }
 0xf66   :  { %2021 = vadd.xlane.f32.xlu1 %v2020_v31 }
 0xf69   :  { %v4992_v32 = vpop.eup %4991 }
 0xf6a   :  { %v2029_v34 = vmul.f32 %v4992_v32, %v2013_v61  ;;  %v5749_v61 = vrot.slane %v4230_v48, %v5273_v49 }
 0xf6c   :  { %v2037_v37 = vmul.f32 %v4212_v33, %v2029_v34 }
 0xf6e   :  { %v5729_v38 = vadd.f32 %v4213_v35, %v2037_v37 }
 0xf70   :  { %4231 = vmatmul.mubr.msk.f32.vlgmr.msra.gmra.mrb[20].mxu0 %vm70_vm0, %v5729_v38 }
 0xf71   :  { %2153 = vmatprep.mubr.f32.mxu0 %v5067_v20 }
 0xff3   :  { %v2022_v39 = vpop.xlane.xlu1 %2021 }
 0xff4   :  { %v2024_v41 = vmul.f32 0.015625, %v2022_v39 }
 0xff6   :  { %v2026_v42 = vadd.f32 1e-05, %v2024_v41 }
 0xff8   :  { %4993 = vrsqrt.f32 %v2026_v42 }
0x1002   :  { %v4994_v44 = vpop.eup %4993 }
0x1003   :  { %v2030_v45 = vmul.f32 %v4994_v44, %v2014_v29 }
0x1005   :  { %v2038_v46 = vmul.f32 %v4212_v33, %v2030_v45 }
0x1007   :  { %v5734_v47 = vadd.f32 %v4213_v35, %v2038_v46 }
0x1009   :  { %4232 = vmatmul.mubr.msk.f32.gmra.mrb[22].mxu0 %vm70_vm0, %v5734_v47 }
0x100a   :  { %4613 = vmatprep.mubr.msk.f32.mxu0 %vm5068_vm1, %v5067_v20 }
0x1043   :  { %v2149_v56 = vpop.f32.mrb[20].mxu0 }
0x1044   :  { %v2150_v57 = vadd.f32 %v2149_v56, %v2070_v51  ;;  %v2151_v59 = vpop.f32.mrb[21].mxu0 }
0x1045   :  { %v5754_v52 = vadd.f32 %v2151_v59, %v5749_v61 }
0x1046   :  { %2161 = vrot.lane.b32.xlu0 %v2150_v57, %s5070_s3 }
0x104a   :  { %2323 = vrot.lane.b32.xlu0 %v2150_v57, %s5071_s4 }
0x104e   :  { %2493 = vrot.lane.b32.xlu0 %v2150_v57, %s5072_s0 }
0x1052   :  { %2660 = vrot.lane.b32.xlu0 %v2150_v57, %s6238_s29 }
0x10b8   :  { %v2162_v63 = vpop.permute.xlu0 %2161 }
0x10b9   :  { %4612 = vmatpush3.xpose.msk.msra.mxu0 %vm229_vm2, %v2162_v63 }
0x10ba   :  { %4616 = vmatprep.subr.mxu0 %v5067_v20 }
0x10bc   :  { %4614 = vmatmul.mubr.msk.f32.vlgmr.msra.gmra.mrb[24].mxu0 %vm229_vm2, %v2150_v57  ;;  %v5757_v0 = vpop.permute.xlu0 %2323 }
0x10bd   :  { %4617 = vmatpush3.msra.mxu0 %v5754_v52  ;;  %4618 = vmatprep.mubr.msk.f32.mxu0 %vm5068_vm1, %v5067_v20 }
0x10be   :  { %4621 = vmatprep.subr.mxu0 %v5067_v20 }
0x10c0   :  { %v2494_v1 = vpop.permute.xlu0 %2493 }
0x10c1   :  { %4632 = vmatpush3.xpose.msk.msra.mxu1 %vm229_vm2, %v2494_v1 }
0x10c2   :  { %4641 = vmatprep.subr.mxu1 %v5067_v20 }
0x10c4   :  { %v2661_v11 = vpop.permute.xlu0 %2660 }
0x10dc   :  { %v2155_v55 = vpop.f32.mrb[22].mxu0 }
0x10dd   :  { %v2156_v2 = vadd.f32 %v2155_v55, %v2070_v51  ;;  %v5765_v60 = vpop.f32.mrb[23].mxu0 }
0x10df   :  { %2841 = vrot.lane.b32.xlu0 %v2156_v2, %s5070_s3 }
0x10e3   :  { %3003 = vrot.lane.b32.xlu0 %v2156_v2, %s5071_s4 }
0x10e7   :  { %3171 = vrot.lane.b32.xlu0 %v2156_v2, %s6239_s5 }
0x10eb   :  { %3338 = vrot.lane.b32.xlu0 %v2156_v2, %s6240_s30 }
0x1151   :  { %v2842_v13 = vpop.permute.xlu0 %2841 }
0x1155   :  { %v3004_v53 = vpop.permute.xlu0 %3003 }
0x1159   :  { %v3172_v18 = vpop.permute.xlu0 %3171 }
0x115d   :  { %v3339_v19 = vpop.permute.xlu0 %3338 }
0x118f   :  { %v2233_v3 = vpop.f32.mrb[24].mxu0 }
0x1190   :  { %v2237_v62 = vmul.f32 0.25, %v2233_v3  ;;  %v4615_v50 = vpop.f32.mrb[25].mxu0 }
0x1192   :  { %v2238_v5 = vadd.f32 %v2237_v62, %v5296_v54 }
0x1194   :  { %v2239_v21 = vsel %vm310_vm3, %v2238_v5, -inf }
0x1195   :  { %2240 = vmax.xlane.f32.xlu1 %v2239_v21 }
0x11a6   :  { %2325 = vrot.lane.b32.xlu1 %v2150_v57, %s6241_s22 }
0x1222   :  { %v2241_v36 = vpop.xlane.xlu1 %2240 }
0x1223   :  { %v2242_v6 = vsub.f32 %v2238_v5, %v2241_v36 }
0x1225   :  { %v2243_v7 = vmul.f32 1.442695, %v2242_v6 }
0x1226   :  { %v2326_v10 = vpop.permute.xlu1 %2325 }
0x1227   :  { %4995 = vpow2.f32 %v2243_v7 }
0x1231   :  { %v4996_v8 = vpop.eup %4995 }
0x1232   :  { %v2245_v9 = vsel %vm310_vm3, %v4996_v8, 0.0 }
0x1233   :  { %2246 = vadd.xlane.f32.xlu1 %v2245_v9 }
0x1244   :  { %2491 = vrot.lane.b32.xlu1 %v2150_v57, %s6239_s5 }
0x1248   :  { %2658 = vrot.lane.b32.xlu1 %v2150_v57, %s6240_s30 }
0x124c   :  { %3005 = vrot.lane.b32.xlu1 %v2156_v2, %s6241_s22 }
0x1250   :  { %3173 = vrot.lane.b32.xlu1 %v2156_v2, %s5072_s0 }
0x1254   :  { %3340 = vrot.lane.b32.xlu1 %v2156_v2, %s6238_s29 }
0x12c0   :  { %v2247_v58 = vpop.xlane.xlu1 %2246 }
0x12c1   :  { %4997 = vrcp.f32 %v2247_v58 }
0x12c4   :  { %v2492_v12 = vpop.permute.xlu1 %2491 }
0x12c5   :  { %4634 = vmatmul.mubr.msk.f32.vlgmr.msra.gmra.mrb[26].mxu1 %vm229_vm2, %v2492_v12 }
0x12c6   :  { %4642 = vmatpush3.xpose.msk.msra.mxu1 %vm229_vm2, %v2661_v11  ;;  %4643 = vmatprep.mubr.msk.f32.mxu1 %vm5068_vm1, %v5067_v20 }
0x12c7   :  { %4651 = vmatprep.subr.mxu1 %v5067_v20 }
0x12c8   :  { %v2659_v14 = vpop.permute.xlu1 %2658 }
0x12c9   :  { %4644 = vmatmul.mubr.msk.f32.vlgmr.msra.gmra.mrb[28].mxu1 %vm229_vm2, %v2659_v14 }
0x12ca   :  { %4652 = vmatpush3.xpose.msk.msra.mxu1 %vm229_vm2, %v2842_v13  ;;  %4653 = vmatprep.mubr.msk.f32.mxu1 %vm5068_vm1, %v5067_v20 }
0x12cb   :  { %v4998_v15 = vpop.eup %4997  ;;  %4661 = vmatprep.subr.mxu1 %v5067_v20 }
0x12cc   :  { %v2249_v16 = vmul.f32 %v4998_v15, %v4996_v8  ;;  %v3006_v17 = vpop.permute.xlu1 %3005 }
0x12cd   :  { %4654 = vmatmul.mubr.msk.f32.vlgmr.msra.gmra.mrb[30].mxu1 %vm229_vm2, %v2156_v2 }
0x12ce   :  { %4662 = vmatpush3.xpose.msk.msra.mxu1 %vm229_vm2, %v3006_v17  ;;  %4619 = vmatmul.mubr.msk.f32.vlgmr.msra.gmra.mrb[26].mxu0 %vm310_vm3, %v2249_v16 }
0x12cf   :  { %4622 = vmatpush3.xpose.msk.msra.mxu0 %vm229_vm2, %v2326_v10  ;;  %4663 = vmatprep.mubr.msk.f32.mxu1 %vm5068_vm1, %v5067_v20 }
0x12d0   :  { %v3174_v40 = vpop.permute.xlu1 %3173  ;;  %4671 = vmatprep.subr.mxu1 %v5067_v20  ;;  %4623 = vmatprep.mubr.msk.f32.mxu0 %vm5068_vm1, %v5067_v20 }
0x12d1   :  { %4664 = vmatmul.mubr.msk.f32.vlgmr.msra.gmra.mrb[32].mxu1 %vm229_vm2, %v3004_v53  ;;  %4626 = vmatprep.subr.mxu0 %v5067_v20 }
0x12d2   :  { %4672 = vmatpush3.xpose.msk.msra.mxu1 %vm229_vm2, %v3174_v40  ;;  %4624 = vmatmul.mubr.msk.f32.vlgmr.msra.gmra.mrb[28].mxu0 %vm229_vm2, %v5757_v0 }
0x12d3   :  { %4673 = vmatprep.mubr.msk.f32.mxu1 %vm5068_vm1, %v5067_v20  ;;  %4681 = vmatprep.subr.mxu1 %v5067_v20 }
0x12d4   :  { %v3341_v22 = vpop.permute.xlu1 %3340  ;;  %4628 = vmatprep.mubr.msk.f32.mxu0 %vm5068_vm1, %v5067_v20 }
0x12d5   :  { %4674 = vmatmul.mubr.msk.f32.vlgmr.msra.gmra.mrb[34].mxu1 %vm229_vm2, %v3172_v18 }
0x12d6   :  { %4682 = vmatpush3.xpose.msk.msra.mxu1 %vm229_vm2, %v3341_v22  ;;  %4683 = vmatprep.mubr.msk.f32.mxu1 %vm5068_vm1, %v5067_v20 }
0x12d9   :  { %4684 = vmatmul.mubr.msk.f32.vlgmr.msra.gmra.mrb[36].mxu1 %vm229_vm2, %v3339_v19 }
0x1398   :  { %v2565_v23 = vpop.f32.mrb[26].mxu1 }
0x1399   :  { %v2569_v24 = vmul.f32 0.25, %v2565_v23  ;;  %v4635_v25 = vpop.f32.mrb[27].mxu1 }
0x139b   :  { %v2570_v26 = vadd.f32 %v2569_v24, %v5296_v54 }
0x139c   :  { %v2732_v27 = vpop.f32.mrb[28].mxu1 }
0x139d   :  { %v2736_v28 = vmul.f32 0.25, %v2732_v27  ;;  %v4645_v29 = vpop.f32.mrb[29].mxu1  ;;  %v2571_v30 = vsel %vm310_vm3, %v2570_v26, -inf }
0x139e   :  { %2572 = vmax.xlane.f32.xlu0 %v2571_v30 }
0x139f   :  { %v2737_v31 = vadd.f32 %v2736_v28, %v5296_v54 }
0x13a0   :  { %v2913_v32 = vpop.f32.mrb[30].mxu1 }
0x13a1   :  { %v5817_v33 = vpop.f32.mrb[26].mxu0  ;;  %v4655_v34 = vpop.f32.mrb[31].mxu1  ;;  %v2738_v35 = vsel %vm310_vm3, %v2737_v31, -inf  ;;  %v2917_v45 = vmul.f32 0.25, %v2913_v32 }
0x13a2   :  { %v4620_v37 = vpop.f32.mrb[27].mxu0  ;;  %2739 = vmax.xlane.f32.xlu0 %v2738_v35 }
0x13a3   :  { %v2918_v55 = vadd.f32 %v2917_v45, %v5386_v4  ;;  %v2158_v37 = vadd.f32 %v5765_v60, %v5749_v61 }
0x13a4   :  { %v3077_v39 = vpop.f32.mrb[32].mxu1 }
0x13a5   :  { %v3081_v41 = vmul.f32 0.25, %v3077_v39  ;;  %v2397_v42 = vpop.f32.mrb[28].mxu0  ;;  %v4665_v44 = vpop.f32.mrb[33].mxu1  ;;  %v2919_v50 = vsel %vm310_vm3, %v2918_v55, -inf }
0x13a6   :  { %v2401_v46 = vmul.f32 0.25, %v2397_v42  ;;  %v4625_v48 = vpop.f32.mrb[29].mxu0 }
0x13a7   :  { %v3082_v51 = vadd.f32 %v3081_v41, %v5386_v4 }
0x13a8   :  { %v3245_v56 = vpop.f32.mrb[34].mxu1  ;;  %v5822_v57 = vadd.f32 %v2401_v46, %v5296_v54 }
0x13a9   :  { %v4675_v59 = vpop.f32.mrb[35].mxu1  ;;  %v3083_v63 = vsel %vm310_vm3, %v3082_v51, -inf  ;;  %v3249_v0 = vmul.f32 0.25, %v3245_v56 }
0x13aa   :  { %3084 = vmax.xlane.f32.xlu0 %v3083_v63  ;;  %v2403_v1 = vsel %vm310_vm3, %v5822_v57, -inf }
0x13ab   :  { %2404 = vmax.xlane.f32.xlu1 %v2403_v1  ;;  %v3250_v5 = vadd.f32 %v3249_v0, %v5386_v4 }
0x13ac   :  { %v3412_v2 = vpop.f32.mrb[36].mxu1 }
0x13ad   :  { %v3416_v3 = vmul.f32 0.25, %v3412_v2  ;;  %v4685_v62 = vpop.f32.mrb[37].mxu1  ;;  %v3251_v36 = vsel %vm310_vm3, %v3250_v5, -inf }
0x13af   :  { %2920 = vmax.xlane.f32.xlu1 %v2919_v50  ;;  %v3417_v54 = vadd.f32 %v3416_v3, %v5386_v4 }
0x13b1   :  { %v3418_v21 = vsel %vm310_vm3, %v3417_v54, -inf }
0x13b2   :  { %3419 = vmax.xlane.f32.xlu0 %v3418_v21 }
0x13b3   :  { %3252 = vmax.xlane.f32.xlu1 %v3251_v36 }
0x142b   :  { %v2573_v6 = vpop.xlane.xlu0 %2572 }
0x142c   :  { %v2574_v7 = vsub.f32 %v2570_v26, %v2573_v6 }
0x142e   :  { %v2575_v8 = vmul.f32 1.442695, %v2574_v7 }
0x142f   :  { %v2740_v9 = vpop.xlane.xlu0 %2739 }
0x1430   :  { %4999 = vpow2.f32 %v2575_v8  ;;  %v2741_v10 = vsub.f32 %v2737_v31, %v2740_v9 }
0x1432   :  { %v2742_v58 = vmul.f32 1.442695, %v2741_v10 }
0x1434   :  { %5001 = vpow2.f32 %v2742_v58  ;;  %v4257_v58 = vld [vmem:[%s6203_s6 + $0x40] sm:$0xff] }
0x1437   :  { %v3085_v11 = vpop.xlane.xlu0 %3084 }
0x1438   :  { %v3086_v12 = vsub.f32 %v3082_v51, %v3085_v11  ;;  %v2405_v13 = vpop.xlane.xlu1 %2404  ;;  %v4258_v11 = vld [vmem:[%s6203_s6 + $0x48] sm:$0xff] }
0x1439   :  { %v2406_v39 = vsub.f32 %v5822_v57, %v2405_v13  ;;  %v4259_v13 = vld [vmem:[%s6203_s6 + $0x50] sm:$0xff] }
0x143a   :  { %v5833_v14 = vpop.eup %4999  ;;  %v3087_v4 = vmul.f32 1.442695, %v3086_v12  ;;  %v4844_v12 = vpack.c.bf16 %v4258_v11, %v4257_v58  ;;  %v4275_v58 = vld [vmem:[%s6207_s10 + $0x90] sm:$0xff] }
0x143b   :  { %v2577_v15 = vsel %vm310_vm3, %v5833_v14, 0.0  ;;  %v2407_v41 = vmul.f32 1.442695, %v2406_v39 }
0x143c   :  { %5003 = vpow2.f32 %v3087_v4  ;;  %v2921_v53 = vpop.xlane.xlu1 %2920  ;;  %2578 = vadd.xlane.f32.xlu0 %v2577_v15  ;;  %4845 = vmatprep.subr.bf16.mxu1 %v4844_v12 }
0x143d   :  { %v2922_v16 = vsub.f32 %v2918_v55, %v2921_v53  ;;  %4847 = vmatpush3.bf16.msra.mxu1 %v4844_v12  ;;  %v4278_v12 = vld [vmem:[%s6207_s10 + $0xa8] sm:$0xff] }
0x143e   :  { %v5837_v17 = vpop.eup %5001 }
0x143f   :  { %v2923_v40 = vmul.f32 1.442695, %v2922_v16  ;;  %v3420_v18 = vpop.xlane.xlu0 %3419  ;;  %v2744_v22 = vsel %vm310_vm3, %v5837_v17, 0.0  ;;  %v4261_v16 = vld [vmem:[%s6203_s6 + $0x60] sm:$0xff] }
0x1440   :  { %v3421_v19 = vsub.f32 %v3417_v54, %v3420_v18  ;;  %v3253_v23 = vpop.xlane.xlu1 %3252  ;;  %2745 = vadd.xlane.f32.xlu1 %v2744_v22 }
0x1441   :  { %5005 = vpow2.f32 %v2923_v40  ;;  %v3254_v24 = vsub.f32 %v3250_v5, %v3253_v23  ;;  %v4264_v23 = vld [vmem:[%s6203_s6 + $0x78] sm:$0xff] }
0x1442   :  { %v3422_v25 = vmul.f32 1.442695, %v3421_v19  ;;  %v4263_v19 = vld [vmem:[%s6203_s6 + $0x70] sm:$0xff] }
0x1443   :  { %v3255_v26 = vmul.f32 1.442695, %v3254_v24 }
0x1444   :  { %5007 = vpow2.f32 %v3422_v25  ;;  %v4856_v25 = vpack.c.bf16 %v4264_v23, %v4263_v19  ;;  %v4286_v23 = vld [vmem:[%s6207_s10 + $0xe8] sm:$0xff] }
0x1445   :  { %5009 = vpow2.f32 %v3255_v26 }
0x1446   :  { %v5841_v27 = vpop.eup %5003  ;;  %5011 = vpow2.f32 %v2407_v41 }
0x1447   :  { %v3089_v28 = vsel %vm310_vm3, %v5841_v27, 0.0 }
0x1448   :  { %3090 = vadd.xlane.f32.xlu1 %v3089_v28 }
0x144b   :  { %v5006_v29 = vpop.eup %5005 }
0x144c   :  { %v2925_v30 = vsel %vm310_vm3, %v5006_v29, 0.0 }
0x144d   :  { %2926 = vadd.xlane.f32.xlu0 %v2925_v30 }
0x144e   :  { %v5846_v31 = vpop.eup %5007 }
0x144f   :  { %v5848_v32 = vpop.eup %5009  ;;  %v3424_v34 = vsel %vm310_vm3, %v5846_v31, 0.0 }
0x1450   :  { %3425 = vadd.xlane.f32.xlu1 %v3424_v34  ;;  %v3257_v35 = vsel %vm310_vm3, %v5848_v32, 0.0  ;;  %v5012_v42 = vpop.eup %5011 }
0x1451   :  { %3258 = vadd.xlane.f32.xlu0 %v3257_v35  ;;  %v2409_v44 = vsel %vm310_vm3, %v5012_v42, 0.0 }
0x1461   :  { %2582 = vrot.lane.b32.xlu1 %v5754_v52, %s6239_s5 }
0x1467   :  { %2415 = vrot.lane.b32.xlu0 %v5754_v52, %s5071_s4 }
0x146b   :  { %3095 = vrot.lane.b32.xlu0 %v2158_v37, %s5071_s4 }
0x146f   :  { %3429 = vrot.lane.b32.xlu0 %v2158_v37, %s6240_s30 }
0x1485   :  { %2410 = vadd.xlane.f32.xlu1 %v2409_v44 }
0x1496   :  { %2749 = vrot.lane.b32.xlu1 %v5754_v52, %s6240_s30  ;;  %s5077_s30 = smov [#allocation2]  }
0x1497   :  { %s4168_s3 = sshll.u32 %s5077_s30, 4  ;;  %s4169_s3 = int_to_ptr.vmem [resolvable:$true] %s4168_s3 }
0x1498   :  { %p5048_p1 = scmp.lt.s32.totalorder %s4169_s3, %s4169_s3 }
0x149a   :  { %3262 = vrot.lane.b32.xlu1 %v2158_v37, %s6239_s5 }
0x14c9   :  { %v2579_v45 = vpop.xlane.xlu0 %2578 }
0x14cd   :  { %v2746_v48 = vpop.xlane.xlu1 %2745 }
0x14d5   :  { %v3091_v51 = vpop.xlane.xlu1 %3090 }
0x14da   :  { %v2927_v46 = vpop.xlane.xlu0 %2926 }
0x14dd   :  { %v3426_v56 = vpop.xlane.xlu1 %3425 }
0x14de   :  { %v3259_v61 = vpop.xlane.xlu0 %3258 }
0x14e1   :  { %v2583_v57 = vpop.permute.xlu1 %2582 }
0x14e2   :  { %v2416_v60 = vpop.permute.xlu0 %2415 }
0x14e3   :  { %4627 = vmatpush3.msra.mxu0 %v2416_v60 }
0x14e4   :  { %4636 = vmatprep.subr.mxu0 %v5067_v20 }
0x14e6   :  { %v3096_v54 = vpop.permute.xlu0 %3095 }
0x14ea   :  { %v3430_v9 = vpop.permute.xlu0 %3429 }
0x1512   :  { %v2411_v59 = vpop.xlane.xlu1 %2410 }
0x1513   :  { %5013 = vrcp.f32 %v2411_v59 }
0x1514   :  { %5015 = vrcp.f32 %v2579_v45 }
0x1515   :  { %5017 = vrcp.f32 %v2746_v48 }
0x1516   :  { %5019 = vrcp.f32 %v2927_v46  ;;  %v2750_v2 = vpop.permute.xlu1 %2749 }
0x1517   :  { %5021 = vrcp.f32 %v3091_v51 }
0x1518   :  { %5023 = vrcp.f32 %v3259_v61 }
0x1519   :  { %5025 = vrcp.f32 %v3426_v56 }
0x151a   :  { %v3263_v6 = vpop.permute.xlu1 %3262 }
0x151d   :  { %v5014_v63 = vpop.eup %5013 }
0x151e   :  { %v2413_v52 = vmul.f32 %v5014_v63, %v5012_v42  ;;  %v5016_v0 = vpop.eup %5015 }
0x151f   :  { %v2581_v1 = vmul.f32 %v5016_v0, %v5833_v14  ;;  %v5018_v55 = vpop.eup %5017  ;;  %v4260_v14 = vld [vmem:[%s6203_s6 + $0x58] sm:$0xff] }
0x1520   :  { %4629 = vmatmul.mubr.msk.f32.vlgmr.msra.gmra.mrb[30].mxu0 %vm310_vm3, %v2413_v52  ;;  %v2748_v3 = vmul.f32 %v5018_v55, %v5837_v17  ;;  %v5020_v62 = vpop.eup %5019  ;;  %v4848_v4 = vpack.c.bf16 %v4260_v14, %v4259_v13  ;;  %v4262_v17 = vld [vmem:[%s6203_s6 + $0x68] sm:$0xff]  ;;  %v4280_v13 = vld [vmem:[%s6207_s10 + $0xb8] sm:$0xff] }
0x1521   :  { %4637 = vmatpush3.msra.mxu0 %v2583_v57  ;;  %4638 = vmatprep.mubr.msk.f32.mxu0 %vm5068_vm1, %v5067_v20  ;;  %v2929_v50 = vmul.f32 %v5020_v62, %v5006_v29  ;;  %v5022_v5 = vpop.eup %5021  ;;  %v4852_v18 = vpack.c.bf16 %v4262_v17, %v4261_v16  ;;  %v4864_v14 = vpack.c.bf16 %v4280_v13, %v4278_v12  ;;  %v4282_v16 = vld [vmem:[%s6207_s10 + $0xc8] sm:$0xff]  ;;  %v4284_v17 = vld [vmem:[%s6207_s10 + $0xd8] sm:$0xff] }
0x1522   :  { %4646 = vmatprep.subr.mxu0 %v5067_v20  ;;  %v3093_v21 = vmul.f32 %v5022_v5, %v5841_v27  ;;  %v5024_v36 = vpop.eup %5023  ;;  %4849 = vmatprep.subr.bf16.mxu1 %v4848_v4  ;;  %v4301_v13 = vld [vmem:[%s6209_s12 + $0x148] sm:$0xff] }
0x1523   :  { %v3261_v7 = vmul.f32 %v5024_v36, %v5848_v32  ;;  %v5026_v8 = vpop.eup %5025  ;;  %4851 = vmatpush3.bf16.msra.mxu1 %v4848_v4  ;;  %v4277_v4 = vld [vmem:[%s6207_s10 + $0xa0] sm:$0xff] }
0x1524   :  { %4639 = vmatmul.mubr.msk.f32.vlgmr.msra.gmra.mrb[32].mxu0 %vm310_vm3, %v2581_v1  ;;  %v3428_v10 = vmul.f32 %v5026_v8, %v5846_v31  ;;  %4853 = vmatprep.subr.bf16.mxu1 %v4852_v18  ;;  %v4276_v8 = vld [vmem:[%s6207_s10 + $0x98] sm:$0xff] }
0x1525   :  { %4647 = vmatpush3.msra.mxu0 %v2750_v2  ;;  %4648 = vmatprep.mubr.msk.f32.mxu0 %vm5068_vm1, %v5067_v20 }
0x1526   :  { %4656 = vmatprep.subr.mxu0 %v5067_v20 }
0x1527   :  { %4855 = vmatpush3.bf16.msra.mxu1 %v4852_v18  ;;  %v4281_v18 = vld [vmem:[%s6207_s10 + $0xc0] sm:$0xff] }
0x1528   :  { %4649 = vmatmul.mubr.msk.f32.vlgmr.msra.gmra.mrb[34].mxu0 %vm310_vm3, %v2748_v3  ;;  %4857 = vmatprep.subr.bf16.mxu1 %v4856_v25 }
0x1529   :  { %4657 = vmatpush3.msra.mxu0 %v2158_v37  ;;  %4658 = vmatprep.mubr.msk.f32.mxu0 %vm5068_vm1, %v5067_v20 }
0x152a   :  { %4666 = vmatprep.subr.mxu0 %v5067_v20 }
0x152b   :  { %4859 = vmatpush3.bf16.msra.mxu1 %v4856_v25  ;;  %v4285_v25 = vld [vmem:[%s6207_s10 + $0xe0] sm:$0xff] }
0x152c   :  { %4659 = vmatmul.mubr.msk.f32.vlgmr.msra.gmra.mrb[36].mxu0 %vm310_vm3, %v2929_v50 }
0x152d   :  { %4667 = vmatpush3.msra.mxu0 %v3096_v54  ;;  %4668 = vmatprep.mubr.msk.f32.mxu0 %vm5068_vm1, %v5067_v20 }
0x152e   :  { %4676 = vmatprep.subr.mxu0 %v5067_v20 }
0x1530   :  { %4669 = vmatmul.mubr.msk.f32.vlgmr.msra.gmra.mrb[38].mxu0 %vm310_vm3, %v3093_v21 }
0x1531   :  { %4677 = vmatpush3.msra.mxu0 %v3263_v6  ;;  %4678 = vmatprep.mubr.msk.f32.mxu0 %vm5068_vm1, %v5067_v20 }
0x1532   :  { %4686 = vmatprep.subr.mxu0 %v5067_v20 }
0x1534   :  { %4679 = vmatmul.mubr.msk.f32.vlgmr.msra.gmra.mrb[40].mxu0 %vm310_vm3, %v3261_v7 }
0x1535   :  { %4687 = vmatpush3.msra.mxu0 %v3430_v9  ;;  %4688 = vmatprep.mubr.msk.f32.mxu0 %vm5068_vm1, %v5067_v20 }
0x1538   :  { %4689 = vmatmul.mubr.msk.f32.vlgmr.msra.gmra.mrb[42].mxu0 %vm310_vm3, %v3428_v10  ;;  %v4273_v10 = vld [vmem:[%s6207_s10 + $0x80] sm:$0xff] }
0x1539   :  { %3766 = vmatprep.mubr.f32.mxu0 %v5067_v20  ;;  %v4862_v11 = vpack.c.bf16 %v4275_v58, %v4273_v10  ;;  %v4316_v10 = vld [vmem:[%s6209_s12 + $0x1c0] sm:$0xff]  ;;  %v4317_v58 = vld [vmem:[%s6209_s12 + $0x1c8] sm:$0xff] }
0x153a   :  { %v4892_v12 = vpack.c.bf16 %v4317_v58, %v4316_v10 }
0x15f3   :  { %v2487_v15 = vpop.f32.mrb[30].mxu0 }
0x15f4   :  { %2826 = vrot.lane.b32.xlu1 %v2487_v15, %s6238_s29  ;;  %v4630_v53 = vpop.f32.mrb[31].mxu0  ;;  %v4279_v15 = vld [vmem:[%s6207_s10 + $0xb0] sm:$0xff] }
0x15f5   :  { %v4866_v53 = vpack.c.bf16 %v4279_v15, %v4277_v4  ;;  %v4319_v4 = vld [vmem:[%s6209_s12 + $0x1d8] sm:$0xff] }
0x15f7   :  { %v2654_v40 = vpop.f32.mrb[32].mxu0 }
0x15f8   :  { %2830 = vrot.lane.b32.xlu0 %v2654_v40, %s5072_s0  ;;  %v4640_v22 = vpop.f32.mrb[33].mxu0  ;;  %v4868_v40 = vpack.c.bf16 %v4284_v17, %v4282_v16  ;;  %v4302_v16 = vld [vmem:[%s6209_s12 + $0x150] sm:$0xff]  ;;  %v4303_v17 = vld [vmem:[%s6209_s12 + $0x158] sm:$0xff] }
0x15f9   :  { %v4283_v22 = vld [vmem:[%s6207_s10 + $0xd0] sm:$0xff] }
0x15fa   :  { %v4870_v19 = vpack.c.bf16 %v4283_v22, %v4281_v18  ;;  %v4321_v18 = vld [vmem:[%s6209_s12 + $0x1e8] sm:$0xff]  ;;  %v4898_v22 = vpack.c.bf16 %v4303_v17, %v4302_v16 }
0x15fb   :  { %v2821_v24 = vpop.f32.mrb[34].mxu0 }
0x15fc   :  { %2834 = vrot.lane.b32.xlu0 %v2821_v24, %s6241_s22  ;;  %v4650_v26 = vpop.f32.mrb[35].mxu0  ;;  %v4288_v24 = vld [vmem:[%s6207_s10 + $0xf8] sm:$0xff] }
0x15fd   :  { %v4872_v26 = vpack.c.bf16 %v4288_v24, %v4286_v23  ;;  %v4304_v23 = vld [vmem:[%s6209_s12 + $0x160] sm:$0xff]  ;;  %v4305_v24 = vld [vmem:[%s6209_s12 + $0x168] sm:$0xff] }
0x15ff   :  { %v2999_v27 = vpop.f32.mrb[36].mxu0 }
0x1600   :  { %v4660_v28 = vpop.f32.mrb[37].mxu0 }
0x1603   :  { %v3167_v29 = vpop.f32.mrb[38].mxu0 }
0x1604   :  { %3506 = vrot.lane.b32.xlu1 %v3167_v29, %s6238_s29  ;;  %v4670_v30 = vpop.f32.mrb[39].mxu0  ;;  %v4308_v29 = vld [vmem:[%s6209_s12 + $0x180] sm:$0xff] }
0x1605   :  { %v4309_v30 = vld [vmem:[%s6209_s12 + $0x188] sm:$0xff] }
0x1607   :  { %v3334_v31 = vpop.f32.mrb[40].mxu0 }
0x1608   :  { %3510 = vrot.lane.b32.xlu1 %v3334_v31, %s5072_s0  ;;  %v4680_v32 = vpop.f32.mrb[41].mxu0  ;;  %v4292_v31 = vld [vmem:[%s6209_s12 + $0x100] sm:$0xff] }
0x1609   :  { %v4876_v32 = vpack.c.bf16 %v4309_v30, %v4308_v29  ;;  %v4306_v29 = vld [vmem:[%s6209_s12 + $0x170] sm:$0xff]  ;;  %v4307_v30 = vld [vmem:[%s6209_s12 + $0x178] sm:$0xff] }
0x160b   :  { %v3501_v34 = vpop.f32.mrb[42].mxu0  ;;  %4877 = vmatprep.subr.bf16.mxu1 %v4876_v32  ;;  %v4289_v32 = vld [vmem:[%s6208_s11 + $0x2] sm:$0x3] }
0x160c   :  { %3514 = vrot.lane.b32.xlu0 %v3501_v34, %s6241_s22  ;;  %v4690_v35 = vpop.f32.mrb[43].mxu0  ;;  %v4293_v34 = vld [vmem:[%s6209_s12 + $0x108] sm:$0xff] }
0x160d   :  { %v4878_v35 = vpack.c.bf16 %v4293_v34, %v4292_v31  ;;  %v4906_v31 = vpack.c.bf16 %v4307_v30, %v4306_v29  ;;  %v3689_v34 = vrot.slane %v4289_v32, %v5258_v43 }
0x1666   :  { %v2827_v37 = vpop.permute.xlu1 %2826 }
0x1667   :  { %v2837_v41 = vsel %vm229_vm2, %v5817_v33, %v2827_v37  ;;  %v4266_v33 = vld [vmem:[%s6204_s7 + $0x1] ss:$0 sm:$0xff] }
0x166a   :  { %v2831_v39 = vpop.permute.xlu0 %2830 }
0x166b   :  { %v2838_v42 = vsel %vm910_vm4, %v2837_v41, %v2831_v39 }
0x166e   :  { %v2835_v44 = vpop.permute.xlu0 %2834 }
0x166f   :  { %v2839_v45 = vsel %vm912_vm5, %v2838_v42, %v2835_v44 }
0x1670   :  { %4707 = vmatprep.mubr.msk.f32.mxu1 %vm70_vm0, %v2839_v45 }
0x1676   :  { %v3507_v46 = vpop.permute.xlu1 %3506 }
0x1677   :  { %v3517_v60 = vsel %vm229_vm2, %v2999_v27, %v3507_v46  ;;  %v4287_v27 = vld [vmem:[%s6207_s10 + $0xf0] sm:$0xff] }
0x1678   :  { %v4874_v28 = vpack.c.bf16 %v4287_v27, %v4285_v25  ;;  %v4322_v25 = vld [vmem:[%s6209_s12 + $0x1f0] sm:$0xff]  ;;  %v4902_v27 = vpack.c.bf16 %v4305_v24, %v4304_v23 }
0x167a   :  { %v3511_v61 = vpop.permute.xlu1 %3510 }
0x167b   :  { %v3518_v48 = vsel %vm910_vm4, %v3517_v60, %v3511_v61  ;;  %v4271_v60 = vld [vmem:[%s6205_s8 + $0x1] ss:$0 sm:$0xff] }
0x167e   :  { %v3515_v51 = vpop.permute.xlu0 %3514 }
0x167f   :  { %v3519_v56 = vsel %vm912_vm5, %v3518_v48, %v3515_v51 }
0x1680   :  { %4708 = vmatmul.mubr.msk.f32.vlgmr.msra.gmra.mrb[38].mxu1 %vm70_vm0, %v3519_v56  ;;  %v4272_v56 = vld [vmem:[%s6206_s9 + $0x1] ss:$0 sm:$0xff] }
0x1681   :  { %4879 = vmatpush3.bf16.msra.mxu1 %v4878_v35  ;;  %v3693_v35 = vrot.slane %v4289_v32, %v5273_v49 }
0x1753   :  { %v4709_v57 = vpop.f32.mrb[38].mxu1 }
0x1754   :  { %v3615_v59 = vadd.f32 %v4709_v57, %v4266_v33  ;;  %v3609_v63 = vpop.f32.mrb[39].mxu1 }
0x1755   :  { %v3610_v52 = vadd.f32 %v4266_v33, %v3609_v63 }
0x1756   :  { %v3619_v0 = vadd.f32 %v3615_v59, %v5734_v47 }
0x1757   :  { %v3618_v1 = vadd.f32 %v3610_v52, %v5729_v38  ;;  %v4274_v38 = vld [vmem:[%s6207_s10 + $0x88] sm:$0xff]  ;;  %v4310_v52 = vld [vmem:[%s6209_s12 + $0x190] sm:$0xff] }
0x1758   :  { %v3627_v55 = vsel %vm70_vm0, %v3619_v0, 0.0  ;;  %v4860_v9 = vpack.c.bf16 %v4276_v8, %v4274_v38  ;;  %v4298_v38 = vld [vmem:[%s6209_s12 + $0x130] sm:$0xff]  ;;  %v4299_v8 = vld [vmem:[%s6209_s12 + $0x138] sm:$0xff] }
0x1759   :  { %3628 = vadd.xlane.f32.xlu0 %v3627_v55  ;;  %v3624_v2 = vsel %vm70_vm0, %v3618_v1, 0.0  ;;  %v4294_v55 = vld [vmem:[%s6209_s12 + $0x110] sm:$0xff] }
0x175a   :  { %3625 = vadd.xlane.f32.xlu1 %v3624_v2  ;;  %4861 = vmatprep.subr.bf16.mxu0 %v4860_v9  ;;  %v4295_v2 = vld [vmem:[%s6209_s12 + $0x118] sm:$0xff]  ;;  %v4890_v9 = vpack.c.bf16 %v4299_v8, %v4298_v38 }
0x175b   :  { %4863 = vmatpush1.bf16.msra.mxu0 %v4862_v11  ;;  %v4300_v11 = vld [vmem:[%s6209_s12 + $0x140] sm:$0xff] }
0x175c   :  { %4865 = vmatprep.subr.bf16.mxu0 %v4864_v14  ;;  %v4318_v14 = vld [vmem:[%s6209_s12 + $0x1d0] sm:$0xff]  ;;  %v4894_v15 = vpack.c.bf16 %v4301_v13, %v4300_v11 }
0x175f   :  { %4867 = vmatpush1.bf16.msra.mxu0 %v4866_v53  ;;  %v4896_v53 = vpack.c.bf16 %v4319_v4, %v4318_v14 }
0x1760   :  { %4869 = vmatprep.subr.bf16.mxu0 %v4868_v40  ;;  %v4320_v40 = vld [vmem:[%s6209_s12 + $0x1e0] sm:$0xff] }
0x1763   :  { %4871 = vmatpush1.bf16.msra.mxu0 %v4870_v19  ;;  %v4900_v19 = vpack.c.bf16 %v4321_v18, %v4320_v40  ;;  %v4325_v40 = vld [vmem:[%s6210_s13 + $0x1] ss:$0 sm:$0xff] }
0x1764   :  { %4873 = vmatprep.subr.bf16.mxu0 %v4872_v26  ;;  %v4323_v26 = vld [vmem:[%s6209_s12 + $0x1f8] sm:$0xff] }
0x1767   :  { %4875 = vmatpush1.bf16.msra.mxu0 %v4874_v28  ;;  %v4904_v28 = vpack.c.bf16 %v4323_v26, %v4322_v25 }
0x17e6   :  { %v3629_v3 = vpop.xlane.xlu0 %3628 }
0x17e7   :  { %v3631_v62 = vmul.f32 0.015625, %v3629_v3  ;;  %v3626_v50 = vpop.xlane.xlu1 %3625  ;;  %v4882_v3 = vpack.c.bf16 %v4295_v2, %v4294_v55 }
0x17e8   :  { %v3630_v5 = vmul.f32 0.015625, %v3626_v50  ;;  %v4313_v50 = vld [vmem:[%s6209_s12 + $0x1a8] sm:$0xff] }
0x17e9   :  { %v3633_v54 = vsub.f32 %v3619_v0, %v3631_v62  ;;  %v4311_v0 = vld [vmem:[%s6209_s12 + $0x198] sm:$0xff]  ;;  %v4312_v62 = vld [vmem:[%s6209_s12 + $0x1a0] sm:$0xff] }
0x17ea   :  { %v3632_v21 = vsub.f32 %v3618_v1, %v3630_v5  ;;  %v4880_v1 = vpack.c.bf16 %v4311_v0, %v4310_v52  ;;  %v4884_v5 = vpack.c.bf16 %v4313_v50, %v4312_v62 }
0x17eb   :  { %v3635_v36 = vmul.f32 %v3633_v54, %v3633_v54 }
0x17ec   :  { %v3634_v6 = vmul.f32 %v3632_v21, %v3632_v21  ;;  %4881 = vmatprep.subr.bf16.mxu1 %v4880_v1 }
0x17ed   :  { %v3639_v7 = vsel %vm70_vm0, %v3635_v36, 0.0  ;;  %4883 = vmatpush3.bf16.msra.mxu1 %v4882_v3 }
0x17ee   :  { %3640 = vadd.xlane.f32.xlu1 %v3639_v7  ;;  %v3636_v47 = vsel %vm70_vm0, %v3634_v6, 0.0  ;;  %4885 = vmatprep.subr.bf16.mxu1 %v4884_v5  ;;  %v4314_v6 = vld [vmem:[%s6209_s12 + $0x1b0] sm:$0xff]  ;;  %v4315_v7 = vld [vmem:[%s6209_s12 + $0x1b8] sm:$0xff] }
0x17ef   :  { %3637 = vadd.xlane.f32.xlu0 %v3636_v47  ;;  %v4888_v47 = vpack.c.bf16 %v4315_v7, %v4314_v6 }
0x187b   :  { %v3641_v37 = vpop.xlane.xlu1 %3640 }
0x187c   :  { %v3643_v39 = vmul.f32 0.015625, %v3641_v37  ;;  %v3638_v41 = vpop.xlane.xlu0 %3637 }
0x187d   :  { %v3642_v42 = vmul.f32 0.015625, %v3638_v41 }
0x187e   :  { %v3645_v44 = vadd.f32 1e-05, %v3643_v39 }
0x187f   :  { %v3644_v45 = vadd.f32 1e-05, %v3642_v42 }
0x1880   :  { %5027 = vrsqrt.f32 %v3645_v44 }
0x1881   :  { %5029 = vrsqrt.f32 %v3644_v45 }
0x188a   :  { %v5028_v46 = vpop.eup %5027 }
0x188b   :  { %v5030_v61 = vpop.eup %5029  ;;  %v3649_v51 = vmul.f32 %v5028_v46, %v3633_v54  ;;  %v4296_v54 = vld [vmem:[%s6209_s12 + $0x120] sm:$0xff] }
0x188c   :  { %v3648_v48 = vmul.f32 %v5030_v61, %v3632_v21  ;;  %v4297_v21 = vld [vmem:[%s6209_s12 + $0x128] sm:$0xff] }
0x188d   :  { %v3657_v59 = vmul.f32 %v4271_v60, %v3649_v51  ;;  %v4886_v36 = vpack.c.bf16 %v4297_v21, %v4296_v54 }
0x188e   :  { %v3656_v33 = vmul.f32 %v4271_v60, %v3648_v48 }
0x188f   :  { %v6017_v63 = vadd.f32 %v4272_v56, %v3657_v59  ;;  %4887 = vmatpush3.bf16.msra.mxu1 %v4886_v36 }
0x1890   :  { %v6012_v57 = vadd.f32 %v4272_v56, %v3656_v33  ;;  %4889 = vmatprep.subr.bf16.mxu1 %v4888_v47 }
0x1892   :  { %4290 = vmatmul.mubr.msk.f32.vlgmr.msra.gmra.mrb[44].mxu0 %vm70_vm0, %v6012_v57 }
0x1893   :  { %3772 = vmatprep.mubr.f32.mxu0 %v5067_v20  ;;  %4891 = vmatpush3.bf16.msra.mxu1 %v4890_v9 }
0x1894   :  { %4893 = vmatprep.subr.bf16.mxu1 %v4892_v12 }
0x1896   :  { %4291 = vmatmul.mubr.msk.f32.gmra.mrb[46].mxu0 %vm70_vm0, %v6017_v63 }
0x1897   :  { %4726 = vmatprep.mubr.msk.f32.mxu0 %vm5068_vm1, %v5067_v20  ;;  %4895 = vmatpush3.bf16.msra.mxu1 %v4894_v15 }
0x1898   :  { %4897 = vmatprep.subr.bf16.mxu1 %v4896_v53 }
0x189b   :  { %4899 = vmatpush3.bf16.msra.mxu1 %v4898_v22 }
0x189c   :  { %4901 = vmatprep.subr.bf16.mxu1 %v4900_v19 }
0x189f   :  { %4903 = vmatpush3.bf16.msra.mxu1 %v4902_v27 }
0x18a0   :  { %4905 = vmatprep.subr.bf16.mxu1 %v4904_v28 }
0x18a3   :  { %4907 = vmatpush3.bf16.msra.mxu1 %v4906_v31 }
0x1965   :  { %v3768_v37 = vpop.f32.mrb[44].mxu0 }
0x1966   :  { %v3769_v39 = vadd.f32 %v3768_v37, %v3689_v34  ;;  %v3770_v41 = vpop.f32.mrb[45].mxu0 }
0x1967   :  { %v3771_v42 = vadd.f32 %v3770_v41, %v3693_v35 }
0x1968   :  { %v3783_v44 = vmul.f32 0.044715, %v3769_v39  ;;  %v3779_v9 = vmul.f32 0.5, %v3769_v39 }
0x1969   :  { %v3784_v45 = vmul.f32 0.044715, %v3771_v42  ;;  %v3774_v46 = vpop.f32.mrb[46].mxu0  ;;  %v3780_v38 = vmul.f32 0.5, %v3771_v42 }
0x196a   :  { %v3787_v61 = vmul.f32 %v3783_v44, %v3769_v39  ;;  %v3775_v60 = vadd.f32 %v3774_v46, %v3689_v34  ;;  %v3776_v48 = vpop.f32.mrb[47].mxu0 }
0x196b   :  { %v3788_v51 = vmul.f32 %v3784_v45, %v3771_v42  ;;  %v3777_v56 = vadd.f32 %v3776_v48, %v3693_v35  ;;  %v3985_v45 = vld [vmem:[%s6213_s16 + $0x8] sm:$0xff]  ;;  %v3987_v48 = vld [vmem:[%s6213_s16 + $0x18] sm:$0xff] }
0x196c   :  { %v3791_v33 = vmul.f32 %v3787_v61, %v3769_v39  ;;  %v3785_v59 = vmul.f32 0.044715, %v3775_v60  ;;  %v3781_v15 = vmul.f32 0.5, %v3775_v60  ;;  %v5076_v61 = vmov 0.0|0.0  }
0x196d   :  { %v3786_v52 = vmul.f32 0.044715, %v3777_v56  ;;  %v3792_v0 = vmul.f32 %v3788_v51, %v3771_v42  ;;  %v3782_v14 = vmul.f32 0.5, %v3777_v56  ;;  %4908 = vmatprep.subr.bf16.mxu0 %v5076_v61 }
0x196e   :  { %v3795_v1 = vadd.f32 %v3791_v33, %v3769_v39  ;;  %v3789_v43 = vmul.f32 %v3785_v59, %v3775_v60  ;;  %v3989_v33 = vld [vmem:[%s6213_s16 + $0x28] sm:$0xff] }
0x196f   :  { %v3790_v55 = vmul.f32 %v3786_v52, %v3777_v56  ;;  %v3796_v49 = vadd.f32 %v3792_v0, %v3771_v42  ;;  %v3990_v52 = vld [vmem:[%s6213_s16 + $0x30] sm:$0xff]  ;;  %v3991_v0 = vld [vmem:[%s6213_s16 + $0x38] sm:$0xff] }
0x1970   :  { %v3799_v2 = vmul.f32 0.7978846, %v3795_v1  ;;  %v3793_v3 = vmul.f32 %v3789_v43, %v3775_v60  ;;  %v4918_v1 = vpack.c.bf16 %v3991_v0, %v3990_v52 }
0x1971   :  { %v3800_v62 = vmul.f32 0.7978846, %v3796_v49  ;;  %v3794_v50 = vmul.f32 %v3790_v55, %v3777_v56 }
0x1972   :  { %5031 = vtanh.f32 %v3799_v2  ;;  %v3797_v5 = vadd.f32 %v3793_v3, %v3775_v60  ;;  %v3986_v60 = vld [vmem:[%s6213_s16 + $0x10] sm:$0xff] }
0x1973   :  { %5033 = vtanh.f32 %v3800_v62  ;;  %v3798_v54 = vadd.f32 %v3794_v50, %v3777_v56  ;;  %v4912_v51 = vpack.c.bf16 %v3987_v48, %v3986_v60  ;;  %v3988_v56 = vld [vmem:[%s6213_s16 + $0x20] sm:$0xff] }
0x1974   :  { %v3801_v21 = vmul.f32 0.7978846, %v3797_v5  ;;  %v4915_v59 = vpack.c.bf16 %v3989_v33, %v3988_v56 }
0x1975   :  { %v3802_v36 = vmul.f32 0.7978846, %v3798_v54 }
0x1976   :  { %5035 = vtanh.f32 %v3801_v21  ;;  %v4328_v21 = vld [vmem:[%s6211_s14 + $0x1] ss:$0 sm:$0xff] }
0x1977   :  { %5037 = vtanh.f32 %v3802_v36 }
0x197c   :  { %v5032_v6 = vpop.eup %5031 }
0x197d   :  { %v5034_v7 = vpop.eup %5033  ;;  %v3807_v47 = vadd.f32 1.0, %v5032_v6 }
0x197e   :  { %v3808_v8 = vadd.f32 1.0, %v5034_v7 }
0x197f   :  { %v3811_v12 = vmul.f32 %v3807_v47, %v3779_v9  ;;  %v4329_v47 = vld [vmem:[%s6212_s15 + $0x1] ss:$0 sm:$0xff] }
0x1980   :  { %v5036_v10 = vpop.eup %5035  ;;  %v3812_v58 = vmul.f32 %v3808_v8, %v3780_v38  ;;  %v4073_v38 = vld [vmem:[%s6215_s18] sm:$0xff]  ;;  %v4074_v8 = vld [vmem:[%s6215_s18 + $0x8] sm:$0xff] }
0x1981   :  { %v5038_v11 = vpop.eup %5037  ;;  %v3809_v13 = vadd.f32 1.0, %v5036_v10 }
0x1982   :  { %3920 = vmatprep.mubr.f32.mxu1 %v3812_v58  ;;  %v3810_v4 = vadd.f32 1.0, %v5038_v11  ;;  %v4921_v11 = vpack.c.bf16 %v4074_v8, %v4073_v38 }
0x1983   :  { %3921 = vmatmul.mubr.f32.vlgmr.msra.gmra.mrb[40].mxu1 %v3811_v12  ;;  %v3813_v16 = vmul.f32 %v3809_v13, %v3781_v15  ;;  %v4075_v12 = vld [vmem:[%s6215_s18 + $0x10] sm:$0xff]  ;;  %v4076_v13 = vld [vmem:[%s6215_s18 + $0x18] sm:$0xff]  ;;  %v4077_v15 = vld [vmem:[%s6215_s18 + $0x20] sm:$0xff] }
0x1984   :  { %v3814_v53 = vmul.f32 %v3810_v4, %v3782_v14  ;;  %v4924_v4 = vpack.c.bf16 %v4076_v13, %v4075_v12 }
0x1986   :  { %3925 = vmatprep.mubr.f32.mxu1 %v3814_v53  ;;  %v4078_v53 = vld [vmem:[%s6215_s18 + $0x28] sm:$0xff] }
0x1987   :  { %3926 = vmatmul.mubr.f32.gmra.mrb[42].mxu1 %v3813_v16  ;;  %v4927_v16 = vpack.c.bf16 %v4078_v53, %v4077_v15 }
0x1a56   :  { %v4488_v17 = vpop.f32.mrb[40].mxu1 }
0x1a57   :  { %v4489_v18 = vpop.f32.mrb[41].mxu1 }
0x1a58   :  { %v4490_v22 = vadd.f32 %v4489_v18, %v4488_v17  ;;  %v4079_v17 = vld [vmem:[%s6215_s18 + $0x30] sm:$0xff]  ;;  %v4330_v18 = vld [vmem:[%s6214_s17] ss:$0 sm:$0xff] }
0x1a5a   :  { %v3923_v19 = vadd.f32 %v4490_v22, %v4325_v40  ;;  %v4491_v23 = vpop.f32.mrb[42].mxu1 }
0x1a5b   :  { %v4492_v24 = vpop.f32.mrb[43].mxu1 }
0x1a5c   :  { %v4493_v25 = vadd.f32 %v4492_v24, %v4491_v23  ;;  %v3931_v26 = vadd.f32 %v3923_v19, %v6012_v57 }
0x1a5e   :  { %v3928_v27 = vadd.f32 %v4493_v25, %v4325_v40  ;;  %v3937_v28 = vsel %vm70_vm0, %v3931_v26, 0.0  ;;  %v4332_v25 = vld [vmem:[%s6216_s19] ss:$0 sm:$0xff] }
0x1a5f   :  { %3938 = vadd.xlane.f32.xlu1 %v3937_v28 }
0x1a60   :  { %v3932_v29 = vadd.f32 %v3928_v27, %v6017_v63  ;;  %v3984_v63 = vld [vmem:[%s6213_s16] sm:$0xff] }
0x1a61   :  { %v4909_v46 = vpack.c.bf16 %v3985_v45, %v3984_v63 }
0x1a62   :  { %v3940_v30 = vsel %vm70_vm0, %v3932_v29, 0.0 }
0x1a63   :  { %3941 = vadd.xlane.f32.xlu0 %v3940_v30  ;;  %4910 = vmatpush3.bf16.msra.mxu0 %v4909_v46 }
0x1a64   :  { %4911 = vmatprep.subr.bf16.mxu0 %v5076_v61 }
0x1a67   :  { %4913 = vmatpush3.bf16.msra.mxu0 %v4912_v51 }
0x1a68   :  { %4914 = vmatprep.subr.bf16.mxu0 %v5076_v61 }
0x1a6b   :  { %4916 = vmatpush3.bf16.msra.mxu0 %v4915_v59 }
0x1a6c   :  { %4917 = vmatprep.subr.bf16.mxu0 %v5076_v61 }
0x1a6f   :  { %4919 = vmatpush3.bf16.msra.mxu0 %v4918_v1 }
0x1a70   :  { %4920 = vmatprep.subr.bf16.mxu0 %v5076_v61 }
0x1aec   :  { %v3939_v31 = vpop.xlane.xlu1 %3938 }
0x1aed   :  { %v3943_v32 = vmul.f32 0.015625, %v3939_v31 }
0x1aef   :  { %v3945_v34 = vsub.f32 %v3931_v26, %v3943_v32 }
0x1af0   :  { %v3942_v35 = vpop.xlane.xlu0 %3941 }
0x1af1   :  { %v3944_v37 = vmul.f32 0.015625, %v3942_v35  ;;  %v3947_v39 = vmul.f32 %v3945_v34, %v3945_v34 }
0x1af3   :  { %v3946_v41 = vsub.f32 %v3932_v29, %v3944_v37  ;;  %v3949_v42 = vsel %vm70_vm0, %v3947_v39, 0.0 }
0x1af4   :  { %3950 = vadd.xlane.f32.xlu1 %v3949_v42 }
0x1af5   :  { %v3948_v57 = vmul.f32 %v3946_v41, %v3946_v41 }
0x1af7   :  { %v3952_v44 = vsel %vm70_vm0, %v3948_v57, 0.0 }
0x1af8   :  { %3953 = vadd.xlane.f32.xlu0 %v3952_v44 }
0x1b81   :  { %v3951_v43 = vpop.xlane.xlu1 %3950 }
0x1b82   :  { %v3955_v55 = vmul.f32 0.015625, %v3951_v43 }
0x1b84   :  { %v3957_v49 = vadd.f32 1e-05, %v3955_v55 }
0x1b85   :  { %v3954_v2 = vpop.xlane.xlu0 %3953 }
0x1b86   :  { %5039 = vrsqrt.f32 %v3957_v49  ;;  %v3956_v3 = vmul.f32 0.015625, %v3954_v2 }
0x1b88   :  { %v3958_v62 = vadd.f32 1e-05, %v3956_v3 }
0x1b8a   :  { %5041 = vrsqrt.f32 %v3958_v62 }
0x1b90   :  { %v5040_v50 = vpop.eup %5039 }
0x1b91   :  { %v3961_v5 = vmul.f32 %v5040_v50, %v3945_v34 }
0x1b93   :  { %v3969_v6 = vmul.f32 %v4328_v21, %v3961_v5 }
0x1b94   :  { %v5042_v54 = vpop.eup %5041 }
0x1b95   :  { %v3962_v36 = vmul.f32 %v5042_v54, %v3946_v41  ;;  %v3977_v10 = vadd.f32 %v4329_v47, %v3969_v6 }
0x1b97   :  { %v3970_v7 = vmul.f32 %v4328_v21, %v3962_v36 }
0x1b99   :  { %v3978_v9 = vadd.f32 %v4329_v47, %v3970_v7 }
0x1b9b   :  { %v3980_v58 = vrot.slane %v3978_v9, 7 }
0x1b9d   :  { %v3983_v14 = vsel %vm3982_vm6, %v3977_v10, %v3980_v58 }
0x1b9e   :  { %4727 = vmatmul.mubr.msk.f32.vlgmr.msra.gmra.mrb[48].mxu0 %vm70_vm0, %v3983_v14 }
0x1b9f   :  { %4922 = vmatpush3.bf16.msra.mxu0 %v4921_v11  ;;  %4745 = vmatprep.mubr.msk.f32.mxu0 %vm5068_vm1, %v5067_v20  ;;  %v4080_v20 = vld [vmem:[%s6215_s18 + $0x38] sm:$0xff]  ;;  %s5043_s18 = scalar_lea.vmem %s4169_s3, 32 }
0x1ba0   :  { %4923 = vmatprep.subr.bf16.mxu0 %v5076_v61  ;;  %v4930_v40 = vpack.c.bf16 %v4080_v20, %v4079_v17  ;;  %p5044_p0 = scmp.ne.s32.totalorder %s4169_s3, %s5043_s18  ;;  %p5049_p2 = scmp.lt.s32.totalorder %s5043_s18, %s5043_s18 }
0x1ba2   :  { %p5050_p3 = por %p5049_p2, %p5048_p1 }
0x1ba3   :  { %4925 = vmatpush3.bf16.msra.mxu0 %v4924_v4 }
0x1ba4   :  { %4926 = vmatprep.subr.bf16.mxu0 %v5076_v61  ;;  %p5051_p4 = pnand %p5050_p3, %p5044_p0 }
0x1ba7   :  { %4928 = vmatpush3.bf16.msra.mxu0 %v4927_v16 }
0x1ba8   :  { %4929 = vmatprep.subr.bf16.mxu0 %v5076_v61 }
0x1bab   :  { %4931 = vmatpush3.bf16.msra.mxu0 %v4930_v40 }
0x1c71   :  { %v4068_v22 = vpop.f32.mrb[48].mxu0 }
0x1c72   :  { %v4069_v19 = vadd.f32 %v4330_v18, %v4068_v22  ;;  %v4728_v23 = vpop.f32.mrb[49].mxu0 }
0x1c74   :  { %v4072_v24 = vmax.f32 %v4069_v19, 0.0 }
0x1c76   :  { %4746 = vmatmul.mubr.msk.f32.vlgmr.msra.gmra.mrb[50].mxu0 %vm70_vm0, %v4072_v24 }
0x1d49   :  { %v4157_v26 = vpop.f32.mrb[50].mxu0 }
0x1d4a   :  { %v4158_v27 = vadd.f32 %v4332_v25, %v4157_v26  ;;  %v4747_v28 = vpop.f32.mrb[51].mxu0 }
0x1d4c   :  { %4161 = vst [vmem:[#allocation2] sm:$0x3] %v4158_v27 }
0x1d4d   :  { %5054 = shalt.err (!%p5051_p4)
}
0x1d4e   :  { %s5055_s24 = scalar_lea.hbm %s6217_s20, 32 }
0x1d4f   :  { %p5056_p5 = scmp.ne.s32.totalorder %s6217_s20, %s5055_s24  ;;  %p5059_p6 = scmp.lt.u32.totalorder %s5055_s24, %s6217_s20 }
0x1d51   :  { %p5061_p7 = pnand %p5059_p6, %p5056_p5 }
0x1d53   :  { %5064 = shalt.err (!%p5061_p7)
}
0x1d54   :  { %4171 = dma.vmem_to_hbm [thread:$0]  %s4169_s3, 32, %s6217_s20, [#allocation3]  }
0x1d55   :  { %5065 = dma.done.wait [#allocation3], 32  }
0x1d56   :  { %5066 = vsyncadd [#allocation3], 4294967264 }
0x1d57   :  { %4175 = vsyncpa [#allocation3], 1 }

</bundles_post_ra>
